<compile_context>
chip_gen: v5e
topology: v5e:2x2
jax: 0.10.0
libtpu: 0.0.40
codegen_flags: <defaults>
</compile_context>

<pallas_src>
import functools

import jax
import jax.numpy as jnp
from jax import lax
from jax.experimental import pallas as pl
from jax.experimental.pallas import tpu as pltpu


# Required on v5e (scoped default 16 MiB); well under v7x's 64 MiB physical VMEM.
VMEM_LIMIT_BYTES = 32 * 1024 * 1024


def _round_up(x, m):
    return (x + m - 1) // m * m


# ----------------------------------------------------------------------------
# Kernel 1: tiled matmul with K-reduction accumulator (+ bias, optional leaky)
# ----------------------------------------------------------------------------
def _matmul_kernel(a_ref, w_ref, b_ref, o_ref, acc_ref, *, leaky):
    k = pl.program_id(2)

    @pl.when(k == 0)
    def _():
        acc_ref[...] = jnp.zeros_like(acc_ref)

    acc_ref[...] += jnp.dot(a_ref[...], w_ref[...],
                            preferred_element_type=jnp.float32)

    @pl.when(k == pl.num_programs(2) - 1)
    def _():
        y = acc_ref[...] + b_ref[...]           # bias only in the epilogue
        if leaky:
            y = jnp.where(y > 0, y, 0.1 * y)
        o_ref[...] = y.astype(o_ref.dtype)


def _pad2d(x, rows, cols, dtype):
    r, c = x.shape
    x = x.astype(dtype)
    if r == rows and c == cols:
        return x
    return jnp.zeros((rows, cols), dtype).at[:r, :c].set(x)


def pallas_matmul(a, w, b, *, leaky=False, out_dtype=jnp.float32,
                  tm=128, tn=256, tk=4096):
    """o = a @ w + b (optionally leaky-relu).  a:[M,K] w:[K,N] b:[1,N].

    bf16 operands on the MXU, f32 accumulation.  Defaults collapse the grid
    (these calls are weight-DMA-bound at tiny M): tk covers the whole padded K
    so the reduction axis is a single step; tn=256 keeps a 2-way "parallel"
    N split so v7x's second TensorCore is not idle (one extra ~0.35us step on
    v5e/v6e, negligible vs. the HBM weight transfer).
    """
    M, K = a.shape
    Kw, N = w.shape
    assert K == Kw
    tm = min(tm, _round_up(M, 8))
    tn = min(tn, _round_up(N, 128))
    tk = min(tk, _round_up(K, 128))
    Mp, Np, Kp = _round_up(M, tm), _round_up(N, tn), _round_up(K, tk)

    a_p = _pad2d(a, Mp, Kp, jnp.bfloat16)
    w_p = _pad2d(w, Kp, Np, jnp.bfloat16)
    b_p = _pad2d(b, 1, Np, jnp.float32)

    out = pl.pallas_call(
        functools.partial(_matmul_kernel, leaky=leaky),
        out_shape=jax.ShapeDtypeStruct((Mp, Np), out_dtype),
        grid=(Mp // tm, Np // tn, Kp // tk),
        in_specs=[
            pl.BlockSpec((tm, tk), lambda i, j, k: (i, k)),
            pl.BlockSpec((tk, tn), lambda i, j, k: (k, j)),
            pl.BlockSpec((1, tn), lambda i, j, k: (0, j)),
        ],
        out_specs=pl.BlockSpec((tm, tn), lambda i, j, k: (i, j)),
        scratch_shapes=[pltpu.VMEM((tm, tn), jnp.float32)],
        compiler_params=pltpu.CompilerParams(
            dimension_semantics=("parallel", "parallel", "arbitrary"),
            vmem_limit_bytes=VMEM_LIMIT_BYTES),
    )(a_p, w_p, b_p)
    return out[:M, :N]


# ----------------------------------------------------------------------------
# Kernel 2: fused cls+reg conv3x3 stacks + lane-dense 1x1 heads (+ box decode)
# ----------------------------------------------------------------------------
def _heads_kernel(x_ref, wl_ref, bl_ref, wh_ref, bh_ref, g_ref, o_ref,
                  cur_ref, slab_ref, *, H, W, n_layers, scale, center_sample):
    """Grid = (branch, layer).  branch 0 = cls (n_layers[0] real conv layers),
    branch 1 = reg (n_layers[1]).  The branch axis is "parallel" (one branch
    per TensorCore on v7x), the layer axis "arbitrary" (sequential).

    cur_ref  : resident [M, C] f32 activation (M = B*H*W, NHWC row order).
    slab_ref : [M, 9*C] bf16 im2col slab rebuilt in VMEM each layer.
    wl_ref   : streamed [9*C, C] bf16 weights of the current layer
               (row = tap*C + cin, tap = ky*3 + kx).
    Note: the reference cls_feat/reg_feat are plain stacked nn.Conv2d (no BN,
    no activation), so bias-only between layers is faithful to the spec.
    """
    br = pl.program_id(0)
    l = pl.program_id(1)
    last = pl.num_programs(1) - 1
    M, C = cur_ref.shape
    HW = H * W

    @pl.when(l == 0)
    def _():
        cur_ref[...] = x_ref[...]

    # cls-branch steps past its real layer count repeat the previous weight
    # block index (DMA elided by the pipeline) and skip compute here.
    active = jnp.logical_or(br == 1, l < n_layers[0])

    @pl.when(active)
    def _():
        cur = cur_ref[...]                                    # [M, C] f32
        # In-kernel zero-padding masks from row-index iota (no HBM mask input).
        rows = lax.broadcasted_iota(jnp.int32, (M, C), 0)
        hh = (rows % HW) // W
        ww = rows % W
        # Build the [M, 9*C] im2col slab from the resident activation:
        # static sublane rotation on the XLU (no materialized slice copies),
        # mask applied in f32, bf16 cast fused into the slab store.
        for tap in range(9):
            dy, dx = tap // 3 - 1, tap % 3 - 1
            off = dy * W + dx                                 # source row offset
            s = (-off) % M                                    # src[m] = cur[m+off]
            src = pltpu.roll(cur, shift=s, axis=0) if s else cur
            valid = ((hh + dy >= 0) & (hh + dy < H)
                     & (ww + dx >= 0) & (ww + dx < W))
            slab_ref[:, tap * C:(tap + 1) * C] = (
                jnp.where(valid, src, 0.0).astype(jnp.bfloat16))
        # Single long-K dot per layer (amortizes MXU weight pushes at tiny M).
        cur_ref[...] = (jnp.dot(slab_ref[...], wl_ref[...],
                                preferred_element_type=jnp.float32)
                        + bl_ref[...])

    @pl.when(l == last)
    def _():
        # Fused lane-dense 1x1 head.
        y = (jnp.dot(cur_ref[...].astype(jnp.bfloat16), wh_ref[...],
                     preferred_element_type=jnp.float32) + bh_ref[...])
        # Reg-branch box decode fused into the epilogue.
        # Lane packing (branch 1): 0 = obj logit, 1..2 = tx,ty, 3..4 = tw,th.
        lane = lax.broadcasted_iota(jnp.int32, y.shape, 1)
        g = g_ref[...]                                        # grid x/y in lanes 1..2
        sig = jax.nn.sigmoid(y)
        if center_sample:
            xy = (sig * 2.0 - 1.0 + g) * scale
        else:
            xy = (sig + g) * scale
        wh = jnp.exp(y) * scale
        # NOTE: sigmoid/exp run over the whole 128-lane slab; the where chain
        # discards the obj/padding lanes before any 0*inf can appear.
        y_dec = jnp.where(lane == 0, y,
                          jnp.where(lane < 3, xy,
                                    jnp.where(lane < 5, wh, 0.0)))
        reg_f = (br == 1).astype(jnp.float32)                 # 0.0 cls / 1.0 reg
        o_ref[...] = y + reg_f * (y_dec - y)


def pallas_heads(x_flat, layer_w, layer_b, head_w, head_b, grid_lanes,
                 *, H, W, n_layers, scale, center_sample):
    """x_flat:[M,C] f32, layer_w:[Lc+Lr, 9*C, C], head_w:[2, C, NH].

    Returns [2, M, NH] f32: row 0 = cls-head logits, row 1 = obj | decoded box.
    """
    # TODO(synk): at realistic image sizes / batch, add an M (sublane) tile
    # grid axis with a +/-W-row halo instead of keeping the whole [M,C]
    # activation resident, and stream int8 (v5e/v6e) / fp8 (v7x) weights.
    M, C = x_flat.shape
    NH = head_w.shape[-1]
    L_cls, L_reg = n_layers
    assert layer_w.shape[0] == L_cls + L_reg and L_reg >= L_cls
    L = L_reg

    def w_idx(br, l):
        # cls branch: clamp to its last real layer (repeated index -> DMA
        # elided); reg branch: its layers live at offset L_cls.
        return (1 - br) * jnp.minimum(l, L_cls - 1) + br * (l + L_cls)

    kernel = functools.partial(_heads_kernel, H=H, W=W, n_layers=n_layers,
                               scale=float(scale), center_sample=center_sample)
    return pl.pallas_call(
        kernel,
        out_shape=jax.ShapeDtypeStruct((2, M, NH), jnp.float32),
        grid=(2, L),
        in_specs=[
            pl.BlockSpec((M, C), lambda br, l: (0, 0)),            # resident x
            pl.BlockSpec((None, 9 * C, C),
                         lambda br, l: (w_idx(br, l), 0, 0)),      # streamed W
            pl.BlockSpec((None, 1, C),
                         lambda br, l: (w_idx(br, l), 0, 0)),      # streamed b
            pl.BlockSpec((None, C, NH), lambda br, l: (br, 0, 0)),  # 1x1 head W
            pl.BlockSpec((None, 1, NH), lambda br, l: (br, 0, 0)),  # 1x1 head b
            pl.BlockSpec((M, NH), lambda br, l: (0, 0)),            # grid lanes
        ],
        out_specs=pl.BlockSpec((None, M, NH), lambda br, l: (br, 0, 0)),
        scratch_shapes=[pltpu.VMEM((M, C), jnp.float32),
                        pltpu.VMEM((M, 9 * C), jnp.bfloat16)],
        compiler_params=pltpu.CompilerParams(
            dimension_semantics=("parallel", "arbitrary"),
            vmem_limit_bytes=VMEM_LIMIT_BYTES),
    )(x_flat.astype(jnp.float32),
      layer_w.astype(jnp.bfloat16),
      layer_b.astype(jnp.float32),
      head_w.astype(jnp.bfloat16),
      head_b.astype(jnp.float32),
      grid_lanes.astype(jnp.float32))


def _maxpool_same(x, k):
    return lax.reduce_window(x, -jnp.inf, lax.max,
                             (1, k, k, 1), (1, 1, 1, 1), 'SAME')


# ----------------------------------------------------------------------------
# Model
# ----------------------------------------------------------------------------
class YOLOv1Pallas:
    def __init__(self, img_size=64, num_classes=20, center_sample=False,
                 seed=0):
        assert img_size % 32 == 0
        self.img_size = img_size
        self.num_classes = num_classes
        self.center_sample = center_sample
        self.feature_dim = 512
        self.stride = 32
        self.head_lanes = _round_up(max(num_classes, 5), 128)
        self.grid_xy = self._create_grids(img_size)            # [HW, 2]
        self.p = self._init_params(seed)

    # -- grids ----------------------------------------------------------------
    def _create_grids(self, img_size):
        fmp_h = fmp_w = img_size // self.stride
        # Faithful to the reference:
        #   grid_y, grid_x = torch.meshgrid([arange(fh), arange(fw)])  # [fh,fw]
        #   grid_xy = torch.cat([grid_x, grid_y], dim=-1).float().view(-1, 2)
        # The reference cats two *2-D* [fh, fw] tensors along the last axis,
        # so view(-1, 2) interleaves values; we reproduce that bit-exactly
        # instead of "fixing" it to a stacked (x, y) grid.
        gy, gx = jnp.meshgrid(jnp.arange(fmp_h), jnp.arange(fmp_w),
                              indexing='ij')
        grid_xy = jnp.concatenate([gx, gy], axis=-1).astype(jnp.float32)
        return grid_xy.reshape(-1, 2)

    def _grid_lanes(self, B, HW):
        # grid x/y placed on lanes 1,2 so they line up with tx,ty in the packed
        # (obj | tx ty tw th | pad) reg-head output.
        g = jnp.zeros((HW, self.head_lanes), jnp.float32).at[:, 1:3].set(
            self.grid_xy)
        return jnp.tile(g, (B, 1))

    # -- parameters -----------------------------------------------------------
    def _init_params(self, seed):
        D = self.feature_dim
        C = self.num_classes
        NH = self.head_lanes
        ks = list(jax.random.split(jax.random.PRNGKey(seed), 12))
        s = 0.02

        def rnd(k, shape):
            return s * jax.random.normal(k, shape, jnp.float32)

        p = {}
        # TODO(synk): Darknet53 source not provided; stand-in = 32x32/stride-32
        # patchify conv (3->512) + leaky-relu ([B,3,H,W] -> [B,512,H/32,W/32]).
        p['backbone_w'] = rnd(ks[0], (3 * 32 * 32, D))
        p['backbone_b'] = rnd(ks[1], (1, D))
        # TODO(synk): SPP source not provided; stand-in = {id, maxpool 5/9/13}
        # concat + 1x1 conv (2048 -> 512).
        p['spp_w'] = rnd(ks[2], (4 * D, D))
        p['spp_b'] = rnd(ks[3], (1, D))
        # 3x3 conv stacks: layers 0..1 = cls, 2..5 = reg, stored as
        # [layer, 9*Cin, Cout] with tap-major rows (tap = ky*3+kx); a torch
        # Conv2d weight [Cout,Cin,3,3] maps via transpose(2,3,1,0) + reshape.
        p['layer_w'] = rnd(ks[4], (2 + 4, 9 * D, D))
        p['layer_b'] = rnd(ks[5], (2 + 4, 1, D))
        # 1x1 heads, lane-dense packed into NH(=128)-lane slabs:
        #   branch 0 (cls): lanes 0..C-1 = class logits
        #   branch 1 (reg): lane 0 = obj logit, lanes 1..4 = tx,ty,tw,th
        cls_w = rnd(ks[6], (D, C)); cls_b = rnd(ks[7], (1, C))
        obj_w = rnd(ks[8], (D, 1)); obj_b = rnd(ks[9], (1, 1))
        reg_w = rnd(ks[10], (D, 4)); reg_b = rnd(ks[11], (1, 4))
        head_w = (jnp.zeros((2, D, NH), jnp.float32)
                  .at[0, :, :C].set(cls_w)
                  .at[1, :, 0:1].set(obj_w).at[1, :, 1:5].set(reg_w))
        head_b = (jnp.zeros((2, 1, NH), jnp.float32)
                  .at[0, :, :C].set(cls_b)
                  .at[1, :, 0:1].set(obj_b).at[1, :, 1:5].set(reg_b))
        p['head_w'] = head_w
        p['head_b'] = head_b
        # TODO(synk): per the perf review, layer/backbone weights could stream
        # as int8 (v5e/v6e) or fp8 (v7x) with dequant scales folded into the
        # epilogue bias to halve HBM weight traffic; kept bf16 here to stay
        # numerically close to the f32 reference.
        return p

    # -- stages ---------------------------------------------------------------
    def _backbone(self, x_nchw):
        x = jnp.transpose(x_nchw, (0, 2, 3, 1))               # NHWC
        B, H, W, Ci = x.shape
        fh, fw = H // 32, W // 32
        patches = x.reshape(B, fh, 32, fw, 32, Ci)
        patches = jnp.transpose(patches, (0, 1, 3, 2, 4, 5))
        patches = patches.reshape(B * fh * fw, 32 * 32 * Ci)
        y = pallas_matmul(patches, self.p['backbone_w'], self.p['backbone_b'],
                          leaky=True)
        return y.reshape(B, fh, fw, self.feature_dim)

    def _spp(self, x):
        pooled = jnp.concatenate(
            [x, _maxpool_same(x, 5), _maxpool_same(x, 9), _maxpool_same(x, 13)],
            axis=-1)
        B, H, W, _ = pooled.shape
        y = pallas_matmul(pooled.reshape(B * H * W, -1),
                          self.p['spp_w'], self.p['spp_b'])
        return y.reshape(B, H, W, self.feature_dim)

    # -- forward --------------------------------------------------------------
    def __call__(self, x_nchw):
        # NOTE: the torch forward with trainable=False discards the result of
        # inference_single_image (returns None); both branches compute the same
        # tensors, which we compute and return here.
        B = x_nchw.shape[0]
        C = self.num_classes
        D = self.feature_dim

        feat = self._backbone(x_nchw)                          # [B, fh, fw, 512]
        feat = self._spp(feat)

        _, fh, fw, _ = feat.shape
        HW = fh * fw
        M = B * HW
        x_flat = feat.reshape(M, D)
        grid_lanes = self._grid_lanes(B, HW)

        # One fused call: cls (2x conv3x3 + cls 1x1 head) and reg (4x conv3x3 +
        # {obj, box} 1x1 head + fused box decode) as parallel grid branches.
        out = pallas_heads(
            x_flat, self.p['layer_w'], self.p['layer_b'],
            self.p['head_w'], self.p['head_b'], grid_lanes,
            H=fh, W=fw, n_layers=(2, 4),
            scale=self.stride / self.img_size,
            center_sample=self.center_sample)

        cls_pred = out[0, :, :C].reshape(B, HW, C)
        obj_pred = out[1, :, 0:1].reshape(B, HW, 1)
        bbox_pred = out[1, :, 1:5].reshape(B, HW, 4)
        return obj_pred, cls_pred, bbox_pred


if __name__ == "__main__":
    B, img_size, num_classes = 2, 64, 20
    key = jax.random.PRNGKey(0)
    x = jax.random.normal(key, (B, 3, img_size, img_size), jnp.float32)

    model = YOLOv1Pallas(img_size=img_size, num_classes=num_classes)
    obj_pred, cls_pred, bbox_pred = model(x)
    jax.block_until_ready((obj_pred, cls_pred, bbox_pred))

    HW = (img_size // 32) ** 2
    assert obj_pred.shape == (B, HW, 1)
    assert cls_pred.shape == (B, HW, num_classes)
    assert bbox_pred.shape == (B, HW, 4)
    assert bool(jnp.all(jnp.isfinite(obj_pred)))
    assert bool(jnp.all(jnp.isfinite(cls_pred)))
    assert bool(jnp.all(jnp.isfinite(bbox_pred)))
    print("KERNEL_OK")
</pallas_src>

<mosaic_0001>
module attributes {stable_mosaic.version = 11 : i64} {
  func.func @_matmul_kernel(%arg0: i32, %arg1: i32, %arg2: i32, %arg3: memref<8x3072xbf16, #tpu.memory_space<vmem>>, %arg4: memref<3072x256xbf16, #tpu.memory_space<vmem>>, %arg5: memref<1x256xf32, #tpu.memory_space<vmem>>, %arg6: memref<8x256xf32, #tpu.memory_space<vmem>>, %arg7: memref<8x256xf32, #tpu.memory_space<vmem>>) attributes {dimension_semantics = [#tpu.dimension_semantics<parallel>, #tpu.dimension_semantics<parallel>, #tpu.dimension_semantics<arbitrary>], iteration_bounds = array<i64: 1, 2, 1>, scalar_prefetch = 0 : i64, scratch_operands = 1 : i64, tpu.core_type = #tpu.core_type<tc>, window_params = [{transform_indices = @transform_0, window_bounds = array<i64: 8, 3072>}, {transform_indices = @transform_1, window_bounds = array<i64: 3072, 256>}, {transform_indices = @transform_2, window_bounds = array<i64: 1, 256>}, {transform_indices = @transform_3, window_bounds = array<i64: 8, 256>}]} {
    %c0_i32 = arith.constant 0 : i32
    %0 = arith.cmpi eq, %arg2, %c0_i32 : i32
    %1 = arith.extui %0 : i1 to i32
    %c0_i32_0 = arith.constant 0 : i32
    %2 = arith.cmpi ne, %1, %c0_i32_0 : i32
    scf.if %2 {
      %cst_10 = arith.constant 0.000000e+00 : f32
      %12 = vector.broadcast %cst_10 : f32 to vector<8x256xf32>
      %c0_11 = arith.constant 0 : index
      %c0_12 = arith.constant 0 : index
      %13 = vector.load %arg7[%c0_11, %c0_12] : memref<8x256xf32, #tpu.memory_space<vmem>>, vector<8x256xf32>
      tpu.vector_store %arg7[%c0_11, %c0_12], %12 {strides = array<i32>} : memref<8x256xf32, #tpu.memory_space<vmem>>, vector<8x256xf32>,
    } else {
    }
    %c0 = arith.constant 0 : index
    %c0_1 = arith.constant 0 : index
    %3 = vector.load %arg7[%c0, %c0_1] : memref<8x256xf32, #tpu.memory_space<vmem>>, vector<8x256xf32>
    %c0_2 = arith.constant 0 : index
    %c0_3 = arith.constant 0 : index
    %4 = vector.load %arg3[%c0_2, %c0_3] : memref<8x3072xbf16, #tpu.memory_space<vmem>>, vector<8x3072xbf16>
    %c0_4 = arith.constant 0 : index
    %c0_5 = arith.constant 0 : index
    %5 = vector.load %arg4[%c0_4, %c0_5] : memref<3072x256xbf16, #tpu.memory_space<vmem>>, vector<3072x256xbf16>
    %cst = arith.constant dense<0.000000e+00> : vector<8x256xf32>
    %6 = tpu.matmul %4, %5, %cst {dimension_numbers = #tpu.dot_dimension_numbers<[1], [0], [0], [1], [0, 0, 1, 1], [], []>} : vector<8x3072xbf16>, vector<3072x256xbf16>, vector<8x256xf32> -> vector<8x256xf32>
    %7 = arith.addf %3, %6 : vector<8x256xf32>
    %c0_6 = arith.constant 0 : index
    %c0_7 = arith.constant 0 : index
    %8 = vector.load %arg7[%c0_6, %c0_7] : memref<8x256xf32, #tpu.memory_space<vmem>>, vector<8x256xf32>
    tpu.vector_store %arg7[%c0_6, %c0_7], %7 {strides = array<i32>} : memref<8x256xf32, #tpu.memory_space<vmem>>, vector<8x256xf32>,
    %c0_i32_8 = arith.constant 0 : i32
    %9 = arith.cmpi eq, %arg2, %c0_i32_8 : i32
    %10 = arith.extui %9 : i1 to i32
    %c0_i32_9 = arith.constant 0 : i32
    %11 = arith.cmpi ne, %10, %c0_i32_9 : i32
    scf.if %11 {
      %c0_10 = arith.constant 0 : index
      %c0_11 = arith.constant 0 : index
      %12 = vector.load %arg7[%c0_10, %c0_11] : memref<8x256xf32, #tpu.memory_space<vmem>>, vector<8x256xf32>
      %c0_12 = arith.constant 0 : index
      %c0_13 = arith.constant 0 : index
      %13 = vector.load %arg5[%c0_12, %c0_13] : memref<1x256xf32, #tpu.memory_space<vmem>>, vector<1x256xf32>
      %14 = vector.broadcast %13 : vector<1x256xf32> to vector<8x256xf32>
      %15 = arith.addf %12, %14 : vector<8x256xf32>
      %cst_14 = arith.constant 0.000000e+00 : f32
      %16 = vector.broadcast %cst_14 : f32 to vector<8x256xf32>
      %17 = arith.cmpf ogt, %15, %16 : vector<8x256xf32>
      %cst_15 = arith.constant 1.000000e-01 : f32
      %18 = vector.broadcast %cst_15 : f32 to vector<8x256xf32>
      %19 = arith.mulf %18, %15 : vector<8x256xf32>
      %20 = arith.select %17, %15, %19 : vector<8x256xi1>, vector<8x256xf32>
      %c0_16 = arith.constant 0 : index
      %c0_17 = arith.constant 0 : index
      %21 = vector.load %arg6[%c0_16, %c0_17] : memref<8x256xf32, #tpu.memory_space<vmem>>, vector<8x256xf32>
      tpu.vector_store %arg6[%c0_16, %c0_17], %20 {strides = array<i32>} : memref<8x256xf32, #tpu.memory_space<vmem>>, vector<8x256xf32>,
    } else {
    }
    return
  }
  func.func @transform_0(%arg0: i32, %arg1: i32, %arg2: i32) -> (i32, i32) {
    %c0_i32 = arith.constant 0 : i32
    return %arg0, %arg2 : i32, i32
  }
  func.func @transform_1(%arg0: i32, %arg1: i32, %arg2: i32) -> (i32, i32) {
    %c0_i32 = arith.constant 0 : i32
    return %arg2, %arg1 : i32, i32
  }
  func.func @transform_2(%arg0: i32, %arg1: i32, %arg2: i32) -> (i32, i32) {
    %c0_i32 = arith.constant 0 : i32
    %c0_i32_0 = arith.constant 0 : i32
    return %c0_i32, %arg1 : i32, i32
  }
  func.func @transform_3(%arg0: i32, %arg1: i32, %arg2: i32) -> (i32, i32) {
    %c0_i32 = arith.constant 0 : i32
    return %arg0, %arg1 : i32, i32
  }
}

</mosaic_0001>

<bundles_post_ra>
// kernel: tpu_custom_call.1
= control target key start
LH: loop header
LB: loop body
LE: loop exit
PB: predicated region body
PF: predicated region fallthrough
CT: control target
= control target key end

     0   :  { %8 = vsyncpa [#allocation4], 0  ;;  %s6788_s0 = inlined_call_operand.hbm [shape: bf16[8,3072], index: 0, kind: input, shape index: {}]   ;;  %s6789_s1 = inlined_call_operand.hbm [shape: bf16[3072,512], index: 1, kind: input, shape index: {}]   ;;  %s6790_s2 = inlined_call_operand.hbm [shape: f32[1,512], index: 2, kind: input, shape index: {}]   ;;  %s6791_s3 = inlined_call_operand.hbm [shape: f32[8,512], index: 3, kind: output, shape index: {}]  }
   0x1   :  { %9 = vsyncpa [#allocation7], 0 }
   0x2   :  { %11 = vsyncpa [#allocation7 + $0x1], 0 }
   0x3   :  { %12 = vsyncpa [#allocation5], 0 }
   0x4   :  { %14 = vsyncpa [#allocation5 + $0x1], 0  ;;  %s5710_s12 = smov 0   ;;  %s5712_s13 = smov 0  }
   0x5   :  { %s5714_s14 = smov 0   ;;  %s5716_s15 = smov 0  }
   0x6   :  { %s5718_s16 = smov 0   ;;  %s5720_s17 = smov 0  }
   0x7 LB: > { %s35_s18 = sadd.s32 1, %s5680_s16  ;;  %s76_s19 = sadd.s32 1, %s5672_s14  ;;  %s5684_s17 = sphi %s5720_s17, %s20_s17   ;;  %s5680_s16 = sphi %s5718_s16, %s6801_s16   ;;  %s5676_s15 = sphi %s5716_s15, %s6800_s15   ;;  %s5672_s14 = sphi %s5714_s14, %s6799_s14   ;;  %s5668_s13 = sphi %s5712_s13, %s6798_s13   ;;  %s5664_s12 = sphi %s5710_s12, %s6797_s12  }
   0x8   : > { %p37_p0 = scmp.ge.s32.totalorder %s35_s18, 2  ;;  %p83_p1 = scmp.ne.s32.totalorder %s5672_s14, %s5668_s13 }
   0x9   : > { %p84_p2 = scmp.eq.s32.totalorder %s5684_s17, 0  ;;  %p3489_p3 = scmp.ge.s32.totalorder %s5684_s17, 2 }
   0xa   : > { %s6803_s18 = smov (%p37_p0, %s35_s18), 0  ;;  %p5453_p5 = scmp.lt.s32.totalorder %s5684_s17, 2 }
   0xb   : > { %p85_p4 = por %p84_p2, %p83_p1  ;;  %s72_s20 = ssub.s32 %s5680_s16, %s6803_s18 }
   0xc   : > { %s184_s21 = sand.u32 1, %s5684_s17   ;;  %p74_p6 = scmp.eq.s32.totalorder %s72_s20, 0 }
   0xd   : > { %s186_s22 = sand.u32 1, %s5672_s14   ;;  %s5039_s23 = sshll.u32 %s5680_s16, 3 }
   0xe   : > { %s5758_s24 = scalar_select %p74_p6, %s5672_s14, %s76_s19  }
   0xf   : > { %s5425_s25 = smul.u32 3072, %s186_s22  ;;  %s196_s28 = scalar_lea.hbm %s6789_s1, %s5039_s23 }
  0x10   : > { %s197_s29 = sshll.u32 %s196_s28, 4  ;;  %p5765_p7 = pnand %p5453_p5, %p85_p4  ;;  %s198_s29 = int_to_ptr.hbm [resolvable:$true] %s197_s29 }
  0x11   : > { %s188_s4 = scalar_lea.vmem [#allocation6], %s5425_s25  ;;  %s5769_s6 = scalar_lea.sflag [#allocation7], %s184_s21 }
  0x12   : > { %s199_s5 = sshll.u32 %s188_s4, 4  ;;  %s5686_s7 = smov 256   ;;  %s200_s5 = int_to_ptr.vmem [resolvable:$true] %s199_s5 }
  0x13   : > { %s5687_s8 = smov 128   ;;  %s5688_s9 = smov 8  }
  0x14   : > { %5444 = dma.hbm_to_vmem [thread:$0]  (!%p5765_p7), %s198_s29, 49152, %s200_s5, %s5769_s6, %s5686_s7, %s5687_s8, %s5688_s9  }
  0x15   : > { %s5775_s10 = sadd.s32 4294967295, %s5684_s17   ;;  %s3486_s11 = sadd.s32 4294967294, %s5684_s17  }
  0x16   : > { %p89_p8 = scmp.ne.s32.totalorder %s5668_s13, %s5664_s12  ;;  %p90_p9 = scmp.eq.s32.totalorder %s5775_s10, 0 }
  0x17   : > { %p141_p10 = scmp.eq.s32.totalorder %s5775_s10, 1  ;;  %p147_p11 = scmp.eq.s32.totalorder %s3486_s11, 1 }
  0x18   : > { %p5784_p12 = por %p90_p9, %p89_p8  ;;  %p3487_p13 = scmp.ge.s32.totalorder %s5684_s17, 1 }
  0x19   : > { %p5792_p0 = por %p141_p10, %p83_p1  ;;  %p5796_p2 = por %p147_p11, %p89_p8 }
  0x1a   : > { %p154_p4 = scmp.lt.s32.totalorder %s5684_s17, 3  ;;  %s171_s26 = sshll.u32 %s6788_s0, 4  ;;  %s172_s26 = int_to_ptr.hbm [resolvable:$true] %s171_s26 }
  0x1b   : > { %s5689_s28 = smov [#allocation3]   ;;  %s3492_s4 = sshll.u32 %s186_s22, 1 }
  0x1c   : > { %p5804_p5 = pnand %p3487_p13, %p154_p4  ;;  %s173_s29 = sshll.u32 %s5689_s28, 4  ;;  %s174_s29 = int_to_ptr.vmem [resolvable:$true] %s173_s29 }
  0x1d   : > { %s3493_s5 = sshll.u32 %s5680_s16, 1  ;;  %s213_s23 = scalar_lea.vmem [#allocation8], %s3492_s4 }
  0x1e   : > { %p5437_p1 = pneg %p5804_p5  ;;  %s217_s9 = scalar_lea.hbm %s6790_s2, %s3493_s5 }
  0x1f   : > { %s219_s11 = sshll.u32 %s217_s9, 4  ;;  %s221_s25 = sshll.u32 %s213_s23, 4  ;;  %s220_s11 = int_to_ptr.hbm [resolvable:$true] %s219_s11  ;;  %s222_s25 = int_to_ptr.vmem [resolvable:$true] %s221_s25 }
  0x20   : > { %p5438_p6 = pnand %p5437_p1, %p90_p9  ;;  %230 = sbr.rel (%p5804_p5) target bundleno = 575 (0x23f), region = 32 }
  0x21   : > { %5447 = dma.hbm_to_vmem [thread:$0]  (!%p5765_p7), %s220_s11, 32, %s222_s25, %s5769_s6  }
  0x22   : > { %5440 = dma.hbm_to_vmem [thread:$0]  (!%p5438_p6), %s172_s26, 1536, %s174_s29, [#allocation4]  }
  0x25   : > { %5651 = dma.done.wait (%p90_p9), [#allocation4], 1536  }
  0x26   : > { %5653 = vsyncadd (%p90_p9), [#allocation4], 4294965760  ;;  %s237_s22 = sand.u32 1, %s5775_s10   ;;  %s5829_s28 = sand.u32 1, %s5668_s13  }
  0x27   : > { %s5426_s26 = smul.u32 3072, %s5829_s28  ;;  %s238_s29 = scalar_lea.sflag [#allocation7], %s237_s22 }
  0x29   : > { %s5832_s30 = scalar_lea.vmem [#allocation6], %s5426_s26 }
  0x2a   : > { %5655 = dma.done.wait (%p5784_p12), %s238_s29, 49184  }
  0x2b   : > { %5657 = vsyncadd (%p5784_p12), %s238_s29, 4294918112  ;;  %v3556_v0 = vld [vmem:[%s5832_s30 + $0x70] sm:$0xf]  ;;  %v5055_v1 = vld [vmem:[%s5832_s30 + $0x74] sm:$0xf0]  ;;  %s3496_s6 = sshll.u32 %s5829_s28, 1 }
  0x2c   : > { %v3620_v2 = vld [vmem:[%s5832_s30 + $0xf0] sm:$0xf]  ;;  %v3557_v3 = vor.u32 %v5055_v1, %v3556_v0  ;;  %v5071_v4 = vld [vmem:[%s5832_s30 + $0xf4] sm:$0xf0]  ;;  %v3548_v11 = vld [vmem:[%s5832_s30 + $0x60] sm:$0xf] }
  0x2d   : > { %v3684_v5 = vld [vmem:[%s5832_s30 + $0x170] sm:$0xf]  ;;  %v5087_v6 = vld [vmem:[%s5832_s30 + $0x174] sm:$0xf0]  ;;  %v3621_v7 = vor.u32 %v5071_v4, %v3620_v2  ;;  %v5053_v13 = vld [vmem:[%s5832_s30 + $0x64] sm:$0xf0] }
  0x2e   : > { %v3685_v8 = vor.u32 %v5087_v6, %v3684_v5  ;;  %v3748_v9 = vld [vmem:[%s5832_s30 + $0x1f0] sm:$0xf]  ;;  %v5103_v10 = vld [vmem:[%s5832_s30 + $0x1f4] sm:$0xf0]  ;;  %2693 = vmatpush.bf16.msra.mxu0 %v3557_v3  ;;  %v3612_v14 = vld [vmem:[%s5832_s30 + $0xe0] sm:$0xf]  ;;  %v3549_v16 = vor.u32 %v5053_v13, %v3548_v11 }
  0x2f   : > { %v3749_v12 = vor.u32 %v5103_v10, %v3748_v9  ;;  %v5069_v15 = vld [vmem:[%s5832_s30 + $0xe4] sm:$0xf0]  ;;  %2706 = vmatpush.bf16.msra.mxu1 %v3621_v7  ;;  %v3676_v18 = vld [vmem:[%s5832_s30 + $0x160] sm:$0xf]  ;;  %v3540_v23 = vld [vmem:[%s5832_s30 + $0x50] sm:$0xf] }
  0x30   : > { %2719 = vmatpush.bf16.msra.mxu2 %v3685_v8  ;;  %v3613_v17 = vor.u32 %v5069_v15, %v3612_v14  ;;  %v5085_v19 = vld [vmem:[%s5832_s30 + $0x164] sm:$0xf0]  ;;  %v3740_v20 = vld [vmem:[%s5832_s30 + $0x1e0] sm:$0xf]  ;;  %v5051_v24 = vld [vmem:[%s5832_s30 + $0x54] sm:$0xf0] }
  0x31   : > { %2732 = vmatpush.bf16.msra.mxu3 %v3749_v12  ;;  %v3677_v21 = vor.u32 %v5085_v19, %v3676_v18  ;;  %v5101_v22 = vld [vmem:[%s5832_s30 + $0x1e4] sm:$0xf0]  ;;  %v3604_v26 = vld [vmem:[%s5832_s30 + $0xd0] sm:$0xf]  ;;  %v5067_v27 = vld [vmem:[%s5832_s30 + $0xd4] sm:$0xf0]  ;;  %v3541_v29 = vor.u32 %v5051_v24, %v3540_v23 }
  0x32   : > { %v3741_v25 = vor.u32 %v5101_v22, %v3740_v20  ;;  %v3668_v28 = vld [vmem:[%s5832_s30 + $0x150] sm:$0xf]  ;;  %2694 = vmatpush.bf16.msra.mxu0 %v3549_v16  ;;  %v5083_v30 = vld [vmem:[%s5832_s30 + $0x154] sm:$0xf0]  ;;  %v3605_v33 = vor.u32 %v5067_v27, %v3604_v26  ;;  %v3532_v35 = vld [vmem:[%s5832_s30 + $0x40] sm:$0xf] }
  0x33   : > { %v3732_v31 = vld [vmem:[%s5832_s30 + $0x1d0] sm:$0xf]  ;;  %v5099_v32 = vld [vmem:[%s5832_s30 + $0x1d4] sm:$0xf0]  ;;  %2707 = vmatpush.bf16.msra.mxu1 %v3613_v17  ;;  %v3669_v34 = vor.u32 %v5083_v30, %v3668_v28  ;;  %v5049_v36 = vld [vmem:[%s5832_s30 + $0x44] sm:$0xf0] }
  0x34   : > { %2720 = vmatpush.bf16.msra.mxu2 %v3677_v21  ;;  %v3596_v37 = vld [vmem:[%s5832_s30 + $0xc0] sm:$0xf]  ;;  %v3733_v38 = vor.u32 %v5099_v32, %v3732_v31  ;;  %v5065_v39 = vld [vmem:[%s5832_s30 + $0xc4] sm:$0xf0]  ;;  %v3533_v44 = vor.u32 %v5049_v36, %v3532_v35  ;;  %v3524_v47 = vld [vmem:[%s5832_s30 + $0x30] sm:$0xf] }
  0x35   : > { %2733 = vmatpush.bf16.msra.mxu3 %v3741_v25  ;;  %v3660_v40 = vld [vmem:[%s5832_s30 + $0x140] sm:$0xf]  ;;  %v5081_v41 = vld [vmem:[%s5832_s30 + $0x144] sm:$0xf0]  ;;  %v3597_v45 = vor.u32 %v5065_v39, %v3596_v37  ;;  %v5047_v48 = vld [vmem:[%s5832_s30 + $0x34] sm:$0xf0] }
  0x36   : > { %v3724_v42 = vld [vmem:[%s5832_s30 + $0x1c0] sm:$0xf]  ;;  %v5097_v43 = vld [vmem:[%s5832_s30 + $0x1c4] sm:$0xf0]  ;;  %2695 = vmatpush.bf16.msra.mxu0 %v3541_v29  ;;  %v3661_v46 = vor.u32 %v5081_v41, %v3660_v40  ;;  %v3588_v49 = vld [vmem:[%s5832_s30 + $0xb0] sm:$0xf]  ;;  %v3525_v56 = vor.u32 %v5047_v48, %v3524_v47 }
  0x37   : > { %2708 = vmatpush.bf16.msra.mxu1 %v3605_v33  ;;  %v3725_v50 = vor.u32 %v5097_v43, %v3724_v42  ;;  %v5063_v51 = vld [vmem:[%s5832_s30 + $0xb4] sm:$0xf0]  ;;  %v3652_v52 = vld [vmem:[%s5832_s30 + $0x130] sm:$0xf]  ;;  %v3516_v59 = vld [vmem:[%s5832_s30 + $0x20] sm:$0xf] }
  0x38   : > { %2721 = vmatpush.bf16.msra.mxu2 %v3669_v34  ;;  %v5079_v53 = vld [vmem:[%s5832_s30 + $0x134] sm:$0xf0]  ;;  %v3716_v54 = vld [vmem:[%s5832_s30 + $0x1b0] sm:$0xf]  ;;  %v3589_v57 = vor.u32 %v5063_v51, %v3588_v49  ;;  %v5045_v60 = vld [vmem:[%s5832_s30 + $0x24] sm:$0xf0] }
  0x39   : > { %2734 = vmatpush.bf16.msra.mxu3 %v3733_v38  ;;  %v5095_v55 = vld [vmem:[%s5832_s30 + $0x1b4] sm:$0xf0]  ;;  %v3653_v58 = vor.u32 %v5079_v53, %v3652_v52  ;;  %v3580_v61 = vld [vmem:[%s5832_s30 + $0xa0] sm:$0xf]  ;;  %v5061_v63 = vld [vmem:[%s5832_s30 + $0xa4] sm:$0xf0]  ;;  %v3517_v4 = vor.u32 %v5045_v60, %v3516_v59 }
  0x3a   : > { %2696 = vmatpush.bf16.msra.mxu0 %v3533_v44  ;;  %v3717_v62 = vor.u32 %v5095_v55, %v3716_v54  ;;  %v3644_v0 = vld [vmem:[%s5832_s30 + $0x120] sm:$0xf]  ;;  %v5077_v1 = vld [vmem:[%s5832_s30 + $0x124] sm:$0xf0]  ;;  %v3581_v5 = vor.u32 %v5061_v63, %v3580_v61  ;;  %v3508_v7 = vld [vmem:[%s5832_s30 + $0x10] sm:$0xf] }
  0x3b   : > { %2709 = vmatpush.bf16.msra.mxu1 %v3597_v45  ;;  %v3708_v2 = vld [vmem:[%s5832_s30 + $0x1a0] sm:$0xf]  ;;  %v5093_v3 = vld [vmem:[%s5832_s30 + $0x1a4] sm:$0xf0]  ;;  %v3645_v6 = vor.u32 %v5077_v1, %v3644_v0  ;;  %v5043_v8 = vld [vmem:[%s5832_s30 + $0x14] sm:$0xf0] }
  0x3c   : > { %2722 = vmatpush.bf16.msra.mxu2 %v3661_v46  ;;  %v3572_v9 = vld [vmem:[%s5832_s30 + $0x90] sm:$0xf]  ;;  %v3709_v10 = vor.u32 %v5093_v3, %v3708_v2  ;;  %v5059_v11 = vld [vmem:[%s5832_s30 + $0x94] sm:$0xf0]  ;;  %v3509_v16 = vor.u32 %v5043_v8, %v3508_v7  ;;  %v3500_v17 = vld [vmem:[%s5832_s30] sm:$0xf] }
  0x3d   : > { %2735 = vmatpush.bf16.msra.mxu3 %v3725_v50  ;;  %v3636_v12 = vld [vmem:[%s5832_s30 + $0x110] sm:$0xf]  ;;  %v5075_v13 = vld [vmem:[%s5832_s30 + $0x114] sm:$0xf0]  ;;  %v5041_v18 = vld [vmem:[%s5832_s30 + $0x4] sm:$0xf0]  ;;  %v3573_v19 = vor.u32 %v5059_v11, %v3572_v9 }
  0x3e   : > { %2697 = vmatpush.bf16.msra.mxu0 %v3525_v56  ;;  %v3700_v14 = vld [vmem:[%s5832_s30 + $0x190] sm:$0xf]  ;;  %v5091_v15 = vld [vmem:[%s5832_s30 + $0x194] sm:$0xf0]  ;;  %v3637_v20 = vor.u32 %v5075_v13, %v3636_v12  ;;  %v3564_v21 = vld [vmem:[%s5832_s30 + $0x80] sm:$0xf]  ;;  %v3501_v31 = vor.u32 %v5041_v18, %v3500_v17 }
  0x3f   : > { %2710 = vmatpush.bf16.msra.mxu1 %v3589_v57  ;;  %v5057_v22 = vld [vmem:[%s5832_s30 + $0x84] sm:$0xf0]  ;;  %v3628_v23 = vld [vmem:[%s5832_s30 + $0x100] sm:$0xf]  ;;  %v3701_v24 = vor.u32 %v5091_v15, %v3700_v14  ;;  %v3812_v28 = vld [vmem:[%s5832_s30 + $0x270] sm:$0xf] }
  0x40   : > { %2723 = vmatpush.bf16.msra.mxu2 %v3653_v58  ;;  %v5073_v25 = vld [vmem:[%s5832_s30 + $0x104] sm:$0xf0]  ;;  %v3692_v26 = vld [vmem:[%s5832_s30 + $0x180] sm:$0xf]  ;;  %v5119_v29 = vld [vmem:[%s5832_s30 + $0x274] sm:$0xf0]  ;;  %v3565_v35 = vor.u32 %v5057_v22, %v3564_v21 }
  0x41   : > { %2736 = vmatpush.bf16.msra.mxu3 %v3717_v62  ;;  %v5089_v27 = vld [vmem:[%s5832_s30 + $0x184] sm:$0xf0]  ;;  %v3876_v30 = vld [vmem:[%s5832_s30 + $0x2f0] sm:$0xf]  ;;  %v5135_v32 = vld [vmem:[%s5832_s30 + $0x2f4] sm:$0xf0]  ;;  %v3629_v36 = vor.u32 %v5073_v25, %v3628_v23  ;;  %v3813_v40 = vor.u32 %v5119_v29, %v3812_v28 }
  0x42   : > { %2698 = vmatpush.bf16.msra.mxu0 %v3517_v4  ;;  %v3940_v33 = vld [vmem:[%s5832_s30 + $0x370] sm:$0xf]  ;;  %v5151_v34 = vld [vmem:[%s5832_s30 + $0x374] sm:$0xf0]  ;;  %v3693_v39 = vor.u32 %v5089_v27, %v3692_v26  ;;  %v3877_v41 = vor.u32 %v5135_v32, %v3876_v30  ;;  %v3804_v43 = vld [vmem:[%s5832_s30 + $0x260] sm:$0xf] }
  0x43   : > { %2711 = vmatpush.bf16.msra.mxu1 %v3581_v5  ;;  %v4004_v37 = vld [vmem:[%s5832_s30 + $0x3f0] sm:$0xf]  ;;  %v5167_v38 = vld [vmem:[%s5832_s30 + $0x3f4] sm:$0xf0]  ;;  %v3941_v42 = vor.u32 %v5151_v34, %v3940_v33  ;;  %v5117_v44 = vld [vmem:[%s5832_s30 + $0x264] sm:$0xf0] }
  0x44   : > { %2724 = vmatpush.bf16.msra.mxu2 %v3645_v6  ;;  %v3868_v45 = vld [vmem:[%s5832_s30 + $0x2e0] sm:$0xf]  ;;  %v4005_v46 = vor.u32 %v5167_v38, %v4004_v37  ;;  %v5133_v47 = vld [vmem:[%s5832_s30 + $0x2e4] sm:$0xf0]  ;;  %v3805_v52 = vor.u32 %v5117_v44, %v3804_v43  ;;  %v3796_v53 = vld [vmem:[%s5832_s30 + $0x250] sm:$0xf] }
  0x45   : > { %2737 = vmatpush.bf16.msra.mxu3 %v3709_v10  ;;  %v3932_v48 = vld [vmem:[%s5832_s30 + $0x360] sm:$0xf]  ;;  %v5149_v49 = vld [vmem:[%s5832_s30 + $0x364] sm:$0xf0]  ;;  %v3869_v54 = vor.u32 %v5133_v47, %v3868_v45  ;;  %v5115_v56 = vld [vmem:[%s5832_s30 + $0x254] sm:$0xf0] }
  0x46   : > { %2699 = vmatpush.bf16.msra.mxu0 %v3509_v16  ;;  %v3996_v50 = vld [vmem:[%s5832_s30 + $0x3e0] sm:$0xf]  ;;  %v5165_v51 = vld [vmem:[%s5832_s30 + $0x3e4] sm:$0xf0]  ;;  %v3933_v55 = vor.u32 %v5149_v49, %v3932_v48  ;;  %v3860_v57 = vld [vmem:[%s5832_s30 + $0x2d0] sm:$0xf]  ;;  %v3797_v3 = vor.u32 %v5115_v56, %v3796_v53 }
  0x47   : > { %2712 = vmatpush.bf16.msra.mxu1 %v3573_v19  ;;  %v294_v58 = vld [vmem:[#allocation3 + $0x8] sm:$0xff]  ;;  %v3997_v59 = vor.u32 %v5165_v51, %v3996_v50  ;;  %v5131_v60 = vld [vmem:[%s5832_s30 + $0x2d4] sm:$0xf0]  ;;  %v3924_v61 = vld [vmem:[%s5832_s30 + $0x350] sm:$0xf]  ;;  %s251_s10 = scalar_lea.vmem [#allocation8], %s3496_s6 }
  0x48   : > { %2725 = vmatpush.bf16.msra.mxu2 %v3637_v20  ;;  %v5147_v62 = vld [vmem:[%s5832_s30 + $0x354] sm:$0xf0]  ;;  %v703_v63 = vunpack.c.l.b16 %v294_v58  ;;  %v704_v0 = vunpack.c.h.b16 %v294_v58  ;;  %v3988_v1 = vld [vmem:[%s5832_s30 + $0x3d0] sm:$0xf]  ;;  %v293_v5 = vld [vmem:[#allocation3] sm:$0xff]  ;;  %v3861_v7 = vor.u32 %v5131_v60, %v3860_v57  ;;  %s3497_s19 = sshll.u32 %s5829_s28, 4 }
  0x49   : > { %2738 = vmatpush.bf16.msra.mxu3 %v3701_v24  ;;  %v5163_v2 = vld [vmem:[%s5832_s30 + $0x3d4] sm:$0xf0]  ;;  %v3925_v8 = vor.u32 %v5147_v62, %v3924_v61  ;;  %v3788_v9 = vld [vmem:[%s5832_s30 + $0x240] sm:$0xf]  ;;  %v5113_v10 = vld [vmem:[%s5832_s30 + $0x244] sm:$0xf0]  ;;  %v701_v12 = vunpack.c.l.b16 %v293_v5  ;;  %v702_v13 = vunpack.c.h.b16 %v293_v5 }
  0x4a   : > { %2700 = vmatpush.bf16.msra.mxu0 %v3501_v31  ;;  %v5926_v4 = vpack.c.b16 %v703_v63, %v703_v63  ;;  %v5928_v6 = vpack.c.b16 %v704_v0, %v704_v0  ;;  %v3852_v11 = vld [vmem:[%s5832_s30 + $0x2c0] sm:$0xf]  ;;  %v3989_v14 = vor.u32 %v5163_v2, %v3988_v1  ;;  %v5129_v15 = vld [vmem:[%s5832_s30 + $0x2c4] sm:$0xf0]  ;;  %v3789_v22 = vor.u32 %v5113_v10, %v3788_v9  ;;  %v3780_v25 = vld [vmem:[%s5832_s30 + $0x230] sm:$0xf] }
  0x4b   : > { %2713 = vmatpush.bf16.msra.mxu1 %v3565_v35  ;;  %v3916_v16 = vld [vmem:[%s5832_s30 + $0x340] sm:$0xf]  ;;  %v5145_v17 = vld [vmem:[%s5832_s30 + $0x344] sm:$0xf0]  ;;  %v5939_v20 = vpack.c.b16 %v701_v12, %v701_v12  ;;  %v5942_v21 = vpack.c.b16 %v702_v13, %v702_v13  ;;  %v3853_v23 = vor.u32 %v5129_v15, %v3852_v11  ;;  %v5111_v26 = vld [vmem:[%s5832_s30 + $0x234] sm:$0xf0] }
  0x4c   : > { %2726 = vmatpush.bf16.msra.mxu2 %v3629_v36  ;;  %v3980_v18 = vld [vmem:[%s5832_s30 + $0x3c0] sm:$0xf]  ;;  %v5161_v19 = vld [vmem:[%s5832_s30 + $0x3c4] sm:$0xf0]  ;;  %v3917_v24 = vor.u32 %v5145_v17, %v3916_v16  ;;  %v3844_v27 = vld [vmem:[%s5832_s30 + $0x2b0] sm:$0xf]  ;;  %v3781_v34 = vor.u32 %v5111_v26, %v3780_v25 }
  0x4d   : > { %2739 = vmatpush.bf16.msra.mxu3 %v3693_v39  ;;  %v3981_v28 = vor.u32 %v5161_v19, %v3980_v18  ;;  %v5127_v29 = vld [vmem:[%s5832_s30 + $0x2b4] sm:$0xf0]  ;;  %v3908_v30 = vld [vmem:[%s5832_s30 + $0x330] sm:$0xf]  ;;  %2701 = vmatmul.bf16.vlgmr.msra.gmra.mxu0 %v5939_v20  ;;  %v3772_v37 = vld [vmem:[%s5832_s30 + $0x220] sm:$0xf] }
  0x4e   : > { %2745 = vmatpush.bf16.msrb.mxu0 %v3813_v40  ;;  %v5143_v31 = vld [vmem:[%s5832_s30 + $0x334] sm:$0xf0]  ;;  %v3972_v32 = vld [vmem:[%s5832_s30 + $0x3b0] sm:$0xf]  ;;  %2714 = vmatmul.bf16.vlgmr.msra.gmra.mxu1 %v5942_v21  ;;  %v3845_v35 = vor.u32 %v5127_v29, %v3844_v27  ;;  %v5109_v38 = vld [vmem:[%s5832_s30 + $0x224] sm:$0xf0] }
  0x4f   : > { %2758 = vmatpush.bf16.msrb.mxu1 %v3877_v41  ;;  %2727 = vmatmul.bf16.vlgmr.msra.gmra.mxu2 %v5926_v4  ;;  %v5159_v33 = vld [vmem:[%s5832_s30 + $0x3b4] sm:$0xf0]  ;;  %v3909_v36 = vor.u32 %v5143_v31, %v3908_v30  ;;  %v3836_v39 = vld [vmem:[%s5832_s30 + $0x2a0] sm:$0xf]  ;;  %v5125_v41 = vld [vmem:[%s5832_s30 + $0x2a4] sm:$0xf0] }
  0x50   : > { %2771 = vmatpush.bf16.msrb.mxu2 %v3941_v42  ;;  %2740 = vmatmul.bf16.vlgmr.msra.gmra.mxu3 %v5928_v6  ;;  %v3973_v40 = vor.u32 %v5159_v33, %v3972_v32  ;;  %v3900_v42 = vld [vmem:[%s5832_s30 + $0x320] sm:$0xf]  ;;  %v5141_v43 = vld [vmem:[%s5832_s30 + $0x324] sm:$0xf0]  ;;  %v3837_v47 = vor.u32 %v5125_v41, %v3836_v39  ;;  %v3764_v49 = vld [vmem:[%s5832_s30 + $0x210] sm:$0xf] }
  0x51   : > { %2784 = vmatpush.bf16.msrb.mxu3 %v4005_v46  ;;  %v3964_v44 = vld [vmem:[%s5832_s30 + $0x3a0] sm:$0xf]  ;;  %v5157_v45 = vld [vmem:[%s5832_s30 + $0x3a4] sm:$0xf0]  ;;  %v3773_v46 = vor.u32 %v5109_v38, %v3772_v37  ;;  %v3901_v48 = vor.u32 %v5141_v43, %v3900_v42  ;;  %v5107_v50 = vld [vmem:[%s5832_s30 + $0x214] sm:$0xf0] }
  0x52   : > { %2746 = vmatpush.bf16.msrb.mxu0 %v3805_v52  ;;  %v3828_v51 = vld [vmem:[%s5832_s30 + $0x290] sm:$0xf]  ;;  %v3965_v52 = vor.u32 %v5157_v45, %v3964_v44  ;;  %v5123_v53 = vld [vmem:[%s5832_s30 + $0x294] sm:$0xf0]  ;;  %v3756_v58 = vld [vmem:[%s5832_s30 + $0x200] sm:$0xf] }
  0x53   : > { %2759 = vmatpush.bf16.msrb.mxu1 %v3869_v54  ;;  %v3892_v54 = vld [vmem:[%s5832_s30 + $0x310] sm:$0xf]  ;;  %v5155_v57 = vld [vmem:[%s5832_s30 + $0x394] sm:$0xf0]  ;;  %v5105_v60 = vld [vmem:[%s5832_s30 + $0x204] sm:$0xf0]  ;;  %v3829_v63 = vor.u32 %v5123_v53, %v3828_v51 }
  0x54   : > { %2772 = vmatpush.bf16.msrb.mxu2 %v3933_v55  ;;  %v5139_v55 = vld [vmem:[%s5832_s30 + $0x314] sm:$0xf0]  ;;  %v3956_v56 = vld [vmem:[%s5832_s30 + $0x390] sm:$0xf]  ;;  %v3820_v61 = vld [vmem:[%s5832_s30 + $0x280] sm:$0xf]  ;;  %v3757_v13 = vor.u32 %v5105_v60, %v3756_v58 }
  0x55   : > { %2785 = vmatpush.bf16.msrb.mxu3 %v3997_v59  ;;  %v3765_v59 = vor.u32 %v5107_v50, %v3764_v49  ;;  %v5121_v62 = vld [vmem:[%s5832_s30 + $0x284] sm:$0xf0]  ;;  %v3893_v0 = vor.u32 %v5139_v55, %v3892_v54  ;;  %v3884_v1 = vld [vmem:[%s5832_s30 + $0x300] sm:$0xf]  ;;  %v3957_v5 = vor.u32 %v5155_v57, %v3956_v56  ;;  %v295_v9 = vld [vmem:[#allocation3 + $0x10] sm:$0xff]  ;;  %s6678_s27 = scalar_lea.vmem [#allocation9], %s3497_s19 }
  0x56   : > { %2747 = vmatpush.bf16.msrb.mxu0 %v3797_v3  ;;  %v5137_v2 = vld [vmem:[%s5832_s30 + $0x304] sm:$0xf0]  ;;  %v296_v3 = vld [vmem:[#allocation3 + $0x18] sm:$0xff]  ;;  %v4068_v10 = vld [vmem:[%s5832_s30 + $0x470] sm:$0xf]  ;;  %v3821_v18 = vor.u32 %v5121_v62, %v3820_v61  ;;  %s5424_s4 = sshll.u32 %s5676_s15, 4 }
  0x57   : > { %2760 = vmatpush.bf16.msrb.mxu1 %v3861_v7  ;;  %v3948_v7 = vld [vmem:[%s5832_s30 + $0x380] sm:$0xf]  ;;  %v5183_v11 = vld [vmem:[%s5832_s30 + $0x474] sm:$0xf0]  ;;  %v4132_v12 = vld [vmem:[%s5832_s30 + $0x4f0] sm:$0xf]  ;;  %v707_v17 = vunpack.c.l.b16 %v296_v3  ;;  %v3885_v19 = vor.u32 %v5137_v2, %v3884_v1  ;;  %v708_v25 = vunpack.c.h.b16 %v296_v3  ;;  %s3356_s8 = scalar_lea.hbm %s6791_s3, %s5424_s4 }
  0x58   : > { %2773 = vmatpush.bf16.msrb.mxu2 %v3925_v8  ;;  %v5153_v8 = vld [vmem:[%s5832_s30 + $0x384] sm:$0xf0]  ;;  %v4196_v15 = vld [vmem:[%s5832_s30 + $0x570] sm:$0xf]  ;;  %v5215_v16 = vld [vmem:[%s5832_s30 + $0x574] sm:$0xf0]  ;;  %v4069_v27 = vor.u32 %v5183_v11, %v4068_v10 }
  0x59   : > { %2786 = vmatpush.bf16.msrb.mxu3 %v3989_v14  ;;  %v5199_v14 = vld [vmem:[%s5832_s30 + $0x4f4] sm:$0xf0]  ;;  %v3949_v26 = vor.u32 %v5153_v8, %v3948_v7  ;;  %v4197_v30 = vor.u32 %v5215_v16, %v4196_v15  ;;  %v4060_v31 = vld [vmem:[%s5832_s30 + $0x460] sm:$0xf]  ;;  %v5181_v32 = vld [vmem:[%s5832_s30 + $0x464] sm:$0xf0]  ;;  %v5992_v38 = vpack.c.b16 %v707_v17, %v707_v17  ;;  %v5998_v42 = vpack.c.b16 %v708_v25, %v708_v25 }
  0x5a   : > { %2748 = vmatpush.bf16.msrb.mxu0 %v3789_v22  ;;  %v4260_v22 = vld [vmem:[%s5832_s30 + $0x5f0] sm:$0xf]  ;;  %v4133_v29 = vor.u32 %v5199_v14, %v4132_v12  ;;  %v4124_v33 = vld [vmem:[%s5832_s30 + $0x4e0] sm:$0xf]  ;;  %v5213_v37 = vld [vmem:[%s5832_s30 + $0x564] sm:$0xf0]  ;;  %v4061_v43 = vor.u32 %v5181_v32, %v4060_v31 }
  0x5b   : > { %2761 = vmatpush.bf16.msrb.mxu1 %v3853_v23  ;;  %v5231_v23 = vld [vmem:[%s5832_s30 + $0x5f4] sm:$0xf0]  ;;  %v4252_v39 = vld [vmem:[%s5832_s30 + $0x5e0] sm:$0xf]  ;;  %v4116_v49 = vld [vmem:[%s5832_s30 + $0x4d0] sm:$0xf] }
  0x5c   : > { %2774 = vmatpush.bf16.msrb.mxu2 %v3917_v24  ;;  %v705_v24 = vunpack.c.l.b16 %v295_v9  ;;  %v5195_v51 = vld [vmem:[%s5832_s30 + $0x4d4] sm:$0xf0]  ;;  %v4244_v54 = vld [vmem:[%s5832_s30 + $0x5d0] sm:$0xf]  ;;  %v5177_v60 = vld [vmem:[%s5832_s30 + $0x444] sm:$0xf0] }
  0x5d   : > { %2787 = vmatpush.bf16.msrb.mxu3 %v3981_v28  ;;  %v706_v28 = vunpack.c.h.b16 %v295_v9  ;;  %v5211_v53 = vld [vmem:[%s5832_s30 + $0x554] sm:$0xf0]  ;;  %v4117_v57 = vor.u32 %v5195_v51, %v4116_v49  ;;  %v4108_v61 = vld [vmem:[%s5832_s30 + $0x4c0] sm:$0xf]  ;;  %v5209_v1 = vld [vmem:[%s5832_s30 + $0x544] sm:$0xf0] }
  0x5e   : > { %2749 = vmatpush.bf16.msrb.mxu0 %v3781_v34  ;;  %v4261_v34 = vor.u32 %v5231_v23, %v4260_v22  ;;  %v5996_v41 = vpack.c.b16 %v705_v24, %v705_v24  ;;  %v5227_v55 = vld [vmem:[%s5832_s30 + $0x5d4] sm:$0xf0]  ;;  %v4236_v2 = vld [vmem:[%s5832_s30 + $0x5c0] sm:$0xf]  ;;  %v5225_v3 = vld [vmem:[%s5832_s30 + $0x5c4] sm:$0xf0] }
  0x5f   : > { %2762 = vmatpush.bf16.msrb.mxu1 %v3845_v35  ;;  %v5197_v35 = vld [vmem:[%s5832_s30 + $0x4e4] sm:$0xf0]  ;;  %v6000_v44 = vpack.c.b16 %v706_v28, %v706_v28  ;;  %v4245_v62 = vor.u32 %v5227_v55, %v4244_v54  ;;  %v4036_v9 = vld [vmem:[%s5832_s30 + $0x430] sm:$0xf]  ;;  %v5175_v10 = vld [vmem:[%s5832_s30 + $0x434] sm:$0xf0]  ;;  %v4237_v12 = vor.u32 %v5225_v3, %v4236_v2 }
  0x60   : > { %2775 = vmatpush.bf16.msrb.mxu2 %v3909_v36  ;;  %v4188_v36 = vld [vmem:[%s5832_s30 + $0x560] sm:$0xf]  ;;  %v4125_v45 = vor.u32 %v5197_v35, %v4124_v33  ;;  %v4100_v11 = vld [vmem:[%s5832_s30 + $0x4b0] sm:$0xf]  ;;  %v5207_v15 = vld [vmem:[%s5832_s30 + $0x534] sm:$0xf0] }
  0x61   : > { %2788 = vmatpush.bf16.msrb.mxu3 %v3973_v40  ;;  %v5229_v40 = vld [vmem:[%s5832_s30 + $0x5e4] sm:$0xf0]  ;;  %v4164_v14 = vld [vmem:[%s5832_s30 + $0x530] sm:$0xf]  ;;  %v5223_v17 = vld [vmem:[%s5832_s30 + $0x5b4] sm:$0xf0] }
  0x62   : > { %2750 = vmatpush.bf16.msrb.mxu0 %v3773_v46  ;;  %v4189_v46 = vor.u32 %v5213_v37, %v4188_v36  ;;  %v4253_v50 = vor.u32 %v5229_v40, %v4252_v39  ;;  %v4228_v16 = vld [vmem:[%s5832_s30 + $0x5b0] sm:$0xf]  ;;  %v4165_v22 = vor.u32 %v5207_v15, %v4164_v14  ;;  %v4028_v23 = vld [vmem:[%s5832_s30 + $0x420] sm:$0xf]  ;;  %v5173_v24 = vld [vmem:[%s5832_s30 + $0x424] sm:$0xf0] }
  0x63   : > { %2763 = vmatpush.bf16.msrb.mxu1 %v3837_v47  ;;  %v4052_v47 = vld [vmem:[%s5832_s30 + $0x450] sm:$0xf]  ;;  %v4092_v25 = vld [vmem:[%s5832_s30 + $0x4a0] sm:$0xf]  ;;  %v5221_v31 = vld [vmem:[%s5832_s30 + $0x5a4] sm:$0xf0]  ;;  %v4029_v32 = vor.u32 %v5173_v24, %v4028_v23 }
  0x64   : > { %2776 = vmatpush.bf16.msrb.mxu2 %v3901_v48  ;;  %v5179_v48 = vld [vmem:[%s5832_s30 + $0x454] sm:$0xf0]  ;;  %v4156_v28 = vld [vmem:[%s5832_s30 + $0x520] sm:$0xf]  ;;  %v4020_v35 = vld [vmem:[%s5832_s30 + $0x410] sm:$0xf] }
  0x65   : > { %2789 = vmatpush.bf16.msrb.mxu3 %v3965_v52  ;;  %v4180_v52 = vld [vmem:[%s5832_s30 + $0x550] sm:$0xf]  ;;  %v4053_v56 = vor.u32 %v5179_v48, %v4052_v47  ;;  %v5171_v36 = vld [vmem:[%s5832_s30 + $0x414] sm:$0xf0]  ;;  %v4012_v48 = vld [vmem:[%s5832_s30 + $0x400] sm:$0xf] }
  0x66   : > { %2751 = vmatpush.bf16.msrb.mxu0 %v3765_v59  ;;  %v4181_v58 = vor.u32 %v5211_v53, %v4180_v52  ;;  %v4044_v59 = vld [vmem:[%s5832_s30 + $0x440] sm:$0xf]  ;;  %v4084_v37 = vld [vmem:[%s5832_s30 + $0x490] sm:$0xf]  ;;  %v5187_v40 = vld [vmem:[%s5832_s30 + $0x494] sm:$0xf0]  ;;  %v4021_v49 = vor.u32 %v5171_v36, %v4020_v35 }
  0x67   : > { %2764 = vmatpush.bf16.msrb.mxu1 %v3829_v63  ;;  %v5193_v63 = vld [vmem:[%s5832_s30 + $0x4c4] sm:$0xf0]  ;;  %v5219_v47 = vld [vmem:[%s5832_s30 + $0x594] sm:$0xf0]  ;;  %v4076_v51 = vld [vmem:[%s5832_s30 + $0x480] sm:$0xf]  ;;  %v4085_v53 = vor.u32 %v5187_v40, %v4084_v37 }
  0x68   : > { %2777 = vmatpush.bf16.msrb.mxu2 %v3893_v0  ;;  %v4172_v0 = vld [vmem:[%s5832_s30 + $0x540] sm:$0xf]  ;;  %v4109_v7 = vor.u32 %v5193_v63, %v4108_v61  ;;  %v5185_v52 = vld [vmem:[%s5832_s30 + $0x484] sm:$0xf0]  ;;  %v5247_v63 = vld [vmem:[%s5832_s30 + $0x674] sm:$0xf0] }
  0x69   : > { %2790 = vmatpush.bf16.msrb.mxu3 %v3957_v5  ;;  %v4045_v5 = vor.u32 %v5177_v60, %v4044_v59  ;;  %v4173_v8 = vor.u32 %v5209_v1, %v4172_v0  ;;  %v4140_v55 = vld [vmem:[%s5832_s30 + $0x500] sm:$0xf]  ;;  %v5217_v60 = vld [vmem:[%s5832_s30 + $0x584] sm:$0xf0]  ;;  %v4388_v0 = vld [vmem:[%s5832_s30 + $0x6f0] sm:$0xf] }
  0x6a   : > { %2752 = vmatpush.bf16.msrb.mxu0 %v3757_v13  ;;  %v5191_v13 = vld [vmem:[%s5832_s30 + $0x4b4] sm:$0xf0]  ;;  %v4204_v59 = vld [vmem:[%s5832_s30 + $0x580] sm:$0xf]  ;;  %v298_v61 = vld [vmem:[#allocation3 + $0x28] sm:$0xff]  ;;  %s3358_s9 = sshll.u32 %s6678_s27, 4  ;;  %s3359_s9 = int_to_ptr.vmem [resolvable:$true] %s3358_s9 }
  0x6b   : > { %2765 = vmatpush.bf16.msrb.mxu1 %v3821_v18  ;;  %v4037_v18 = vor.u32 %v5175_v10, %v4036_v9  ;;  %v5263_v2 = vld [vmem:[%s5832_s30 + $0x6f4] sm:$0xf0]  ;;  %v4452_v3 = vld [vmem:[%s5832_s30 + $0x770] sm:$0xf]  ;;  %v4205_v14 = vor.u32 %v5217_v60, %v4204_v59  ;;  %v4380_v23 = vld [vmem:[%s5832_s30 + $0x6e0] sm:$0xf] }
  0x6c   : > { %2778 = vmatpush.bf16.msrb.mxu2 %v3885_v19  ;;  %v4101_v19 = vor.u32 %v5191_v13, %v4100_v11  ;;  %v4516_v10 = vld [vmem:[%s5832_s30 + $0x7f0] sm:$0xf]  ;;  %v5295_v11 = vld [vmem:[%s5832_s30 + $0x7f4] sm:$0xf0]  ;;  %v5273_v59 = vld [vmem:[%s5832_s30 + $0x744] sm:$0xf0] }
  0x6d   : > { %2791 = vmatpush.bf16.msrb.mxu3 %v3949_v26  ;;  %2753 = vmatmul.bf16.vlgmr.msrb.gmra.mxu0 %v5996_v41  ;;  %v4229_v26 = vor.u32 %v5223_v17, %v4228_v16  ;;  %v712_v16 = vunpack.c.h.b16 %v298_v61  ;;  %v4389_v17 = vor.u32 %v5263_v2, %v4388_v0  ;;  %v4517_v24 = vor.u32 %v5295_v11, %v4516_v10  ;;  %v4308_v37 = vld [vmem:[%s5832_s30 + $0x650] sm:$0xf]  ;;  %v4492_v60 = vld [vmem:[%s5832_s30 + $0x7c0] sm:$0xf]  ;;  %v5239_v2 = vld [vmem:[%s5832_s30 + $0x634] sm:$0xf0] }
  0x6e   : > { %2797 = vmatpush.bf16.msra.mxu0 %v4069_v27  ;;  %2766 = vmatmul.bf16.vlgmr.msrb.gmra.mxu1 %v6000_v44  ;;  %v5189_v27 = vld [vmem:[%s5832_s30 + $0x4a4] sm:$0xf0]  ;;  %v4372_v40 = vld [vmem:[%s5832_s30 + $0x6d0] sm:$0xf]  ;;  %v5287_v11 = vld [vmem:[%s5832_s30 + $0x7b4] sm:$0xf0] }
  0x6f   : > { %2810 = vmatpush.bf16.msra.mxu1 %v4133_v29  ;;  %2779 = vmatmul.bf16.vlgmr.msrb.gmra.mxu2 %v5992_v38  ;;  %v5205_v29 = vld [vmem:[%s5832_s30 + $0x524] sm:$0xf0]  ;;  %v4093_v33 = vor.u32 %v5189_v27, %v4092_v25  ;;  %v4444_v27 = vld [vmem:[%s5832_s30 + $0x760] sm:$0xf]  ;;  %v4484_v10 = vld [vmem:[%s5832_s30 + $0x7b0] sm:$0xf] }
  0x70   : > { %2823 = vmatpush.bf16.msra.mxu2 %v4197_v30  ;;  %2792 = vmatmul.bf16.vlgmr.msrb.gmra.mxu3 %v5998_v42  ;;  %v4220_v30 = vld [vmem:[%s5832_s30 + $0x5a0] sm:$0xf]  ;;  %s3360_s11 = sshll.u32 %s3356_s8, 4  ;;  %s3343_s15 = scalar_lea.sflag [#allocation5], %s5829_s28  ;;  %s3361_s11 = int_to_ptr.hbm [resolvable:$true] %s3360_s11 }
  0x71   : > { %2836 = vmatpush.bf16.msra.mxu3 %v4261_v34  ;;  %v4157_v34 = vor.u32 %v5205_v29, %v4156_v28  ;;  %v4221_v39 = vor.u32 %v5221_v31, %v4220_v30  ;;  %v5277_v28 = vld [vmem:[%s5832_s30 + $0x764] sm:$0xf0]  ;;  %v4508_v31 = vld [vmem:[%s5832_s30 + $0x7e0] sm:$0xf]  ;;  %s5612_s23 = sshra.s32 %s3361_s11, 4  ;;  %s5618_s29 = scalar_lea.hbm %s6791_s3, 32  ;;  %s5613_s23 = int_to_ptr.hbm [resolvable:$true] %s5612_s23 }
  0x72   : > { %2798 = vmatpush.bf16.msra.mxu0 %v4061_v43  ;;  %v4148_v43 = vld [vmem:[%s5832_s30 + $0x510] sm:$0xf]  ;;  %v4445_v36 = vor.u32 %v5277_v28, %v4444_v27  ;;  %s5614_s25 = scalar_lea.hbm %s5613_s23, 16  ;;  %p5619_p10 = scmp.lt.s32.totalorder %s5613_s23, %s6791_s3 }
  0x73   : > { %2811 = vmatpush.bf16.msra.mxu1 %v4125_v45  ;;  %v5203_v45 = vld [vmem:[%s5832_s30 + $0x514] sm:$0xf0]  ;;  %p5615_p7 = scmp.ne.s32.totalorder %s5613_s23, %s5614_s25  ;;  %p5620_p11 = scmp.lt.s32.totalorder %s5618_s29, %s5614_s25 }
  0x74   : > { %2824 = vmatpush.bf16.msra.mxu2 %v4189_v46  ;;  %v4212_v46 = vld [vmem:[%s5832_s30 + $0x590] sm:$0xf]  ;;  %v4149_v54 = vor.u32 %v5203_v45, %v4148_v43  ;;  %v5259_v45 = vld [vmem:[%s5832_s30 + $0x6d4] sm:$0xf0] }
  0x75   : > { %2837 = vmatpush.bf16.msra.mxu3 %v4253_v50  ;;  %v5169_v50 = vld [vmem:[%s5832_s30 + $0x404] sm:$0xf0]  ;;  %p5616_p8 = pnand %p5615_p7, %p5792_p0  ;;  %p5621_p12 = por %p5620_p11, %p5619_p10 }
  0x76   : > { %2799 = vmatpush.bf16.msra.mxu0 %v4053_v56  ;;  %v5201_v56 = vld [vmem:[%s5832_s30 + $0x504] sm:$0xf0]  ;;  %v4013_v1 = vor.u32 %v5169_v50, %v4012_v48  ;;  %v4500_v48 = vld [vmem:[%s5832_s30 + $0x7d0] sm:$0xf] }
  0x77   : > { %2812 = vmatpush.bf16.msra.mxu1 %v4117_v57  ;;  %v297_v57 = vld [vmem:[#allocation3 + $0x20] sm:$0xff]  ;;  %v4141_v9 = vor.u32 %v5201_v56, %v4140_v55  ;;  %p5617_p9 = pneg %p5616_p8 }
  0x78   : > { %2825 = vmatpush.bf16.msra.mxu2 %v4181_v58  ;;  %v4213_v58 = vor.u32 %v5219_v47, %v4212_v46  ;;  %v710_v13 = vunpack.c.h.b16 %v297_v57  ;;  %v4436_v46 = vld [vmem:[%s5832_s30 + $0x750] sm:$0xf]  ;;  %v5275_v47 = vld [vmem:[%s5832_s30 + $0x754] sm:$0xf0]  ;;  %v4364_v55 = vld [vmem:[%s5832_s30 + $0x6c0] sm:$0xf] }
  0x79   : > { %2838 = vmatpush.bf16.msra.mxu3 %v4245_v62  ;;  %v4324_v62 = vld [vmem:[%s5832_s30 + $0x670] sm:$0xf]  ;;  %p5622_p13 = pnand %p5621_p12, %p5617_p9 }
  0x7a   : > { %2800 = vmatpush.bf16.msra.mxu0 %v4045_v5  ;;  %v5279_v5 = vld [vmem:[%s5832_s30 + $0x774] sm:$0xf0]  ;;  %v4325_v15 = vor.u32 %v5247_v63, %v4324_v62  ;;  %v6072_v30 = vpack.c.b16 %v710_v13, %v710_v13 }
  0x7b   : > { %2813 = vmatpush.bf16.msra.mxu1 %v4109_v7  ;;  %v709_v7 = vunpack.c.l.b16 %v297_v57  ;;  %v5257_v57 = vld [vmem:[%s5832_s30 + $0x6c4] sm:$0xf0] }
  0x7c   : > { %2826 = vmatpush.bf16.msra.mxu2 %v4173_v8  ;;  %v4077_v8 = vor.u32 %v5185_v52, %v4076_v51  ;;  %v4373_v51 = vor.u32 %v5259_v45, %v4372_v40  ;;  %v4437_v52 = vor.u32 %v5275_v47, %v4436_v46  ;;  %v4365_v63 = vor.u32 %v5257_v57, %v4364_v55  ;;  %v5267_v40 = vld [vmem:[%s5832_s30 + $0x714] sm:$0xf0]  ;;  %v4268_v46 = vld [vmem:[%s5832_s30 + $0x600] sm:$0xf]  ;;  %v299_v55 = vld [vmem:[#allocation3 + $0x30] sm:$0xff] }
  0x7d   : > { %2839 = vmatpush.bf16.msra.mxu3 %v4237_v12  ;;  %v711_v12 = vunpack.c.l.b16 %v298_v61  ;;  %v6065_v25 = vpack.c.b16 %v709_v7, %v709_v7  ;;  %v5289_v61 = vld [vmem:[%s5832_s30 + $0x7c4] sm:$0xf0]  ;;  %v5255_v7 = vld [vmem:[%s5832_s30 + $0x6b4] sm:$0xf0]  ;;  %v4460_v57 = vld [vmem:[%s5832_s30 + $0x780] sm:$0xf] }
  0x7e   : > { %2801 = vmatpush.bf16.msra.mxu0 %v4037_v18  ;;  %v4453_v18 = vor.u32 %v5279_v5, %v4452_v3  ;;  %v4356_v3 = vld [vmem:[%s5832_s30 + $0x6b0] sm:$0xf]  ;;  %v4493_v5 = vor.u32 %v5289_v61, %v4492_v60  ;;  %v5283_v45 = vld [vmem:[%s5832_s30 + $0x794] sm:$0xf0] }
  0x7f   : > { %2814 = vmatpush.bf16.msra.mxu1 %v4101_v19  ;;  %v4316_v19 = vld [vmem:[%s5832_s30 + $0x660] sm:$0xf]  ;;  %v6070_v29 = vpack.c.b16 %v711_v12, %v711_v12  ;;  %v4357_v13 = vor.u32 %v5255_v7, %v4356_v3  ;;  %v4580_v60 = vld [vmem:[%s5832_s30 + $0x870] sm:$0xf]  ;;  %v5311_v61 = vld [vmem:[%s5832_s30 + $0x874] sm:$0xf0]  ;;  %v713_v3 = vunpack.c.l.b16 %v299_v55 }
  0x80   : > { %2827 = vmatpush.bf16.msra.mxu2 %v4165_v22  ;;  %v5245_v22 = vld [vmem:[%s5832_s30 + $0x664] sm:$0xf0] }
  0x81   : > { %2840 = vmatpush.bf16.msra.mxu3 %v4229_v26  ;;  %v5261_v26 = vld [vmem:[%s5832_s30 + $0x6e4] sm:$0xf0] }
  0x82   : > { %2802 = vmatpush.bf16.msra.mxu0 %v4029_v32  ;;  %v5293_v32 = vld [vmem:[%s5832_s30 + $0x7e4] sm:$0xf0]  ;;  %v4381_v35 = vor.u32 %v5261_v26, %v4380_v23 }
  0x83   : > { %2815 = vmatpush.bf16.msra.mxu1 %v4093_v33  ;;  %v6076_v33 = vpack.c.b16 %v712_v16, %v712_v16  ;;  %v4509_v43 = vor.u32 %v5293_v32, %v4508_v31  ;;  %v5237_v16 = vld [vmem:[%s5832_s30 + $0x624] sm:$0xf0]  ;;  %v4276_v32 = vld [vmem:[%s5832_s30 + $0x610] sm:$0xf] }
  0x84   : > { %2828 = vmatpush.bf16.msra.mxu2 %v4157_v34  ;;  %v4317_v34 = vor.u32 %v5245_v22, %v4316_v19  ;;  %v5253_v19 = vld [vmem:[%s5832_s30 + $0x6a4] sm:$0xf0]  ;;  %v4412_v22 = vld [vmem:[%s5832_s30 + $0x720] sm:$0xf] }
  0x85   : > { %2841 = vmatpush.bf16.msra.mxu3 %v4221_v39  ;;  %v5243_v39 = vld [vmem:[%s5832_s30 + $0x654] sm:$0xf0]  ;;  %v5269_v23 = vld [vmem:[%s5832_s30 + $0x724] sm:$0xf0] }
  0x86   : > { %2803 = vmatpush.bf16.msra.mxu0 %v4021_v49  ;;  %v5291_v49 = vld [vmem:[%s5832_s30 + $0x7d4] sm:$0xf0]  ;;  %v4309_v50 = vor.u32 %v5243_v39, %v4308_v37  ;;  %v5285_v26 = vld [vmem:[%s5832_s30 + $0x7a4] sm:$0xf0]  ;;  %v4413_v31 = vor.u32 %v5269_v23, %v4412_v22  ;;  %v4404_v39 = vld [vmem:[%s5832_s30 + $0x710] sm:$0xf]  ;;  %v6141_v23 = vpack.c.b16 %v713_v3, %v713_v3 }
  0x87   : > { %2816 = vmatpush.bf16.msra.mxu1 %v4085_v53  ;;  %v4300_v53 = vld [vmem:[%s5832_s30 + $0x640] sm:$0xf]  ;;  %v4501_v56 = vor.u32 %v5291_v49, %v4500_v48  ;;  %v5251_v37 = vld [vmem:[%s5832_s30 + $0x694] sm:$0xf0]  ;;  %v5233_v48 = vld [vmem:[%s5832_s30 + $0x604] sm:$0xf0] }
  0x88   : > { %2829 = vmatpush.bf16.msra.mxu2 %v4149_v54  ;;  %v5241_v54 = vld [vmem:[%s5832_s30 + $0x644] sm:$0xf0]  ;;  %v4332_v49 = vld [vmem:[%s5832_s30 + $0x680] sm:$0xf]  ;;  %v4548_v3 = vld [vmem:[%s5832_s30 + $0x830] sm:$0xf] }
  0x89   : > { %2842 = vmatpush.bf16.msra.mxu3 %v4213_v58  ;;  %v4428_v58 = vld [vmem:[%s5832_s30 + $0x740] sm:$0xf]  ;;  %v4301_v62 = vor.u32 %v5241_v54, %v4300_v53  ;;  %v5265_v54 = vld [vmem:[%s5832_s30 + $0x704] sm:$0xf0] }
  0x8a   : > { %2804 = vmatpush.bf16.msra.mxu0 %v4013_v1  ;;  %v4429_v0 = vor.u32 %v5273_v59, %v4428_v58  ;;  %v4292_v1 = vld [vmem:[%s5832_s30 + $0x630] sm:$0xf]  ;;  %v4396_v53 = vld [vmem:[%s5832_s30 + $0x700] sm:$0xf]  ;;  %v5281_v58 = vld [vmem:[%s5832_s30 + $0x784] sm:$0xf0] }
  0x8b   : > { %2817 = vmatpush.bf16.msra.mxu1 %v4077_v8  ;;  %v4420_v8 = vld [vmem:[%s5832_s30 + $0x730] sm:$0xf]  ;;  %v4293_v12 = vor.u32 %v5239_v2, %v4292_v1  ;;  %v300_v59 = vld [vmem:[#allocation3 + $0x38] sm:$0xff]  ;;  %v4397_v7 = vor.u32 %v5265_v54, %v4396_v53 }
  0x8c   : > { %2830 = vmatpush.bf16.msra.mxu2 %v4141_v9  ;;  %v5271_v9 = vld [vmem:[%s5832_s30 + $0x734] sm:$0xf0]  ;;  %v4708_v1 = vld [vmem:[%s5832_s30 + $0x970] sm:$0xf] }
  0x8d   : > { %2843 = vmatpush.bf16.msra.mxu3 %v4205_v14  ;;  %2805 = vmatmul.bf16.vlgmr.msra.gmra.mxu0 %v6065_v25  ;;  %v4421_v14 = vor.u32 %v5271_v9, %v4420_v8  ;;  %v5343_v2 = vld [vmem:[%s5832_s30 + $0x974] sm:$0xf0]  ;;  %v4772_v8 = vld [vmem:[%s5832_s30 + $0x9f0] sm:$0xf] }
  0x8e   : > { %2849 = vmatpush.bf16.msrb.mxu0 %v4325_v15  ;;  %2818 = vmatmul.bf16.vlgmr.msra.gmra.mxu1 %v6072_v30  ;;  %v4284_v15 = vld [vmem:[%s5832_s30 + $0x620] sm:$0xf]  ;;  %v5359_v9 = vld [vmem:[%s5832_s30 + $0x9f4] sm:$0xf0] }
  0x8f   : > { %2862 = vmatpush.bf16.msrb.mxu1 %v4389_v17  ;;  %2831 = vmatmul.bf16.vlgmr.msra.gmra.mxu2 %v6070_v29  ;;  %v4348_v17 = vld [vmem:[%s5832_s30 + $0x6a0] sm:$0xf]  ;;  %v4285_v27 = vor.u32 %v5237_v16, %v4284_v15  ;;  %v4709_v16 = vor.u32 %v5343_v2, %v4708_v1  ;;  %v4773_v22 = vor.u32 %v5359_v9, %v4772_v8  ;;  %v5319_v9 = vld [vmem:[%s5832_s30 + $0x8b4] sm:$0xf0] }
  0x90   : > { %2875 = vmatpush.bf16.msrb.mxu2 %v4453_v18  ;;  %2844 = vmatmul.bf16.vlgmr.msra.gmra.mxu3 %v6076_v33  ;;  %v4485_v18 = vor.u32 %v5287_v11, %v4484_v10  ;;  %v4349_v28 = vor.u32 %v5253_v19, %v4348_v17  ;;  %v715_v10 = vunpack.c.l.b16 %v300_v59  ;;  %v714_v11 = vunpack.c.h.b16 %v299_v55  ;;  %v4572_v17 = vld [vmem:[%s5832_s30 + $0x860] sm:$0xf] }
  0x91   : > { %2888 = vmatpush.bf16.msrb.mxu3 %v4517_v24  ;;  %v4476_v24 = vld [vmem:[%s5832_s30 + $0x7a0] sm:$0xf] }
  0x92   : > { %2850 = vmatpush.bf16.msrb.mxu0 %v4317_v34  ;;  %v5235_v34 = vld [vmem:[%s5832_s30 + $0x614] sm:$0xf0]  ;;  %v4636_v19 = vld [vmem:[%s5832_s30 + $0x8e0] sm:$0xf] }
  0x93   : > { %2863 = vmatpush.bf16.msrb.mxu1 %v4381_v35  ;;  %v4340_v35 = vld [vmem:[%s5832_s30 + $0x690] sm:$0xf]  ;;  %v4277_v47 = vor.u32 %v5235_v34, %v4276_v32  ;;  %v4764_v32 = vld [vmem:[%s5832_s30 + $0x9e0] sm:$0xf]  ;;  %v5357_v34 = vld [vmem:[%s5832_s30 + $0x9e4] sm:$0xf0] }
  0x94   : > { %2876 = vmatpush.bf16.msrb.mxu2 %v4445_v36  ;;  %v4477_v36 = vor.u32 %v5285_v26, %v4476_v24  ;;  %v5325_v24 = vld [vmem:[%s5832_s30 + $0x8e4] sm:$0xf0]  ;;  %v4700_v26 = vld [vmem:[%s5832_s30 + $0x960] sm:$0xf] }
  0x95   : > { %2889 = vmatpush.bf16.msrb.mxu3 %v4509_v43  ;;  %v4468_v43 = vld [vmem:[%s5832_s30 + $0x790] sm:$0xf]  ;;  %v4556_v55 = vld [vmem:[%s5832_s30 + $0x840] sm:$0xf] }
  0x96   : > { %2851 = vmatpush.bf16.msrb.mxu0 %v4309_v50  ;;  %v5249_v50 = vld [vmem:[%s5832_s30 + $0x684] sm:$0xf0] }
  0x97   : > { %2864 = vmatpush.bf16.msrb.mxu1 %v4373_v51  ;;  %v4341_v51 = vor.u32 %v5251_v37, %v4340_v35  ;;  %v4637_v37 = vor.u32 %v5325_v24, %v4636_v19  ;;  %v4604_v19 = vld [vmem:[%s5832_s30 + $0x8a0] sm:$0xf]  ;;  %v5317_v24 = vld [vmem:[%s5832_s30 + $0x8a4] sm:$0xf0] }
  0x98   : > { %2877 = vmatpush.bf16.msrb.mxu2 %v4437_v52  ;;  %v4405_v52 = vor.u32 %v5267_v40, %v4404_v39  ;;  %v4564_v40 = vld [vmem:[%s5832_s30 + $0x850] sm:$0xf] }
  0x99   : > { %2890 = vmatpush.bf16.msrb.mxu3 %v4501_v56  ;;  %v4469_v56 = vor.u32 %v5283_v45, %v4468_v43  ;;  %v5307_v43 = vld [vmem:[%s5832_s30 + $0x854] sm:$0xf0]  ;;  %v4628_v45 = vld [vmem:[%s5832_s30 + $0x8d0] sm:$0xf] }
  0x9a   : > { %2852 = vmatpush.bf16.msrb.mxu0 %v4301_v62  ;;  %v4644_v62 = vld [vmem:[%s5832_s30 + $0x8f0] sm:$0xf] }
  0x9b   : > { %2865 = vmatpush.bf16.msrb.mxu1 %v4365_v63  ;;  %v4269_v63 = vor.u32 %v5233_v48, %v4268_v46  ;;  %v4765_v46 = vor.u32 %v5357_v34, %v4764_v32  ;;  %v4692_v48 = vld [vmem:[%s5832_s30 + $0x950] sm:$0xf]  ;;  %v4732_v32 = vld [vmem:[%s5832_s30 + $0x9a0] sm:$0xf]  ;;  %v5349_v34 = vld [vmem:[%s5832_s30 + $0x9a4] sm:$0xf0] }
  0x9c   : > { %2878 = vmatpush.bf16.msrb.mxu2 %v4429_v0  ;;  %v5327_v0 = vld [vmem:[%s5832_s30 + $0x8f4] sm:$0xf0] }
  0x9d   : > { %2891 = vmatpush.bf16.msrb.mxu3 %v4493_v5  ;;  %v4333_v5 = vor.u32 %v5249_v50, %v4332_v49  ;;  %v4645_v15 = vor.u32 %v5327_v0, %v4644_v62  ;;  %v5339_v49 = vld [vmem:[%s5832_s30 + $0x954] sm:$0xf0]  ;;  %v4756_v50 = vld [vmem:[%s5832_s30 + $0x9d0] sm:$0xf]  ;;  %v4748_v62 = vld [vmem:[%s5832_s30 + $0x9c0] sm:$0xf] }
  0x9e   : > { %2853 = vmatpush.bf16.msrb.mxu0 %v4293_v12  ;;  %v4461_v12 = vor.u32 %v5281_v58, %v4460_v57  ;;  %v4693_v54 = vor.u32 %v5339_v49, %v4692_v48  ;;  %v4620_v57 = vld [vmem:[%s5832_s30 + $0x8c0] sm:$0xf]  ;;  %v4660_v48 = vld [vmem:[%s5832_s30 + $0x910] sm:$0xf]  ;;  %v5331_v49 = vld [vmem:[%s5832_s30 + $0x914] sm:$0xf0] }
  0x9f   : > { %2866 = vmatpush.bf16.msrb.mxu1 %v4357_v13  ;;  %v4581_v13 = vor.u32 %v5311_v61, %v4580_v60  ;;  %v4684_v60 = vld [vmem:[%s5832_s30 + $0x940] sm:$0xf]  ;;  %v5337_v61 = vld [vmem:[%s5832_s30 + $0x944] sm:$0xf0] }
  0xa0   : > { %2879 = vmatpush.bf16.msrb.mxu2 %v4421_v14  ;;  %v716_v14 = vunpack.c.h.b16 %v300_v59  ;;  %v5321_v59 = vld [vmem:[%s5832_s30 + $0x8c4] sm:$0xf0]  ;;  %v4685_v2 = vor.u32 %v5337_v61, %v4684_v60  ;;  %v301_v61 = vld [vmem:[#allocation3 + $0x40] sm:$0xff] }
  0xa1   : > { %2892 = vmatpush.bf16.msrb.mxu3 %v4485_v18  ;;  %v5309_v18 = vld [vmem:[%s5832_s30 + $0x864] sm:$0xf0]  ;;  %v4621_v1 = vor.u32 %v5321_v59, %v4620_v57  ;;  %v4652_v59 = vld [vmem:[%s5832_s30 + $0x900] sm:$0xf] }
  0xa2   : > { %2854 = vmatpush.bf16.msrb.mxu0 %v4285_v27  ;;  %v5341_v27 = vld [vmem:[%s5832_s30 + $0x964] sm:$0xf0]  ;;  %v6152_v35 = vpack.c.b16 %v716_v14, %v716_v14 }
  0xa3   : > { %2867 = vmatpush.bf16.msrb.mxu1 %v4349_v28  ;;  %v6146_v28 = vpack.c.b16 %v715_v10, %v715_v10  ;;  %v4701_v39 = vor.u32 %v5341_v27, %v4700_v26  ;;  %v4676_v10 = vld [vmem:[%s5832_s30 + $0x930] sm:$0xf]  ;;  %v4668_v26 = vld [vmem:[%s5832_s30 + $0x920] sm:$0xf]  ;;  %v5333_v27 = vld [vmem:[%s5832_s30 + $0x924] sm:$0xf0] }
  0xa4   : > { %2880 = vmatpush.bf16.msrb.mxu2 %v4413_v31  ;;  %v6148_v31 = vpack.c.b16 %v714_v11, %v714_v11  ;;  %v5335_v11 = vld [vmem:[%s5832_s30 + $0x934] sm:$0xf0]  ;;  %v5329_v60 = vld [vmem:[%s5832_s30 + $0x904] sm:$0xf0] }
  0xa5   : > { %2893 = vmatpush.bf16.msrb.mxu3 %v4477_v36  ;;  %v4573_v36 = vor.u32 %v5309_v18, %v4572_v17  ;;  %v4540_v17 = vld [vmem:[%s5832_s30 + $0x820] sm:$0xf]  ;;  %v5301_v18 = vld [vmem:[%s5832_s30 + $0x824] sm:$0xf0] }
  0xa6   : > { %2855 = vmatpush.bf16.msrb.mxu0 %v4277_v47  ;;  %v5323_v47 = vld [vmem:[%s5832_s30 + $0x8d4] sm:$0xf0] }
  0xa7   : > { %2868 = vmatpush.bf16.msrb.mxu1 %v4341_v51  ;;  %v5355_v51 = vld [vmem:[%s5832_s30 + $0x9d4] sm:$0xf0]  ;;  %v4629_v53 = vor.u32 %v5323_v47, %v4628_v45  ;;  %v4596_v45 = vld [vmem:[%s5832_s30 + $0x890] sm:$0xf] }
  0xa8   : > { %2881 = vmatpush.bf16.msrb.mxu2 %v4405_v52  ;;  %v4565_v52 = vor.u32 %v5307_v43, %v4564_v40  ;;  %v4757_v58 = vor.u32 %v5355_v51, %v4756_v50  ;;  %v4532_v40 = vld [vmem:[%s5832_s30 + $0x810] sm:$0xf]  ;;  %v5299_v43 = vld [vmem:[%s5832_s30 + $0x814] sm:$0xf0] }
  0xa9   : > { %2894 = vmatpush.bf16.msrb.mxu3 %v4469_v56  ;;  %v5305_v56 = vld [vmem:[%s5832_s30 + $0x844] sm:$0xf0]  ;;  %v5315_v47 = vld [vmem:[%s5832_s30 + $0x894] sm:$0xf0]  ;;  %v4724_v50 = vld [vmem:[%s5832_s30 + $0x990] sm:$0xf] }
  0xaa   : > { %2856 = vmatpush.bf16.msrb.mxu0 %v4269_v63  ;;  %v5353_v63 = vld [vmem:[%s5832_s30 + $0x9c4] sm:$0xf0]  ;;  %v4557_v0 = vor.u32 %v5305_v56, %v4556_v55  ;;  %v5347_v51 = vld [vmem:[%s5832_s30 + $0x994] sm:$0xf0]  ;;  %v4588_v55 = vld [vmem:[%s5832_s30 + $0x880] sm:$0xf]  ;;  %v4597_v57 = vor.u32 %v5315_v47, %v4596_v45 }
  0xab   : > { %2869 = vmatpush.bf16.msrb.mxu1 %v4333_v5  ;;  %v5303_v5 = vld [vmem:[%s5832_s30 + $0x834] sm:$0xf0]  ;;  %v4749_v8 = vor.u32 %v5353_v63, %v4748_v62  ;;  %v5313_v56 = vld [vmem:[%s5832_s30 + $0x884] sm:$0xf0]  ;;  %v4725_v62 = vor.u32 %v5347_v51, %v4724_v50  ;;  %v4716_v63 = vld [vmem:[%s5832_s30 + $0x980] sm:$0xf] }
  0xac   : > { %2882 = vmatpush.bf16.msrb.mxu2 %v4397_v7  ;;  %v4612_v7 = vld [vmem:[%s5832_s30 + $0x8b0] sm:$0xf]  ;;  %v4549_v14 = vor.u32 %v5303_v5, %v4548_v3  ;;  %v5375_v3 = vld [vmem:[%s5832_s30 + $0xa74] sm:$0xf0]  ;;  %v5020_v47 = vld [vmem:[%s5832_s30 + $0xbe0] sm:$0xf] }
  0xad   : > { %2895 = vmatpush.bf16.msrb.mxu3 %v4461_v12  ;;  %2857 = vmatmul.bf16.vlgmr.msrb.gmra.mxu0 %v6141_v23  ;;  %v4740_v12 = vld [vmem:[%s5832_s30 + $0x9b0] sm:$0xf] }
  0xae   : > { %2901 = vmatpush.bf16.msra.mxu0 %v4581_v13  ;;  %2870 = vmatmul.bf16.vlgmr.msrb.gmra.mxu1 %v6148_v31  ;;  %v5351_v13 = vld [vmem:[%s5832_s30 + $0x9b4] sm:$0xf0]  ;;  %v4900_v5 = vld [vmem:[%s5832_s30 + $0xaf0] sm:$0xf] }
  0xaf   : > { %2914 = vmatpush.bf16.msra.mxu1 %v4645_v15  ;;  %2883 = vmatmul.bf16.vlgmr.msrb.gmra.mxu2 %v6146_v28  ;;  %v4613_v15 = vor.u32 %v5319_v9, %v4612_v7  ;;  %v4964_v9 = vld [vmem:[%s5832_s30 + $0xb70] sm:$0xf] }
  0xb0   : > { %2927 = vmatpush.bf16.msra.mxu2 %v4709_v16  ;;  %2896 = vmatmul.bf16.vlgmr.msrb.gmra.mxu3 %v6152_v35  ;;  %v4677_v16 = vor.u32 %v5335_v11, %v4676_v10  ;;  %v5407_v10 = vld [vmem:[%s5832_s30 + $0xb74] sm:$0xf0]  ;;  %v717_v11 = vunpack.c.l.b16 %v301_v61 }
  0xb1   : > { %2940 = vmatpush.bf16.msra.mxu3 %v4773_v22  ;;  %v4741_v22 = vor.u32 %v5351_v13, %v4740_v12  ;;  %v4589_v12 = vor.u32 %v5313_v56, %v4588_v55  ;;  %v4653_v13 = vor.u32 %v5329_v60, %v4652_v59  ;;  %v4884_v55 = vld [vmem:[%s5832_s30 + $0xad0] sm:$0xf]  ;;  %v5403_v59 = vld [vmem:[%s5832_s30 + $0xb54] sm:$0xf0] }
  0xb2   : > { %2902 = vmatpush.bf16.msra.mxu0 %v4573_v36  ;;  %v4541_v36 = vor.u32 %v5301_v18, %v4540_v17  ;;  %v718_v17 = vunpack.c.h.b16 %v301_v61  ;;  %v5012_v60 = vld [vmem:[%s5832_s30 + $0xbd0] sm:$0xf]  ;;  %v5419_v61 = vld [vmem:[%s5832_s30 + $0xbd4] sm:$0xf0] }
  0xb3   : > { %2915 = vmatpush.bf16.msra.mxu1 %v4637_v37  ;;  %v4605_v37 = vor.u32 %v5317_v24, %v4604_v19 }
  0xb4   : > { %2928 = vmatpush.bf16.msra.mxu2 %v4701_v39  ;;  %v4669_v39 = vor.u32 %v5333_v27, %v4668_v26  ;;  %v4965_v26 = vor.u32 %v5407_v10, %v4964_v9  ;;  %v4828_v27 = vld [vmem:[%s5832_s30 + $0xa60] sm:$0xf]  ;;  %v5401_v9 = vld [vmem:[%s5832_s30 + $0xb44] sm:$0xf0] }
  0xb5   : > { %2941 = vmatpush.bf16.msra.mxu3 %v4765_v46  ;;  %v4733_v46 = vor.u32 %v5349_v34, %v4732_v32  ;;  %v5373_v32 = vld [vmem:[%s5832_s30 + $0xa64] sm:$0xf0]  ;;  %v4892_v34 = vld [vmem:[%s5832_s30 + $0xae0] sm:$0xf] }
  0xb6   : > { %2903 = vmatpush.bf16.msra.mxu0 %v4565_v52  ;;  %v4524_v52 = vld [vmem:[%s5832_s30 + $0x800] sm:$0xf]  ;;  %v4829_v50 = vor.u32 %v5373_v32, %v4828_v27  ;;  %v5415_v27 = vld [vmem:[%s5832_s30 + $0xbb4] sm:$0xf0] }
  0xb7   : > { %2916 = vmatpush.bf16.msra.mxu1 %v4629_v53  ;;  %v4533_v53 = vor.u32 %v5299_v43, %v4532_v40  ;;  %v4956_v40 = vld [vmem:[%s5832_s30 + $0xb60] sm:$0xf]  ;;  %v5405_v43 = vld [vmem:[%s5832_s30 + $0xb64] sm:$0xf0] }
  0xb8   : > { %2929 = vmatpush.bf16.msra.mxu2 %v4693_v54  ;;  %v5297_v54 = vld [vmem:[%s5832_s30 + $0x804] sm:$0xf0]  ;;  %v5004_v10 = vld [vmem:[%s5832_s30 + $0xbc0] sm:$0xf] }
  0xb9   : > { %2942 = vmatpush.bf16.msra.mxu3 %v4757_v58  ;;  %v4661_v58 = vor.u32 %v5331_v49, %v4660_v48  ;;  %v4525_v7 = vor.u32 %v5297_v54, %v4524_v52  ;;  %v5421_v48 = vld [vmem:[%s5832_s30 + $0xbe4] sm:$0xf0]  ;;  %v4957_v52 = vor.u32 %v5405_v43, %v4956_v40  ;;  %v5371_v54 = vld [vmem:[%s5832_s30 + $0xa54] sm:$0xf0]  ;;  %v4860_v43 = vld [vmem:[%s5832_s30 + $0xaa0] sm:$0xf] }
  0xba   : > { %2904 = vmatpush.bf16.msra.mxu0 %v4557_v0  ;;  %v5345_v0 = vld [vmem:[%s5832_s30 + $0x984] sm:$0xf0]  ;;  %v5021_v56 = vor.u32 %v5421_v48, %v5020_v47 }
  0xbb   : > { %2917 = vmatpush.bf16.msra.mxu1 %v4621_v1  ;;  %v302_v1 = vld [vmem:[#allocation3 + $0x48] sm:$0xff]  ;;  %v4717_v18 = vor.u32 %v5345_v0, %v4716_v63 }
  0xbc   : > { %2930 = vmatpush.bf16.msra.mxu2 %v4685_v2  ;;  %v4836_v2 = vld [vmem:[%s5832_s30 + $0xa70] sm:$0xf]  ;;  %v5365_v40 = vld [vmem:[%s5832_s30 + $0xa24] sm:$0xf0] }
  0xbd   : > { %2943 = vmatpush.bf16.msra.mxu3 %v4749_v8  ;;  %v5391_v8 = vld [vmem:[%s5832_s30 + $0xaf4] sm:$0xf0]  ;;  %v4837_v19 = vor.u32 %v5375_v3, %v4836_v2  ;;  %v5369_v2 = vld [vmem:[%s5832_s30 + $0xa44] sm:$0xf0]  ;;  %v4876_v3 = vld [vmem:[%s5832_s30 + $0xac0] sm:$0xf] }
  0xbe   : > { %2905 = vmatpush.bf16.msra.mxu0 %v4549_v14  ;;  %v5028_v14 = vld [vmem:[%s5832_s30 + $0xbf0] sm:$0xf]  ;;  %v4901_v24 = vor.u32 %v5391_v8, %v4900_v5  ;;  %v5013_v5 = vor.u32 %v5419_v61, %v5012_v60  ;;  %v4940_v8 = vld [vmem:[%s5832_s30 + $0xb40] sm:$0xf]  ;;  %v5381_v48 = vld [vmem:[%s5832_s30 + $0xaa4] sm:$0xf0] }
  0xbf   : > { %2918 = vmatpush.bf16.msra.mxu1 %v4613_v15  ;;  %v5423_v15 = vld [vmem:[%s5832_s30 + $0xbf4] sm:$0xf0]  ;;  %v4852_v61 = vld [vmem:[%s5832_s30 + $0xa90] sm:$0xf] }
  0xc0   : > { %2931 = vmatpush.bf16.msra.mxu2 %v4677_v16  ;;  %v719_v16 = vunpack.c.l.b16 %v302_v1  ;;  %v5363_v60 = vld [vmem:[%s5832_s30 + $0xa14] sm:$0xf0] }
  0xc1   : > { %2944 = vmatpush.bf16.msra.mxu3 %v4741_v22  ;;  %v720_v22 = vunpack.c.h.b16 %v302_v1  ;;  %v4812_v1 = vld [vmem:[%s5832_s30 + $0xa40] sm:$0xf] }
  0xc2   : > { %2906 = vmatpush.bf16.msra.mxu0 %v4541_v36  ;;  %v5029_v36 = vor.u32 %v5423_v15, %v5028_v14  ;;  %v6222_v45 = vpack.c.b16 %v719_v16, %v719_v16  ;;  %v4941_v14 = vor.u32 %v5401_v9, %v4940_v8  ;;  %v4804_v15 = vld [vmem:[%s5832_s30 + $0xa30] sm:$0xf]  ;;  %v5367_v16 = vld [vmem:[%s5832_s30 + $0xa34] sm:$0xf0]  ;;  %v4780_v9 = vld [vmem:[%s5832_s30 + $0xa00] sm:$0xf] }
  0xc3   : > { %2919 = vmatpush.bf16.msra.mxu1 %v4605_v37  ;;  %v6217_v37 = vpack.c.b16 %v717_v11, %v717_v11  ;;  %v6228_v49 = vpack.c.b16 %v720_v22, %v720_v22  ;;  %v5417_v11 = vld [vmem:[%s5832_s30 + $0xbc4] sm:$0xf0]  ;;  %v4932_v22 = vld [vmem:[%s5832_s30 + $0xb30] sm:$0xf]  ;;  %v4805_v32 = vor.u32 %v5367_v16, %v4804_v15  ;;  %v5411_v8 = vld [vmem:[%s5832_s30 + $0xb94] sm:$0xf0] }
  0xc4   : > { %2932 = vmatpush.bf16.msra.mxu2 %v4669_v39  ;;  %v5389_v39 = vld [vmem:[%s5832_s30 + $0xae4] sm:$0xf0] }
  0xc5   : > { %2945 = vmatpush.bf16.msra.mxu3 %v4733_v46  ;;  %v6224_v46 = vpack.c.b16 %v718_v17, %v718_v17  ;;  %v4893_v51 = vor.u32 %v5389_v39, %v4892_v34  ;;  %v4868_v17 = vld [vmem:[%s5832_s30 + $0xab0] sm:$0xf]  ;;  %v4796_v39 = vld [vmem:[%s5832_s30 + $0xa20] sm:$0xf] }
  0xc6   : > { %2907 = vmatpush.bf16.msra.mxu0 %v4533_v53  ;;  %v4820_v53 = vld [vmem:[%s5832_s30 + $0xa50] sm:$0xf] }
  0xc7   : > { %2920 = vmatpush.bf16.msra.mxu1 %v4597_v57  ;;  %v5387_v57 = vld [vmem:[%s5832_s30 + $0xad4] sm:$0xf0] }
  0xc8   : > { %2933 = vmatpush.bf16.msra.mxu2 %v4661_v58  ;;  %v4948_v58 = vld [vmem:[%s5832_s30 + $0xb50] sm:$0xf]  ;;  %v4885_v63 = vor.u32 %v5387_v57, %v4884_v55  ;;  %v4797_v55 = vor.u32 %v5365_v40, %v4796_v39  ;;  %v4861_v57 = vor.u32 %v5381_v48, %v4860_v43  ;;  %v5070_v39 = vld [vmem:[%s5832_s30 + $0xf4] sm:$0xf] }
  0xc9   : > { %2946 = vmatpush.bf16.msra.mxu3 %v4725_v62  ;;  %v4821_v62 = vor.u32 %v5371_v54, %v4820_v53  ;;  %v4949_v0 = vor.u32 %v5403_v59, %v4948_v58  ;;  %v5413_v53 = vld [vmem:[%s5832_s30 + $0xba4] sm:$0xf0]  ;;  %v4788_v59 = vld [vmem:[%s5832_s30 + $0xa10] sm:$0xf]  ;;  %v5086_v48 = vld [vmem:[%s5832_s30 + $0x174] sm:$0xf] }
  0xca   : > { %2908 = vmatpush.bf16.msra.mxu0 %v4525_v7  ;;  %v5385_v7 = vld [vmem:[%s5832_s30 + $0xac4] sm:$0xf0]  ;;  %v2702_v54 = vpop.f32.mrf.mxu0 }
  0xcb   : > { %2921 = vmatpush.bf16.msra.mxu1 %v4589_v12  ;;  %v4813_v12 = vor.u32 %v5369_v2, %v4812_v1  ;;  %v5379_v1 = vld [vmem:[%s5832_s30 + $0xa94] sm:$0xf0]  ;;  %v4916_v2 = vld [vmem:[%s5832_s30 + $0xb10] sm:$0xf] }
  0xcc   : > { %2934 = vmatpush.bf16.msra.mxu2 %v4653_v13  ;;  %v4877_v13 = vor.u32 %v5385_v7, %v4876_v3  ;;  %v5395_v3 = vld [vmem:[%s5832_s30 + $0xb14] sm:$0xf0]  ;;  %v4980_v7 = vld [vmem:[%s5832_s30 + $0xb90] sm:$0xf]  ;;  %v4853_v15 = vor.u32 %v5379_v1, %v4852_v61 }
  0xcd   : > { %2947 = vmatpush.bf16.msra.mxu3 %v4717_v18  ;;  %2909 = vmatmul.bf16.vlgmr.msra.gmra.mxu0 %v6217_v37  ;;  %v5005_v18 = vor.u32 %v5417_v11, %v5004_v10  ;;  %v4789_v11 = vor.u32 %v5363_v60, %v4788_v59  ;;  %v4917_v16 = vor.u32 %v5395_v3, %v4916_v2  ;;  %v5052_v2 = vld [vmem:[%s5832_s30 + $0x64] sm:$0xf]  ;;  %v3550_v3 = vld [vmem:[%s5832_s30 + $0x68] sm:$0xf0] }
  0xce   : > { %2953 = vmatpush.bf16.msrb.mxu0 %v4837_v19  ;;  %2922 = vmatmul.bf16.vlgmr.msra.gmra.mxu1 %v6224_v46  ;;  %v5383_v19 = vld [vmem:[%s5832_s30 + $0xab4] sm:$0xf0] }
  0xcf   : > { %2966 = vmatpush.bf16.msrb.mxu1 %v4901_v24  ;;  %2935 = vmatmul.bf16.vlgmr.msra.gmra.mxu2 %v6222_v45  ;;  %v5399_v24 = vld [vmem:[%s5832_s30 + $0xb34] sm:$0xf0]  ;;  %v4869_v34 = vor.u32 %v5383_v19, %v4868_v17  ;;  %v4908_v17 = vld [vmem:[%s5832_s30 + $0xb00] sm:$0xf]  ;;  %v303_v19 = vld [vmem:[#allocation3 + $0x50] sm:$0xff] }
  0xd0   : > { %2979 = vmatpush.bf16.msrb.mxu2 %v4965_v26  ;;  %2948 = vmatmul.bf16.vlgmr.msra.gmra.mxu3 %v6228_v49  ;;  %v4996_v26 = vld [vmem:[%s5832_s30 + $0xbb0] sm:$0xf] }
  0xd1   : > { %2992 = vmatpush.bf16.msrb.mxu3 %v5029_v36  ;;  %v4933_v36 = vor.u32 %v5399_v24, %v4932_v22  ;;  %v4997_v47 = vor.u32 %v5415_v27, %v4996_v26  ;;  %v4981_v24 = vor.u32 %v5411_v8, %v4980_v7  ;;  %v4972_v26 = vld [vmem:[%s5832_s30 + $0xb80] sm:$0xf]  ;;  %v5409_v27 = vld [vmem:[%s5832_s30 + $0xb84] sm:$0xf0] }
  0xd2   : > { %2954 = vmatpush.bf16.msrb.mxu0 %v4829_v50  ;;  %v4924_v50 = vld [vmem:[%s5832_s30 + $0xb20] sm:$0xf]  ;;  %v2704_v40 = vpop.f32.mrf.mxu0  ;;  %v4973_v60 = vor.u32 %v5409_v27, %v4972_v26  ;;  %v3542_v26 = vld [vmem:[%s5832_s30 + $0x58] sm:$0xf0]  ;;  %v5066_v27 = vld [vmem:[%s5832_s30 + $0xd4] sm:$0xf] }
  0xd3   : > { %2967 = vmatpush.bf16.msrb.mxu1 %v4893_v51  ;;  %v5397_v51 = vld [vmem:[%s5832_s30 + $0xb24] sm:$0xf0]  ;;  %v5098_v40 = vld [vmem:[%s5832_s30 + $0x1d4] sm:$0xf] }
  0xd4   : > { %2980 = vmatpush.bf16.msrb.mxu2 %v4957_v52  ;;  %v4988_v52 = vld [vmem:[%s5832_s30 + $0xba0] sm:$0xf]  ;;  %v4925_v58 = vor.u32 %v5397_v51, %v4924_v50  ;;  %v3686_v50 = vld [vmem:[%s5832_s30 + $0x178] sm:$0xf0]  ;;  %v721_v51 = vunpack.c.l.b16 %v303_v19 }
  0xd5   : > { %2993 = vmatpush.bf16.msrb.mxu3 %v5021_v56  ;;  %v2715_v56 = vpop.f32.mrf.mxu1  ;;  %v3689_v1 = vor.u32 %v5086_v48, %v3686_v50 }
  0xd6   : > { %2955 = vmatpush.bf16.msrb.mxu0 %v4821_v62  ;;  %v2716_v62 = vadd.f32 %v2715_v56, %v2702_v54  ;;  %v3750_v56 = vld [vmem:[%s5832_s30 + $0x1f8] sm:$0xf0]  ;;  %v6295_v8 = vpack.c.b16 %v721_v51, %v721_v51  ;;  %v5048_v51 = vld [vmem:[%s5832_s30 + $0x44] sm:$0xf] }
  0xd7   : > { %2968 = vmatpush.bf16.msrb.mxu1 %v4885_v63  ;;  %v2728_v63 = vpop.f32.mrf.mxu2 }
  0xd8   : > { %2981 = vmatpush.bf16.msrb.mxu2 %v4949_v0  ;;  %v4989_v0 = vor.u32 %v5413_v53, %v4988_v52  ;;  %v2729_v10 = vadd.f32 %v2728_v63, %v2716_v62 }
  0xd9   : > { %2994 = vmatpush.bf16.msrb.mxu3 %v5013_v5  ;;  %v2741_v5 = vpop.f32.mrf.mxu3 }
  0xda   : > { %2956 = vmatpush.bf16.msrb.mxu0 %v4813_v12  ;;  %v5361_v12 = vld [vmem:[%s5832_s30 + $0xa04] sm:$0xf0]  ;;  %v6280_v22 = vadd.f32 %v2741_v5, %v2729_v10  ;;  %v5068_v5 = vld [vmem:[%s5832_s30 + $0xe4] sm:$0xf] }
  0xdb   : > { %2969 = vmatpush.bf16.msrb.mxu1 %v4877_v13  ;;  %v4844_v13 = vld [vmem:[%s5832_s30 + $0xa80] sm:$0xf]  ;;  %v4781_v43 = vor.u32 %v5361_v12, %v4780_v9  ;;  %v3614_v9 = vld [vmem:[%s5832_s30 + $0xe8] sm:$0xf0]  ;;  %v5084_v10 = vld [vmem:[%s5832_s30 + $0x164] sm:$0xf] }
  0xdc   : > { %2982 = vmatpush.bf16.msrb.mxu2 %v4941_v14  ;;  %v5377_v14 = vld [vmem:[%s5832_s30 + $0xa84] sm:$0xf0] }
  0xdd   : > { %2995 = vmatpush.bf16.msrb.mxu3 %v5005_v18  ;;  %v5393_v18 = vld [vmem:[%s5832_s30 + $0xb04] sm:$0xf0]  ;;  %v2717_v52 = vpop.f32.mrf.mxu1  ;;  %v4845_v53 = vor.u32 %v5377_v14, %v4844_v13  ;;  %v5100_v14 = vld [vmem:[%s5832_s30 + $0x1e4] sm:$0xf] }
  0xde   : > { %2957 = vmatpush.bf16.msrb.mxu0 %v4805_v32  ;;  %v304_v32 = vld [vmem:[#allocation3 + $0x58] sm:$0xff]  ;;  %v4909_v54 = vor.u32 %v5393_v18, %v4908_v17  ;;  %v3553_v17 = vor.u32 %v5052_v2, %v3550_v3  ;;  %v3617_v18 = vor.u32 %v5068_v5, %v3614_v9  ;;  %v3534_v52 = vld [vmem:[%s5832_s30 + $0x48] sm:$0xf0]  ;;  %v5062_v2 = vld [vmem:[%s5832_s30 + $0xb4] sm:$0xf] }
  0xdf   : > { %2970 = vmatpush.bf16.msrb.mxu1 %v4869_v34  ;;  %v5054_v34 = vld [vmem:[%s5832_s30 + $0x74] sm:$0xf]  ;;  %v2730_v59 = vpop.f32.mrf.mxu2  ;;  %v724_v62 = vunpack.c.h.b16 %v304_v32  ;;  %v3590_v9 = vld [vmem:[%s5832_s30 + $0xb8] sm:$0xf0] }
  0xe0   : > { %2983 = vmatpush.bf16.msrb.mxu2 %v4933_v36  ;;  %v3558_v36 = vld [vmem:[%s5832_s30 + $0x78] sm:$0xf0]  ;;  %v3726_v59 = vld [vmem:[%s5832_s30 + $0x1c8] sm:$0xf0] }
  0xe1   : > { %2996 = vmatpush.bf16.msrb.mxu3 %v4997_v47  ;;  %v3622_v47 = vld [vmem:[%s5832_s30 + $0xf8] sm:$0xf0]  ;;  %v3561_v61 = vor.u32 %v5054_v34, %v3558_v36  ;;  %v2743_v63 = vpop.f32.mrf.mxu3  ;;  %v5082_v36 = vld [vmem:[%s5832_s30 + $0x154] sm:$0xf] }
  0xe2   : > { %2958 = vmatpush.bf16.msrb.mxu0 %v4797_v55  ;;  %v5102_v55 = vld [vmem:[%s5832_s30 + $0x1f4] sm:$0xf]  ;;  %v3606_v34 = vld [vmem:[%s5832_s30 + $0xd8] sm:$0xf0] }
  0xe3   : > { %2971 = vmatpush.bf16.msrb.mxu1 %v4861_v57  ;;  %v723_v57 = vunpack.c.l.b16 %v304_v32  ;;  %v3753_v7 = vor.u32 %v5102_v55, %v3750_v56  ;;  %v3609_v48 = vor.u32 %v5066_v27, %v3606_v34  ;;  %v3598_v55 = vld [vmem:[%s5832_s30 + $0xc8] sm:$0xf0]  ;;  %v5080_v56 = vld [vmem:[%s5832_s30 + $0x144] sm:$0xf] }
  0xe4   : > { %2984 = vmatpush.bf16.msrb.mxu2 %v4925_v58  ;;  %v722_v58 = vunpack.c.h.b16 %v303_v19  ;;  %v5060_v27 = vld [vmem:[%s5832_s30 + $0xa4] sm:$0xf] }
  0xe5   : > { %2997 = vmatpush.bf16.msrb.mxu3 %v4989_v0  ;;  %v3625_v0 = vor.u32 %v5070_v39, %v3622_v47  ;;  %v6300_v12 = vpack.c.b16 %v723_v57, %v723_v57  ;;  %v3670_v39 = vld [vmem:[%s5832_s30 + $0x158] sm:$0xf0]  ;;  %v3662_v57 = vld [vmem:[%s5832_s30 + $0x148] sm:$0xf0] }
  0xe6   : > { %2959 = vmatpush.bf16.msrb.mxu0 %v4789_v11  ;;  %v3678_v11 = vld [vmem:[%s5832_s30 + $0x168] sm:$0xf0]  ;;  %v6302_v13 = vpack.c.b16 %v722_v58, %v722_v58  ;;  %v3673_v50 = vor.u32 %v5082_v36, %v3670_v39  ;;  %v5096_v58 = vld [vmem:[%s5832_s30 + $0x1c4] sm:$0xf]  ;;  %v3665_v63 = vor.u32 %v5080_v56, %v3662_v57  ;;  %v5042_v56 = vld [vmem:[%s5832_s30 + $0x14] sm:$0xf] }
  0xe7   : > { %2972 = vmatpush.bf16.msrb.mxu1 %v4853_v15  ;;  %v3742_v15 = vld [vmem:[%s5832_s30 + $0x1e8] sm:$0xf0]  ;;  %v3681_v19 = vor.u32 %v5084_v10, %v3678_v11  ;;  %v5078_v10 = vld [vmem:[%s5832_s30 + $0x134] sm:$0xf]  ;;  %v3654_v11 = vld [vmem:[%s5832_s30 + $0x138] sm:$0xf0] }
  0xe8   : > { %2985 = vmatpush.bf16.msrb.mxu2 %v4917_v16  ;;  %v6306_v16 = vpack.c.b16 %v724_v62, %v724_v62  ;;  %v3745_v32 = vor.u32 %v5100_v14, %v3742_v15  ;;  %v5094_v14 = vld [vmem:[%s5832_s30 + $0x1b4] sm:$0xf]  ;;  %v3718_v15 = vld [vmem:[%s5832_s30 + $0x1b8] sm:$0xf0]  ;;  %v3582_v36 = vld [vmem:[%s5832_s30 + $0xa8] sm:$0xf0] }
  0xe9   : > { %2998 = vmatpush.bf16.msrb.mxu3 %v4981_v24  ;;  %v5050_v24 = vld [vmem:[%s5832_s30 + $0x54] sm:$0xf]  ;;  %v3721_v34 = vor.u32 %v5094_v14, %v3718_v15  ;;  %v5076_v39 = vld [vmem:[%s5832_s30 + $0x124] sm:$0xf]  ;;  %v3510_v57 = vld [vmem:[%s5832_s30 + $0x18] sm:$0xf0] }
  0xea   : > { %2960 = vmatpush.bf16.msrb.mxu0 %v4781_v43  ;;  %v3734_v43 = vld [vmem:[%s5832_s30 + $0x1d8] sm:$0xf0]  ;;  %v3545_v47 = vor.u32 %v5050_v24, %v3542_v26  ;;  %v5044_v24 = vld [vmem:[%s5832_s30 + $0x24] sm:$0xf]  ;;  %v3518_v26 = vld [vmem:[%s5832_s30 + $0x28] sm:$0xf0] }
  0xeb   : > { %2973 = vmatpush.bf16.msrb.mxu1 %v4845_v53  ;;  %v5064_v53 = vld [vmem:[%s5832_s30 + $0xc4] sm:$0xf]  ;;  %v2767_v5 = vpop.f32.mrf.mxu1 }
  0xec   : > { %2986 = vmatpush.bf16.msrb.mxu2 %v4909_v54  ;;  %v3737_v54 = vor.u32 %v5098_v40, %v3734_v43  ;;  %v3601_v62 = vor.u32 %v5064_v53, %v3598_v55  ;;  %v3646_v40 = vld [vmem:[%s5832_s30 + $0x128] sm:$0xf0]  ;;  %v5072_v14 = vld [vmem:[%s5832_s30 + $0x104] sm:$0xf] }
  0xed   : > { %2999 = vmatpush.bf16.msrb.mxu3 %v4973_v60  ;;  %2961 = vmatmul.bf16.vlgmr.msrb.gmra.mxu0 %v6295_v8  ;;  %v3537_v60 = vor.u32 %v5048_v51, %v3534_v52  ;;  %v3521_v51 = vor.u32 %v5044_v24, %v3518_v26  ;;  %v3649_v55 = vor.u32 %v5076_v39, %v3646_v40  ;;  %v5118_v26 = vld [vmem:[%s5832_s30 + $0x274] sm:$0xf]  ;;  %v3942_v40 = vld [vmem:[%s5832_s30 + $0x378] sm:$0xf0] }
  0xee   : > { %3005 = vmatpush.bf16.msra.mxu0 %v3561_v61  ;;  %2974 = vmatmul.bf16.vlgmr.msrb.gmra.mxu1 %v6302_v13  ;;  %v2754_v61 = vpop.f32.mrf.mxu0  ;;  %v5150_v39 = vld [vmem:[%s5832_s30 + $0x374] sm:$0xf] }
  0xef   : > { %3018 = vmatpush.bf16.msra.mxu1 %v3625_v0  ;;  %2987 = vmatmul.bf16.vlgmr.msrb.gmra.mxu2 %v6300_v12  ;;  %v5046_v0 = vld [vmem:[%s5832_s30 + $0x34] sm:$0xf]  ;;  %v2755_v3 = vadd.f32 %v2754_v61, %v6280_v22  ;;  %v3593_v22 = vor.u32 %v5062_v2, %v3590_v9  ;;  %v3574_v61 = vld [vmem:[%s5832_s30 + $0x98] sm:$0xf0]  ;;  %v3513_v2 = vor.u32 %v5042_v56, %v3510_v57  ;;  %v5116_v56 = vld [vmem:[%s5832_s30 + $0x264] sm:$0xf] }
  0xf0   : > { %3031 = vmatpush.bf16.msra.mxu2 %v3689_v1  ;;  %3000 = vmatmul.bf16.vlgmr.msrb.gmra.mxu3 %v6306_v16  ;;  %v3526_v1 = vld [vmem:[%s5832_s30 + $0x38] sm:$0xf0]  ;;  %v3806_v57 = vld [vmem:[%s5832_s30 + $0x268] sm:$0xf0] }
  0xf1   : > { %3044 = vmatpush.bf16.msra.mxu3 %v3753_v7  ;;  %v3729_v7 = vor.u32 %v5096_v58, %v3726_v59  ;;  %v5058_v58 = vld [vmem:[%s5832_s30 + $0x94] sm:$0xf] }
  0xf2   : > { %3006 = vmatpush.bf16.msra.mxu0 %v3553_v17  ;;  %v2768_v17 = vadd.f32 %v2767_v5, %v2755_v3  ;;  %v5040_v3 = vld [vmem:[%s5832_s30 + $0x4] sm:$0xf]  ;;  %v3502_v5 = vld [vmem:[%s5832_s30 + $0x8] sm:$0xf0] }
  0xf3   : > { %3019 = vmatpush.bf16.msra.mxu1 %v3617_v18  ;;  %v3529_v18 = vor.u32 %v5046_v0, %v3526_v1  ;;  %v2769_v59 = vpop.f32.mrf.mxu1  ;;  %v5090_v0 = vld [vmem:[%s5832_s30 + $0x194] sm:$0xf]  ;;  %v3702_v1 = vld [vmem:[%s5832_s30 + $0x198] sm:$0xf0] }
  0xf4   : > { %3032 = vmatpush.bf16.msra.mxu2 %v3681_v19  ;;  %v3657_v19 = vor.u32 %v5078_v10, %v3654_v11  ;;  %v5056_v10 = vld [vmem:[%s5832_s30 + $0x84] sm:$0xf]  ;;  %v3566_v11 = vld [vmem:[%s5832_s30 + $0x88] sm:$0xf0] }
  0xf5   : > { %3045 = vmatpush.bf16.msra.mxu3 %v3745_v32  ;;  %v2780_v32 = vpop.f32.mrf.mxu2 }
  0xf6   : > { %3007 = vmatpush.bf16.msra.mxu0 %v3545_v47  ;;  %v2781_v43 = vadd.f32 %v2780_v32, %v2768_v17  ;;  %v2793_v47 = vpop.f32.mrf.mxu3  ;;  %v2756_v53 = vpop.f32.mrf.mxu0  ;;  %v3705_v17 = vor.u32 %v5090_v0, %v3702_v1  ;;  %v5134_v32 = vld [vmem:[%s5832_s30 + $0x2f4] sm:$0xf]  ;;  %v3998_v0 = vld [vmem:[%s5832_s30 + $0x3e8] sm:$0xf0]  ;;  %v3809_v1 = vor.u32 %v5116_v56, %v3806_v57  ;;  %v3846_v57 = vld [vmem:[%s5832_s30 + $0x2b8] sm:$0xf0] }
  0xf7   : > { %3020 = vmatpush.bf16.msra.mxu1 %v3609_v48  ;;  %v5092_v48 = vld [vmem:[%s5832_s30 + $0x1a4] sm:$0xf] }
  0xf8   : > { %3033 = vmatpush.bf16.msra.mxu2 %v3673_v50  ;;  %v3710_v50 = vld [vmem:[%s5832_s30 + $0x1a8] sm:$0xf0]  ;;  %v6345_v52 = vadd.f32 %v2793_v47, %v2781_v43  ;;  %v3569_v43 = vor.u32 %v5056_v10, %v3566_v11  ;;  %v3862_v11 = vld [vmem:[%s5832_s30 + $0x2d8] sm:$0xf0] }
  0xf9   : > { %3046 = vmatpush.bf16.msra.mxu3 %v3737_v54  ;;  %v3585_v54 = vor.u32 %v5060_v27, %v3582_v36  ;;  %v3814_v27 = vld [vmem:[%s5832_s30 + $0x278] sm:$0xf0] }
  0xfa   : > { %3008 = vmatpush.bf16.msra.mxu0 %v3537_v60  ;;  %v3713_v60 = vor.u32 %v5092_v48, %v3710_v50  ;;  %v3878_v36 = vld [vmem:[%s5832_s30 + $0x2f8] sm:$0xf0]  ;;  %v5166_v48 = vld [vmem:[%s5832_s30 + $0x3f4] sm:$0xf]  ;;  %v3817_v53 = vor.u32 %v5118_v26, %v3814_v27  ;;  %v3790_v26 = vld [vmem:[%s5832_s30 + $0x248] sm:$0xf0] }
  0xfb   : > { %3021 = vmatpush.bf16.msra.mxu1 %v3601_v62  ;;  %v5074_v62 = vld [vmem:[%s5832_s30 + $0x114] sm:$0xf]  ;;  %v4006_v50 = vld [vmem:[%s5832_s30 + $0x3f8] sm:$0xf0]  ;;  %v5128_v27 = vld [vmem:[%s5832_s30 + $0x2c4] sm:$0xf] }
  0xfc   : > { %3034 = vmatpush.bf16.msra.mxu2 %v3665_v63  ;;  %v3638_v63 = vld [vmem:[%s5832_s30 + $0x118] sm:$0xf0]  ;;  %v4009_v59 = vor.u32 %v5166_v48, %v4006_v50 }
  0xfd   : > { %3047 = vmatpush.bf16.msra.mxu3 %v3729_v7  ;;  %v3577_v7 = vor.u32 %v5058_v58, %v3574_v61  ;;  %v3641_v9 = vor.u32 %v5074_v62, %v3638_v63  ;;  %v2782_v15 = vpop.f32.mrf.mxu2  ;;  %v5132_v58 = vld [vmem:[%s5832_s30 + $0x2e4] sm:$0xf]  ;;  %v3934_v62 = vld [vmem:[%s5832_s30 + $0x368] sm:$0xf0] }
  0xfe   : > { %3009 = vmatpush.bf16.msra.mxu0 %v3529_v18  ;;  %v3630_v18 = vld [vmem:[%s5832_s30 + $0x108] sm:$0xf0]  ;;  %v2795_v24 = vpop.f32.mrf.mxu3  ;;  %v5148_v61 = vld [vmem:[%s5832_s30 + $0x364] sm:$0xf]  ;;  %v3926_v15 = vld [vmem:[%s5832_s30 + $0x358] sm:$0xf0] }
  0xff   : > { %3022 = vmatpush.bf16.msra.mxu1 %v3593_v22  ;;  %v5088_v22 = vld [vmem:[%s5832_s30 + $0x184] sm:$0xf]  ;;  %v3633_v47 = vor.u32 %v5072_v14, %v3630_v18  ;;  %v5146_v14 = vld [vmem:[%s5832_s30 + $0x354] sm:$0xf]  ;;  %v3990_v18 = vld [vmem:[%s5832_s30 + $0x3d8] sm:$0xf0] }
 0x100   : > { %3035 = vmatpush.bf16.msra.mxu2 %v3657_v19  ;;  %v3694_v19 = vld [vmem:[%s5832_s30 + $0x188] sm:$0xf0]  ;;  %v5164_v63 = vld [vmem:[%s5832_s30 + $0x3e4] sm:$0xf]  ;;  %v3929_v24 = vor.u32 %v5146_v14, %v3926_v15 }
 0x101   : > { %3048 = vmatpush.bf16.msra.mxu3 %v3721_v34  ;;  %v3505_v34 = vor.u32 %v5040_v3, %v3502_v5  ;;  %v3937_v3 = vor.u32 %v5148_v61, %v3934_v62  ;;  %v5114_v5 = vld [vmem:[%s5832_s30 + $0x254] sm:$0xf]  ;;  %v4001_v10 = vor.u32 %v5164_v63, %v3998_v0  ;;  %v5108_v0 = vld [vmem:[%s5832_s30 + $0x224] sm:$0xf] }
 0x102   : > { %3010 = vmatpush.bf16.msra.mxu0 %v3521_v51  ;;  %v3697_v51 = vor.u32 %v5088_v22, %v3694_v19  ;;  %v5156_v15 = vld [vmem:[%s5832_s30 + $0x3a4] sm:$0xf] }
 0x103   : > { %3023 = vmatpush.bf16.msra.mxu1 %v3585_v54  ;;  %v3881_v54 = vor.u32 %v5134_v32, %v3878_v36 }
 0x104   : > { %3036 = vmatpush.bf16.msra.mxu2 %v3649_v55  ;;  %v3945_v55 = vor.u32 %v5150_v39, %v3942_v40  ;;  %v5160_v39 = vld [vmem:[%s5832_s30 + $0x3c4] sm:$0xf]  ;;  %v3982_v40 = vld [vmem:[%s5832_s30 + $0x3c8] sm:$0xf0] }
 0x105   : > { %3049 = vmatpush.bf16.msra.mxu3 %v3713_v60  ;;  %v3870_v60 = vld [vmem:[%s5832_s30 + $0x2e8] sm:$0xf0] }
 0x106   : > { %3011 = vmatpush.bf16.msra.mxu0 %v3513_v2  ;;  %v3873_v2 = vor.u32 %v5132_v58, %v3870_v60  ;;  %v5142_v58 = vld [vmem:[%s5832_s30 + $0x334] sm:$0xf]  ;;  %v3974_v60 = vld [vmem:[%s5832_s30 + $0x3b8] sm:$0xf0] }
 0x107   : > { %3024 = vmatpush.bf16.msra.mxu1 %v3577_v7  ;;  %v3798_v7 = vld [vmem:[%s5832_s30 + $0x258] sm:$0xf0] }
 0x108   : > { %3037 = vmatpush.bf16.msra.mxu2 %v3641_v9  ;;  %v5130_v9 = vld [vmem:[%s5832_s30 + $0x2d4] sm:$0xf]  ;;  %v3801_v22 = vor.u32 %v5114_v5, %v3798_v7  ;;  %v3838_v7 = vld [vmem:[%s5832_s30 + $0x2a8] sm:$0xf0] }
 0x109   : > { %3050 = vmatpush.bf16.msra.mxu3 %v3705_v17  ;;  %v5162_v17 = vld [vmem:[%s5832_s30 + $0x3d4] sm:$0xf]  ;;  %v3865_v19 = vor.u32 %v5130_v9, %v3862_v11  ;;  %v5140_v9 = vld [vmem:[%s5832_s30 + $0x324] sm:$0xf] }
 0x10a   : > { %3012 = vmatpush.bf16.msra.mxu0 %v3505_v34  ;;  %v3993_v32 = vor.u32 %v5162_v17, %v3990_v18  ;;  %v3918_v34 = vld [vmem:[%s5832_s30 + $0x348] sm:$0xf0]  ;;  %v2806_v36 = vpop.f32.mrf.mxu0 }
 0x10b   : > { %3025 = vmatpush.bf16.msra.mxu1 %v3569_v43  ;;  %v3966_v17 = vld [vmem:[%s5832_s30 + $0x3a8] sm:$0xf0] }
 0x10c   : > { %3038 = vmatpush.bf16.msra.mxu2 %v3633_v47  ;;  %v2819_v47 = vpop.f32.mrf.mxu1 }
 0x10d   : > { %3051 = vmatpush.bf16.msra.mxu3 %v3697_v51  ;;  %3013 = vmatmul.bf16.vlgmr.msra.gmra.mxu0 %v5939_v20  ;;  %v3854_v20 = vld [vmem:[%s5832_s30 + $0x2c8] sm:$0xf0]  ;;  %v5110_v51 = vld [vmem:[%s5832_s30 + $0x234] sm:$0xf] }
 0x10e   : > { %3057 = vmatpush.bf16.msrb.mxu0 %v3817_v53  ;;  %3026 = vmatmul.bf16.vlgmr.msra.gmra.mxu1 %v5942_v21  ;;  %v2807_v21 = vadd.f32 %v2806_v36, %v6345_v52  ;;  %v3857_v48 = vor.u32 %v5128_v27, %v3854_v20  ;;  %v3782_v53 = vld [vmem:[%s5832_s30 + $0x238] sm:$0xf0]  ;;  %v5106_v27 = vld [vmem:[%s5832_s30 + $0x214] sm:$0xf] }
 0x10f   : > { %3070 = vmatpush.bf16.msrb.mxu1 %v3881_v54  ;;  %3039 = vmatmul.bf16.vlgmr.msra.gmra.mxu2 %v5926_v4  ;;  %v5112_v4 = vld [vmem:[%s5832_s30 + $0x244] sm:$0xf]  ;;  %v5126_v54 = vld [vmem:[%s5832_s30 + $0x2b4] sm:$0xf]  ;;  %v3910_v52 = vld [vmem:[%s5832_s30 + $0x338] sm:$0xf0]  ;;  %v3785_v61 = vor.u32 %v5110_v51, %v3782_v53 }
 0x110   : > { %3083 = vmatpush.bf16.msrb.mxu2 %v3945_v55  ;;  %3052 = vmatmul.bf16.vlgmr.msra.gmra.mxu3 %v5928_v6  ;;  %v5144_v6 = vld [vmem:[%s5832_s30 + $0x344] sm:$0xf]  ;;  %v3793_v43 = vor.u32 %v5112_v4, %v3790_v26  ;;  %v3985_v55 = vor.u32 %v5160_v39, %v3982_v40  ;;  %v2820_v56 = vadd.f32 %v2819_v47, %v2807_v21  ;;  %v5122_v20 = vld [vmem:[%s5832_s30 + $0x294] sm:$0xf]  ;;  %v3894_v39 = vld [vmem:[%s5832_s30 + $0x318] sm:$0xf0] }
 0x111   : > { %3096 = vmatpush.bf16.msrb.mxu3 %v4009_v59  ;;  %v3921_v50 = vor.u32 %v5144_v6, %v3918_v34  ;;  %v5158_v59 = vld [vmem:[%s5832_s30 + $0x3b4] sm:$0xf]  ;;  %v3849_v62 = vor.u32 %v5126_v54, %v3846_v57  ;;  %v3913_v63 = vor.u32 %v5142_v58, %v3910_v52  ;;  %v3969_v6 = vor.u32 %v5156_v15, %v3966_v17  ;;  %v3830_v34 = vld [vmem:[%s5832_s30 + $0x298] sm:$0xf0]  ;;  %v5104_v47 = vld [vmem:[%s5832_s30 + $0x204] sm:$0xf] }
 0x112   : > { %3058 = vmatpush.bf16.msrb.mxu0 %v3809_v1  ;;  %v3774_v1 = vld [vmem:[%s5832_s30 + $0x228] sm:$0xf0]  ;;  %v2832_v5 = vpop.f32.mrf.mxu2  ;;  %v2808_v18 = vpop.f32.mrf.mxu0  ;;  %v5138_v36 = vld [vmem:[%s5832_s30 + $0x314] sm:$0xf]  ;;  %v3958_v21 = vld [vmem:[%s5832_s30 + $0x398] sm:$0xf0] }
 0x113   : > { %3071 = vmatpush.bf16.msrb.mxu1 %v3873_v2  ;;  %v5124_v2 = vld [vmem:[%s5832_s30 + $0x2a4] sm:$0xf]  ;;  %v2833_v11 = vadd.f32 %v2832_v5, %v2820_v56  ;;  %v2845_v14 = vpop.f32.mrf.mxu3  ;;  %v5154_v40 = vld [vmem:[%s5832_s30 + $0x394] sm:$0xf]  ;;  %v3897_v51 = vor.u32 %v5138_v36, %v3894_v39  ;;  %v3822_v54 = vld [vmem:[%s5832_s30 + $0x288] sm:$0xf0] }
 0x114   : > { %3084 = vmatpush.bf16.msrb.mxu2 %v3937_v3  ;;  %v3977_v3 = vor.u32 %v5158_v59, %v3974_v60  ;;  %v3841_v4 = vor.u32 %v5124_v2, %v3838_v7  ;;  %v5120_v53 = vld [vmem:[%s5832_s30 + $0x284] sm:$0xf]  ;;  %v3961_v56 = vor.u32 %v5154_v40, %v3958_v21  ;;  %v3886_v57 = vld [vmem:[%s5832_s30 + $0x308] sm:$0xf0]  ;;  %v5182_v60 = vld [vmem:[%s5832_s30 + $0x474] sm:$0xf] }
 0x115   : > { %3097 = vmatpush.bf16.msrb.mxu3 %v4001_v10  ;;  %v3902_v10 = vld [vmem:[%s5832_s30 + $0x328] sm:$0xf0]  ;;  %v5152_v58 = vld [vmem:[%s5832_s30 + $0x384] sm:$0xf]  ;;  %v5214_v2 = vld [vmem:[%s5832_s30 + $0x574] sm:$0xf]  ;;  %v3825_v5 = vor.u32 %v5120_v53, %v3822_v54 }
 0x116   : > { %3059 = vmatpush.bf16.msrb.mxu0 %v3801_v22  ;;  %v3777_v22 = vor.u32 %v5108_v0, %v3774_v1  ;;  %v3905_v26 = vor.u32 %v5140_v9, %v3902_v10  ;;  %v3950_v52 = vld [vmem:[%s5832_s30 + $0x388] sm:$0xf0]  ;;  %v4134_v1 = vld [vmem:[%s5832_s30 + $0x4f8] sm:$0xf0]  ;;  %v5230_v9 = vld [vmem:[%s5832_s30 + $0x5f4] sm:$0xf] }
 0x117   : > { %3072 = vmatpush.bf16.msrb.mxu1 %v3865_v19  ;;  %v2821_v19 = vpop.f32.mrf.mxu1  ;;  %v4262_v10 = vld [vmem:[%s5832_s30 + $0x5f8] sm:$0xf0]  ;;  %v5180_v18 = vld [vmem:[%s5832_s30 + $0x464] sm:$0xf]  ;;  %v5178_v40 = vld [vmem:[%s5832_s30 + $0x454] sm:$0xf] }
 0x118   : > { %3085 = vmatpush.bf16.msrb.mxu2 %v3929_v24  ;;  %v6416_v24 = vadd.f32 %v2845_v14, %v2833_v11  ;;  %v3953_v11 = vor.u32 %v5152_v58, %v3950_v52  ;;  %v5196_v19 = vld [vmem:[%s5832_s30 + $0x4e4] sm:$0xf]  ;;  %v4054_v21 = vld [vmem:[%s5832_s30 + $0x458] sm:$0xf0]  ;;  %v5226_v53 = vld [vmem:[%s5832_s30 + $0x5d4] sm:$0xf] }
 0x119   : > { %3098 = vmatpush.bf16.msrb.mxu3 %v3993_v32  ;;  %v3766_v32 = vld [vmem:[%s5832_s30 + $0x218] sm:$0xf0]  ;;  %v4046_v58 = vld [vmem:[%s5832_s30 + $0x448] sm:$0xf0] }
 0x11a   : > { %3060 = vmatpush.bf16.msrb.mxu0 %v3793_v43  ;;  %v3769_v43 = vor.u32 %v5106_v27, %v3766_v32  ;;  %v2834_v59 = vpop.f32.mrf.mxu2  ;;  %v5212_v27 = vld [vmem:[%s5832_s30 + $0x564] sm:$0xf]  ;;  %v4190_v32 = vld [vmem:[%s5832_s30 + $0x568] sm:$0xf0]  ;;  %v4246_v54 = vld [vmem:[%s5832_s30 + $0x5d8] sm:$0xf0] }
 0x11b   : > { %3073 = vmatpush.bf16.msrb.mxu1 %v3857_v48  ;;  %v3758_v48 = vld [vmem:[%s5832_s30 + $0x208] sm:$0xf0]  ;;  %v4193_v39 = vor.u32 %v5212_v27, %v4190_v32  ;;  %v5208_v59 = vld [vmem:[%s5832_s30 + $0x544] sm:$0xf] }
 0x11c   : > { %3086 = vmatpush.bf16.msrb.mxu2 %v3921_v50  ;;  %v3833_v50 = vor.u32 %v5122_v20, %v3830_v34  ;;  %v3761_v0 = vor.u32 %v5104_v47, %v3758_v48  ;;  %v5228_v20 = vld [vmem:[%s5832_s30 + $0x5e4] sm:$0xf]  ;;  %v4118_v48 = vld [vmem:[%s5832_s30 + $0x4d8] sm:$0xf0]  ;;  %v4110_v52 = vld [vmem:[%s5832_s30 + $0x4c8] sm:$0xf0] }
 0x11d   : > { %3099 = vmatpush.bf16.msrb.mxu3 %v3985_v55  ;;  %v5136_v55 = vld [vmem:[%s5832_s30 + $0x304] sm:$0xf] }
 0x11e   : > { %3061 = vmatpush.bf16.msrb.mxu0 %v3785_v61  ;;  %v4070_v61 = vld [vmem:[%s5832_s30 + $0x478] sm:$0xf0]  ;;  %v3889_v7 = vor.u32 %v5136_v55, %v3886_v57  ;;  %v4057_v55 = vor.u32 %v5178_v40, %v4054_v21  ;;  %v5176_v57 = vld [vmem:[%s5832_s30 + $0x444] sm:$0xf]  ;;  %v4222_v21 = vld [vmem:[%s5832_s30 + $0x5a8] sm:$0xf0] }
 0x11f   : > { %3074 = vmatpush.bf16.msrb.mxu1 %v3849_v62  ;;  %v5198_v62 = vld [vmem:[%s5832_s30 + $0x4f4] sm:$0xf]  ;;  %v4073_v14 = vor.u32 %v5182_v60, %v4070_v61  ;;  %v4174_v60 = vld [vmem:[%s5832_s30 + $0x548] sm:$0xf0]  ;;  %v5188_v27 = vld [vmem:[%s5832_s30 + $0x4a4] sm:$0xf] }
 0x120   : > { %3087 = vmatpush.bf16.msrb.mxu2 %v3913_v63  ;;  %v2847_v63 = vpop.f32.mrf.mxu3  ;;  %v4137_v15 = vor.u32 %v5198_v62, %v4134_v1  ;;  %v4238_v62 = vld [vmem:[%s5832_s30 + $0x5c8] sm:$0xf0]  ;;  %v5220_v40 = vld [vmem:[%s5832_s30 + $0x5a4] sm:$0xf] }
 0x121   : > { %3100 = vmatpush.bf16.msrb.mxu3 %v3977_v3  ;;  %v4198_v3 = vld [vmem:[%s5832_s30 + $0x578] sm:$0xf0]  ;;  %v4049_v63 = vor.u32 %v5176_v57, %v4046_v58  ;;  %v5202_v57 = vld [vmem:[%s5832_s30 + $0x514] sm:$0xf] }
 0x122   : > { %3062 = vmatpush.bf16.msrb.mxu0 %v3777_v22  ;;  %v4201_v17 = vor.u32 %v5214_v2, %v4198_v3  ;;  %v4062_v22 = vld [vmem:[%s5832_s30 + $0x468] sm:$0xf0]  ;;  %v4177_v2 = vor.u32 %v5208_v59, %v4174_v60  ;;  %v5174_v3 = vld [vmem:[%s5832_s30 + $0x434] sm:$0xf]  ;;  %v4150_v58 = vld [vmem:[%s5832_s30 + $0x518] sm:$0xf0] }
 0x123   : > { %3075 = vmatpush.bf16.msrb.mxu1 %v3841_v4  ;;  %v4265_v4 = vor.u32 %v5230_v9, %v4262_v10  ;;  %v4065_v34 = vor.u32 %v5180_v18, %v4062_v22  ;;  %v4102_v10 = vld [vmem:[%s5832_s30 + $0x4b8] sm:$0xf0]  ;;  %v5168_v59 = vld [vmem:[%s5832_s30 + $0x404] sm:$0xf]  ;;  %v4014_v60 = vld [vmem:[%s5832_s30 + $0x408] sm:$0xf0] }
 0x124   : > { %3088 = vmatpush.bf16.msrb.mxu2 %v3905_v26  ;;  %v4126_v26 = vld [vmem:[%s5832_s30 + $0x4e8] sm:$0xf0] }
 0x125   : > { %3101 = vmatpush.bf16.msrb.mxu3 %v3969_v6  ;;  %v4254_v6 = vld [vmem:[%s5832_s30 + $0x5e8] sm:$0xf0]  ;;  %v4129_v36 = vor.u32 %v5196_v19, %v4126_v26 }
 0x126   : > { %3063 = vmatpush.bf16.msrb.mxu0 %v3769_v43  ;;  %v5194_v43 = vld [vmem:[%s5832_s30 + $0x4d4] sm:$0xf]  ;;  %v4257_v47 = vor.u32 %v5228_v20, %v4254_v6  ;;  %v4030_v26 = vld [vmem:[%s5832_s30 + $0x428] sm:$0xf0] }
 0x127   : > { %3076 = vmatpush.bf16.msrb.mxu1 %v3833_v50  ;;  %v5210_v50 = vld [vmem:[%s5832_s30 + $0x554] sm:$0xf]  ;;  %v4094_v6 = vld [vmem:[%s5832_s30 + $0x4a8] sm:$0xf0] }
 0x128   : > { %3089 = vmatpush.bf16.msrb.mxu2 %v3897_v51  ;;  %v4182_v51 = vld [vmem:[%s5832_s30 + $0x558] sm:$0xf0] }
 0x129   : > { %3102 = vmatpush.bf16.msrb.mxu3 %v3961_v56  ;;  %v4185_v56 = vor.u32 %v5210_v50, %v4182_v51  ;;  %v4097_v50 = vor.u32 %v5188_v27, %v4094_v6  ;;  %v4518_v6 = vld [vmem:[%s5832_s30 + $0x7f8] sm:$0xf0] }
 0x12a   : > { %3064 = vmatpush.bf16.msrb.mxu0 %v3761_v0  ;;  %v6468_v61 = vpop.f32.mrf.mxu0 }
 0x12b   : > { %3077 = vmatpush.bf16.msrb.mxu1 %v3825_v5  ;;  %v6472_v0 = vpop.f32.mrf.mxu1  ;;  %v4038_v5 = vld [vmem:[%s5832_s30 + $0x438] sm:$0xf0] }
 0x12c   : > { %3090 = vmatpush.bf16.msrb.mxu2 %v3889_v7  ;;  %v5190_v7 = vld [vmem:[%s5832_s30 + $0x4b4] sm:$0xf]  ;;  %v4041_v18 = vor.u32 %v5174_v3, %v4038_v5  ;;  %v4142_v5 = vld [vmem:[%s5832_s30 + $0x508] sm:$0xf0] }
 0x12d   : > { %3103 = vmatpush.bf16.msrb.mxu3 %v3953_v11  ;;  %3065 = vmatmul.bf16.vlgmr.msrb.gmra.mxu0 %v5996_v41  ;;  %v5192_v41 = vld [vmem:[%s5832_s30 + $0x4c4] sm:$0xf]  ;;  %v5206_v11 = vld [vmem:[%s5832_s30 + $0x534] sm:$0xf]  ;;  %v4105_v22 = vor.u32 %v5190_v7, %v4102_v10 }
 0x12e   : > { %3109 = vmatpush.bf16.msra.mxu0 %v4073_v14  ;;  %3078 = vmatmul.bf16.vlgmr.msrb.gmra.mxu1 %v6000_v44  ;;  %v5224_v44 = vld [vmem:[%s5832_s30 + $0x5c4] sm:$0xf]  ;;  %v4113_v1 = vor.u32 %v5192_v41, %v4110_v52  ;;  %v4166_v14 = vld [vmem:[%s5832_s30 + $0x538] sm:$0xf0]  ;;  %v5218_v41 = vld [vmem:[%s5832_s30 + $0x594] sm:$0xf] }
 0x12f   : > { %3122 = vmatpush.bf16.msra.mxu1 %v4137_v15  ;;  %3091 = vmatmul.bf16.vlgmr.msrb.gmra.mxu2 %v5992_v38  ;;  %v4121_v38 = vor.u32 %v5194_v43, %v4118_v48  ;;  %v4241_v9 = vor.u32 %v5224_v44, %v4238_v62  ;;  %v5222_v15 = vld [vmem:[%s5832_s30 + $0x5b4] sm:$0xf]  ;;  %v4169_v19 = vor.u32 %v5206_v11, %v4166_v14  ;;  %v5216_v7 = vld [vmem:[%s5832_s30 + $0x584] sm:$0xf]  ;;  %v4326_v14 = vld [vmem:[%s5832_s30 + $0x678] sm:$0xf0] }
 0x130   : > { %3135 = vmatpush.bf16.msra.mxu2 %v4201_v17  ;;  %3104 = vmatmul.bf16.vlgmr.msrb.gmra.mxu3 %v5998_v42  ;;  %v4249_v42 = vor.u32 %v5226_v53, %v4246_v54  ;;  %v4230_v17 = vld [vmem:[%s5832_s30 + $0x5b8] sm:$0xf0]  ;;  %v5170_v53 = vld [vmem:[%s5832_s30 + $0x414] sm:$0xf]  ;;  %v4153_v62 = vor.u32 %v5202_v57, %v4150_v58 }
 0x131   : > { %3148 = vmatpush.bf16.msra.mxu3 %v4265_v4  ;;  %v5172_v4 = vld [vmem:[%s5832_s30 + $0x424] sm:$0xf]  ;;  %v4233_v32 = vor.u32 %v5222_v15, %v4230_v17  ;;  %v4022_v54 = vld [vmem:[%s5832_s30 + $0x418] sm:$0xf0]  ;;  %v5246_v11 = vld [vmem:[%s5832_s30 + $0x674] sm:$0xf] }
 0x132   : > { %3110 = vmatpush.bf16.msra.mxu0 %v4065_v34  ;;  %v6485_v20 = vpop.f32.mrf.mxu2  ;;  %v5204_v34 = vld [vmem:[%s5832_s30 + $0x524] sm:$0xf]  ;;  %v2860_v43 = vpop.f32.mrf.mxu0  ;;  %v4025_v52 = vor.u32 %v5170_v53, %v4022_v54  ;;  %v5262_v15 = vld [vmem:[%s5832_s30 + $0x6f4] sm:$0xf]  ;;  %v4446_v54 = vld [vmem:[%s5832_s30 + $0x768] sm:$0xf0] }
 0x133   : > { %3123 = vmatpush.bf16.msra.mxu1 %v4129_v36  ;;  %v4158_v36 = vld [vmem:[%s5832_s30 + $0x528] sm:$0xf0]  ;;  %v2873_v48 = vpop.f32.mrf.mxu1  ;;  %v5244_v43 = vld [vmem:[%s5832_s30 + $0x664] sm:$0xf] }
 0x134   : > { %3136 = vmatpush.bf16.msra.mxu2 %v4193_v39  ;;  %v6490_v39 = vpop.f32.mrf.mxu3  ;;  %v4161_v51 = vor.u32 %v5204_v34, %v4158_v36  ;;  %v4329_v36 = vor.u32 %v5246_v11, %v4326_v14  ;;  %v5260_v48 = vld [vmem:[%s5832_s30 + $0x6e4] sm:$0xf]  ;;  %v4430_v11 = vld [vmem:[%s5832_s30 + $0x748] sm:$0xf0] }
 0x135   : > { %3149 = vmatpush.bf16.msra.mxu3 %v4257_v47  ;;  %v4033_v47 = vor.u32 %v5172_v4, %v4030_v26  ;;  %v4454_v4 = vld [vmem:[%s5832_s30 + $0x778] sm:$0xf0]  ;;  %v5276_v53 = vld [vmem:[%s5832_s30 + $0x764] sm:$0xf] }
 0x136   : > { %3111 = vmatpush.bf16.msra.mxu0 %v4057_v55  ;;  %v5186_v55 = vld [vmem:[%s5832_s30 + $0x494] sm:$0xf]  ;;  %v4449_v58 = vor.u32 %v5276_v53, %v4446_v54  ;;  %v5288_v14 = vld [vmem:[%s5832_s30 + $0x7c4] sm:$0xf] }
 0x137   : > { %3124 = vmatpush.bf16.msra.mxu1 %v4121_v38  ;;  %v4225_v38 = vor.u32 %v5220_v40, %v4222_v21  ;;  %v5252_v53 = vld [vmem:[%s5832_s30 + $0x6a4] sm:$0xf] }
 0x138   : > { %3137 = vmatpush.bf16.msra.mxu2 %v4185_v56  ;;  %v4086_v56 = vld [vmem:[%s5832_s30 + $0x498] sm:$0xf0] }
 0x139   : > { %3150 = vmatpush.bf16.msra.mxu3 %v4249_v42  ;;  %v4214_v42 = vld [vmem:[%s5832_s30 + $0x598] sm:$0xf0]  ;;  %v4089_v44 = vor.u32 %v5186_v55, %v4086_v56  ;;  %v5292_v55 = vld [vmem:[%s5832_s30 + $0x7e4] sm:$0xf] }
 0x13a   : > { %3112 = vmatpush.bf16.msra.mxu0 %v4049_v63  ;;  %v5184_v63 = vld [vmem:[%s5832_s30 + $0x484] sm:$0xf]  ;;  %v4217_v3 = vor.u32 %v5218_v41, %v4214_v42  ;;  %v2886_v10 = vpop.f32.mrf.mxu2  ;;  %v5242_v41 = vld [vmem:[%s5832_s30 + $0x654] sm:$0xf]  ;;  %v4310_v42 = vld [vmem:[%s5832_s30 + $0x658] sm:$0xf0] }
 0x13b   : > { %3125 = vmatpush.bf16.msra.mxu1 %v4113_v1  ;;  %v4078_v1 = vld [vmem:[%s5832_s30 + $0x488] sm:$0xf0]  ;;  %v5272_v10 = vld [vmem:[%s5832_s30 + $0x744] sm:$0xf] }
 0x13c   : > { %3138 = vmatpush.bf16.msra.mxu2 %v4177_v2  ;;  %v5200_v2 = vld [vmem:[%s5832_s30 + $0x504] sm:$0xf]  ;;  %v2899_v17 = vpop.f32.mrf.mxu3  ;;  %v4081_v26 = vor.u32 %v5184_v63, %v4078_v1  ;;  %v5290_v63 = vld [vmem:[%s5832_s30 + $0x7d4] sm:$0xf]  ;;  %v4502_v1 = vld [vmem:[%s5832_s30 + $0x7d8] sm:$0xf0] }
 0x13d   : > { %3151 = vmatpush.bf16.msra.mxu3 %v4241_v9  ;;  %v4206_v9 = vld [vmem:[%s5832_s30 + $0x588] sm:$0xf0]  ;;  %v4145_v27 = vor.u32 %v5200_v2, %v4142_v5  ;;  %v5240_v5 = vld [vmem:[%s5832_s30 + $0x644] sm:$0xf] }
 0x13e   : > { %3113 = vmatpush.bf16.msra.mxu0 %v4041_v18  ;;  %v4017_v18 = vor.u32 %v5168_v59, %v4014_v60  ;;  %v4209_v34 = vor.u32 %v5216_v7, %v4206_v9  ;;  %v4374_v60 = vld [vmem:[%s5832_s30 + $0x6d8] sm:$0xf0]  ;;  %v4302_v7 = vld [vmem:[%s5832_s30 + $0x648] sm:$0xf0] }
 0x13f   : > { %3126 = vmatpush.bf16.msra.mxu1 %v4105_v22  ;;  %v4390_v22 = vld [vmem:[%s5832_s30 + $0x6f8] sm:$0xf0]  ;;  %v4366_v9 = vld [vmem:[%s5832_s30 + $0x6c8] sm:$0xf0]  ;;  %v4305_v17 = vor.u32 %v5240_v5, %v4302_v7 }
 0x140   : > { %3139 = vmatpush.bf16.msra.mxu2 %v4169_v19  ;;  %v5278_v19 = vld [vmem:[%s5832_s30 + $0x774] sm:$0xf]  ;;  %v4393_v40 = vor.u32 %v5262_v15, %v4390_v22  ;;  %v4494_v15 = vld [vmem:[%s5832_s30 + $0x7c8] sm:$0xf0]  ;;  %v4406_v5 = vld [vmem:[%s5832_s30 + $0x718] sm:$0xf0] }
 0x141   : > { %3152 = vmatpush.bf16.msra.mxu3 %v4233_v32  ;;  %v5294_v32 = vld [vmem:[%s5832_s30 + $0x7f4] sm:$0xf]  ;;  %v4457_v21 = vor.u32 %v5278_v19, %v4454_v4  ;;  %v4433_v19 = vor.u32 %v5272_v10, %v4430_v11  ;;  %v5232_v10 = vld [vmem:[%s5832_s30 + $0x604] sm:$0xf]  ;;  %v4270_v11 = vld [vmem:[%s5832_s30 + $0x608] sm:$0xf0] }
 0x142   : > { %3114 = vmatpush.bf16.msra.mxu0 %v4033_v47  ;;  %v4318_v47 = vld [vmem:[%s5832_s30 + $0x668] sm:$0xf0]  ;;  %v5238_v4 = vld [vmem:[%s5832_s30 + $0x634] sm:$0xf] }
 0x143   : > { %3127 = vmatpush.bf16.msra.mxu1 %v4097_v50  ;;  %v4521_v50 = vor.u32 %v5294_v32, %v4518_v6  ;;  %v4321_v56 = vor.u32 %v5244_v43, %v4318_v47  ;;  %v4497_v32 = vor.u32 %v5288_v14, %v4494_v15  ;;  %v4358_v6 = vld [vmem:[%s5832_s30 + $0x6b8] sm:$0xf0] }
 0x144   : > { %3140 = vmatpush.bf16.msra.mxu2 %v4161_v51  ;;  %v4382_v51 = vld [vmem:[%s5832_s30 + $0x6e8] sm:$0xf0] }
 0x145   : > { %3153 = vmatpush.bf16.msra.mxu3 %v4225_v38  ;;  %v4510_v38 = vld [vmem:[%s5832_s30 + $0x7e8] sm:$0xf0]  ;;  %v4385_v57 = vor.u32 %v5260_v48, %v4382_v51 }
 0x146   : > { %3115 = vmatpush.bf16.msra.mxu0 %v4025_v52  ;;  %v5258_v52 = vld [vmem:[%s5832_s30 + $0x6d4] sm:$0xf]  ;;  %v4513_v59 = vor.u32 %v5292_v55, %v4510_v38  ;;  %v4286_v51 = vld [vmem:[%s5832_s30 + $0x628] sm:$0xf0] }
 0x147   : > { %3128 = vmatpush.bf16.msra.mxu1 %v4089_v44  ;;  %v5274_v44 = vld [vmem:[%s5832_s30 + $0x754] sm:$0xf]  ;;  %v4377_v2 = vor.u32 %v5258_v52, %v4374_v60  ;;  %v4350_v38 = vld [vmem:[%s5832_s30 + $0x6a8] sm:$0xf0] }
 0x148   : > { %3141 = vmatpush.bf16.msra.mxu2 %v4153_v62  ;;  %v4438_v62 = vld [vmem:[%s5832_s30 + $0x758] sm:$0xf0]  ;;  %v4478_v52 = vld [vmem:[%s5832_s30 + $0x7a8] sm:$0xf0] }
 0x149   : > { %3154 = vmatpush.bf16.msra.mxu3 %v4217_v3  ;;  %v4441_v3 = vor.u32 %v5274_v44, %v4438_v62  ;;  %v4353_v62 = vor.u32 %v5252_v53, %v4350_v38  ;;  %v4774_v38 = vld [vmem:[%s5832_s30 + $0x9f8] sm:$0xf0] }
 0x14a   : > { %3116 = vmatpush.bf16.msra.mxu0 %v4017_v18 }
 0x14b   : > { %3129 = vmatpush.bf16.msra.mxu1 %v4081_v26  ;;  %v6548_v18 = vpop.f32.mrf.mxu1  ;;  %v4294_v26 = vld [vmem:[%s5832_s30 + $0x638] sm:$0xf0] }
 0x14c   : > { %3142 = vmatpush.bf16.msra.mxu2 %v4145_v27  ;;  %v5254_v27 = vld [vmem:[%s5832_s30 + $0x6b4] sm:$0xf]  ;;  %v4297_v43 = vor.u32 %v5238_v4, %v4294_v26  ;;  %v4398_v26 = vld [vmem:[%s5832_s30 + $0x708] sm:$0xf0] }
 0x14d   : > { %3155 = vmatpush.bf16.msra.mxu3 %v4209_v34  ;;  %3117 = vmatmul.bf16.vlgmr.msra.gmra.mxu0 %v6065_v25  ;;  %v4313_v25 = vor.u32 %v5242_v41, %v4310_v42  ;;  %v5270_v34 = vld [vmem:[%s5832_s30 + $0x734] sm:$0xf]  ;;  %v4361_v47 = vor.u32 %v5254_v27, %v4358_v6  ;;  %v5284_v42 = vld [vmem:[%s5832_s30 + $0x7a4] sm:$0xf] }
 0x14e   : > { %3161 = vmatpush.bf16.msrb.mxu0 %v4329_v36  ;;  %3130 = vmatmul.bf16.vlgmr.msra.gmra.mxu1 %v6072_v30  ;;  %v4505_v30 = vor.u32 %v5290_v63, %v4502_v1  ;;  %v4422_v36 = vld [vmem:[%s5832_s30 + $0x738] sm:$0xf0]  ;;  %v5250_v1 = vld [vmem:[%s5832_s30 + $0x694] sm:$0xf]  ;;  %v5280_v27 = vld [vmem:[%s5832_s30 + $0x784] sm:$0xf] }
 0x14f   : > { %3174 = vmatpush.bf16.msrb.mxu1 %v4393_v40  ;;  %3143 = vmatmul.bf16.vlgmr.msra.gmra.mxu2 %v6070_v29  ;;  %v5256_v29 = vld [vmem:[%s5832_s30 + $0x6c4] sm:$0xf]  ;;  %v5286_v40 = vld [vmem:[%s5832_s30 + $0x7b4] sm:$0xf]  ;;  %v4425_v48 = vor.u32 %v5270_v34, %v4422_v36  ;;  %v4582_v34 = vld [vmem:[%s5832_s30 + $0x878] sm:$0xf0] }
 0x150   : > { %3187 = vmatpush.bf16.msrb.mxu2 %v4457_v21  ;;  %3156 = vmatmul.bf16.vlgmr.msra.gmra.mxu3 %v6076_v33  ;;  %v6544_v33 = vpop.f32.mrf.mxu0  ;;  %v4369_v22 = vor.u32 %v5256_v29, %v4366_v9  ;;  %v4486_v21 = vld [vmem:[%s5832_s30 + $0x7b8] sm:$0xf0]  ;;  %v5282_v29 = vld [vmem:[%s5832_s30 + $0x794] sm:$0xf] }
 0x151   : > { %3200 = vmatpush.bf16.msrb.mxu3 %v4521_v50  ;;  %v5236_v50 = vld [vmem:[%s5832_s30 + $0x624] sm:$0xf]  ;;  %v4489_v54 = vor.u32 %v5286_v40, %v4486_v21  ;;  %v5326_v36 = vld [vmem:[%s5832_s30 + $0x8f4] sm:$0xf]  ;;  %v4273_v21 = vor.u32 %v5232_v10, %v4270_v11  ;;  %v4694_v11 = vld [vmem:[%s5832_s30 + $0x958] sm:$0xf0] }
 0x152   : > { %3162 = vmatpush.bf16.msrb.mxu0 %v4321_v56  ;;  %v6561_v55 = vpop.f32.mrf.mxu2  ;;  %v5268_v56 = vld [vmem:[%s5832_s30 + $0x724] sm:$0xf]  ;;  %v4289_v60 = vor.u32 %v5236_v50, %v4286_v51  ;;  %v5338_v10 = vld [vmem:[%s5832_s30 + $0x954] sm:$0xf] }
 0x153   : > { %3175 = vmatpush.bf16.msrb.mxu1 %v4385_v57  ;;  %v4414_v57 = vld [vmem:[%s5832_s30 + $0x728] sm:$0xf0]  ;;  %v6568_v41 = vpop.f32.mrf.mxu3  ;;  %v2925_v44 = vpop.f32.mrf.mxu1 }
 0x154   : > { %3188 = vmatpush.bf16.msrb.mxu2 %v4449_v58  ;;  %v2859_v58 = vadd.f32 %v6468_v61, %v6416_v24  ;;  %v4417_v63 = vor.u32 %v5268_v56, %v4414_v57  ;;  %v5234_v24 = vld [vmem:[%s5832_s30 + $0x614] sm:$0xf]  ;;  %v4278_v61 = vld [vmem:[%s5832_s30 + $0x618] sm:$0xf0] }
 0x155   : > { %3201 = vmatpush.bf16.msrb.mxu3 %v4513_v59  ;;  %v4281_v9 = vor.u32 %v5234_v24, %v4278_v61  ;;  %v4702_v24 = vld [vmem:[%s5832_s30 + $0x968] sm:$0xf0]  ;;  %v5356_v61 = vld [vmem:[%s5832_s30 + $0x9e4] sm:$0xf] }
 0x156   : > { %3163 = vmatpush.bf16.msrb.mxu0 %v4313_v25  ;;  %v4481_v25 = vor.u32 %v5284_v42, %v4478_v52  ;;  %v2872_v7 = vadd.f32 %v6472_v0, %v2859_v58  ;;  %v5248_v0 = vld [vmem:[%s5832_s30 + $0x684] sm:$0xf] }
 0x157   : > { %3176 = vmatpush.bf16.msrb.mxu1 %v4377_v2  ;;  %v4342_v2 = vld [vmem:[%s5832_s30 + $0x698] sm:$0xf0] }
 0x158   : > { %3189 = vmatpush.bf16.msrb.mxu2 %v4441_v3  ;;  %v2912_v59 = vpop.f32.mrf.mxu0  ;;  %v5266_v3 = vld [vmem:[%s5832_s30 + $0x714] sm:$0xf]  ;;  %v2885_v14 = vadd.f32 %v6485_v20, %v2872_v7  ;;  %v4345_v15 = vor.u32 %v5250_v1, %v4342_v2  ;;  %v4766_v1 = vld [vmem:[%s5832_s30 + $0x9e8] sm:$0xf0]  ;;  %v4566_v7 = vld [vmem:[%s5832_s30 + $0x858] sm:$0xf0] }
 0x159   : > { %3202 = vmatpush.bf16.msrb.mxu3 %v4505_v30  ;;  %v4470_v30 = vld [vmem:[%s5832_s30 + $0x798] sm:$0xf0]  ;;  %v5310_v20 = vld [vmem:[%s5832_s30 + $0x874] sm:$0xf]  ;;  %v5308_v59 = vld [vmem:[%s5832_s30 + $0x864] sm:$0xf] }
 0x15a   : > { %3164 = vmatpush.bf16.msrb.mxu0 %v4305_v17  ;;  %v4409_v17 = vor.u32 %v5266_v3, %v4406_v5  ;;  %v4473_v4 = vor.u32 %v5282_v29, %v4470_v30  ;;  %v2938_v6 = vpop.f32.mrf.mxu2  ;;  %v2898_v50 = vadd.f32 %v6490_v39, %v2885_v14  ;;  %v4585_v57 = vor.u32 %v5310_v20, %v4582_v34  ;;  %v4574_v39 = vld [vmem:[%s5832_s30 + $0x868] sm:$0xf0]  ;;  %v5306_v5 = vld [vmem:[%s5832_s30 + $0x854] sm:$0xf] }
 0x15b   : > { %3177 = vmatpush.bf16.msrb.mxu1 %v4369_v22  ;;  %v4334_v22 = vld [vmem:[%s5832_s30 + $0x688] sm:$0xf0]  ;;  %v2951_v40 = vpop.f32.mrf.mxu3  ;;  %v5322_v29 = vld [vmem:[%s5832_s30 + $0x8d4] sm:$0xf]  ;;  %v4769_v30 = vor.u32 %v5356_v61, %v4766_v1 }
 0x15c   : > { %3190 = vmatpush.bf16.msrb.mxu2 %v4433_v19  ;;  %v5264_v19 = vld [vmem:[%s5832_s30 + $0x704] sm:$0xf]  ;;  %v4337_v51 = vor.u32 %v5248_v0, %v4334_v22  ;;  %v2911_v58 = vadd.f32 %v6544_v33, %v2898_v50  ;;  %v4577_v33 = vor.u32 %v5308_v59, %v4574_v39  ;;  %v5354_v14 = vld [vmem:[%s5832_s30 + $0x9d4] sm:$0xf]  ;;  %v4750_v6 = vld [vmem:[%s5832_s30 + $0x9c8] sm:$0xf0] }
 0x15d   : > { %3203 = vmatpush.bf16.msrb.mxu3 %v4497_v32  ;;  %v4462_v32 = vld [vmem:[%s5832_s30 + $0x788] sm:$0xf0]  ;;  %v4401_v53 = vor.u32 %v5264_v19, %v4398_v26  ;;  %v5304_v0 = vld [vmem:[%s5832_s30 + $0x844] sm:$0xf]  ;;  %v4614_v50 = vld [vmem:[%s5832_s30 + $0x8b8] sm:$0xf0] }
 0x15e   : > { %3165 = vmatpush.bf16.msrb.mxu0 %v4297_v43  ;;  %v4646_v43 = vld [vmem:[%s5832_s30 + $0x8f8] sm:$0xf0]  ;;  %v4465_v56 = vor.u32 %v5280_v27, %v4462_v32  ;;  %v5320_v22 = vld [vmem:[%s5832_s30 + $0x8c4] sm:$0xf]  ;;  %v4622_v19 = vld [vmem:[%s5832_s30 + $0x8c8] sm:$0xf0] }
 0x15f   : > { %3178 = vmatpush.bf16.msrb.mxu1 %v4361_v47  ;;  %v5342_v47 = vld [vmem:[%s5832_s30 + $0x974] sm:$0xf]  ;;  %v4649_v42 = vor.u32 %v5326_v36, %v4646_v43  ;;  %v5352_v32 = vld [vmem:[%s5832_s30 + $0x9c4] sm:$0xf]  ;;  %v4625_v40 = vor.u32 %v5320_v22, %v4622_v19  ;;  %v4542_v39 = vld [vmem:[%s5832_s30 + $0x828] sm:$0xf0] }
 0x160   : > { %3191 = vmatpush.bf16.msrb.mxu2 %v4425_v48  ;;  %v4710_v48 = vld [vmem:[%s5832_s30 + $0x978] sm:$0xf0]  ;;  %v5302_v43 = vld [vmem:[%s5832_s30 + $0x834] sm:$0xf]  ;;  %v5300_v59 = vld [vmem:[%s5832_s30 + $0x824] sm:$0xf] }
 0x161   : > { %3204 = vmatpush.bf16.msrb.mxu3 %v4489_v54  ;;  %v5358_v54 = vld [vmem:[%s5832_s30 + $0x9f4] sm:$0xf]  ;;  %v4713_v52 = vor.u32 %v5342_v47, %v4710_v48  ;;  %v4550_v47 = vld [vmem:[%s5832_s30 + $0x838] sm:$0xf0]  ;;  %v4753_v48 = vor.u32 %v5352_v32, %v4750_v6  ;;  %v4670_v61 = vld [vmem:[%s5832_s30 + $0x928] sm:$0xf0] }
 0x162   : > { %3166 = vmatpush.bf16.msrb.mxu0 %v4289_v60  ;;  %v5324_v60 = vld [vmem:[%s5832_s30 + $0x8e4] sm:$0xf]  ;;  %v4777_v44 = vor.u32 %v5358_v54, %v4774_v38  ;;  %v5350_v54 = vld [vmem:[%s5832_s30 + $0x9b4] sm:$0xf]  ;;  %v4742_v38 = vld [vmem:[%s5832_s30 + $0x9b8] sm:$0xf0] }
 0x163   : > { %3179 = vmatpush.bf16.msrb.mxu1 %v4353_v62  ;;  %v4638_v62 = vld [vmem:[%s5832_s30 + $0x8e8] sm:$0xf0]  ;;  %v4726_v22 = vld [vmem:[%s5832_s30 + $0x998] sm:$0xf0] }
 0x164   : > { %3192 = vmatpush.bf16.msrb.mxu2 %v4417_v63  ;;  %v5340_v63 = vld [vmem:[%s5832_s30 + $0x964] sm:$0xf]  ;;  %v4641_v2 = vor.u32 %v5324_v60, %v4638_v62 }
 0x165   : > { %3205 = vmatpush.bf16.msrb.mxu3 %v4481_v25  ;;  %v2924_v25 = vadd.f32 %v6548_v18, %v2911_v58  ;;  %v4705_v3 = vor.u32 %v5340_v63, %v4702_v24  ;;  %v5316_v60 = vld [vmem:[%s5832_s30 + $0x8a4] sm:$0xf]  ;;  %v4606_v63 = vld [vmem:[%s5832_s30 + $0x8a8] sm:$0xf0] }
 0x166   : > { %3167 = vmatpush.bf16.msrb.mxu0 %v4281_v9  ;;  %v4630_v9 = vld [vmem:[%s5832_s30 + $0x8d8] sm:$0xf0]  ;;  %v5332_v24 = vld [vmem:[%s5832_s30 + $0x924] sm:$0xf] }
 0x167   : > { %3180 = vmatpush.bf16.msrb.mxu1 %v4345_v15  ;;  %v2937_v18 = vadd.f32 %v6561_v55, %v2924_v25  ;;  %v4758_v15 = vld [vmem:[%s5832_s30 + $0x9d8] sm:$0xf0]  ;;  %v4697_v55 = vor.u32 %v5338_v10, %v4694_v11  ;;  %v4673_v10 = vor.u32 %v5332_v24, %v4670_v61  ;;  %v5298_v11 = vld [vmem:[%s5832_s30 + $0x814] sm:$0xf]  ;;  %v4830_v24 = vld [vmem:[%s5832_s30 + $0xa68] sm:$0xf0] }
 0x168   : > { %3193 = vmatpush.bf16.msrb.mxu2 %v4409_v17  ;;  %v4633_v17 = vor.u32 %v5322_v29, %v4630_v9  ;;  %v4609_v9 = vor.u32 %v5316_v60, %v4606_v63  ;;  %v5372_v63 = vld [vmem:[%s5832_s30 + $0xa64] sm:$0xf] }
 0x169   : > { %3206 = vmatpush.bf16.msrb.mxu3 %v4473_v4  ;;  %v5336_v4 = vld [vmem:[%s5832_s30 + $0x944] sm:$0xf]  ;;  %v2950_v26 = vadd.f32 %v6568_v41, %v2937_v18  ;;  %v5318_v41 = vld [vmem:[%s5832_s30 + $0x8b4] sm:$0xf]  ;;  %v4534_v18 = vld [vmem:[%s5832_s30 + $0x818] sm:$0xf0] }
 0x16a   : > { %3168 = vmatpush.bf16.msrb.mxu0 %v4273_v21  ;;  %v2962_v27 = vpop.f32.mrf.mxu0  ;;  %v4537_v19 = vor.u32 %v5298_v11, %v4534_v18  ;;  %v5388_v61 = vld [vmem:[%s5832_s30 + $0xae4] sm:$0xf]  ;;  %v5386_v11 = vld [vmem:[%s5832_s30 + $0xad4] sm:$0xf] }
 0x16b   : > { %3181 = vmatpush.bf16.msrb.mxu1 %v4337_v51  ;;  %v2975_v34 = vpop.f32.mrf.mxu1  ;;  %v2963_v36 = vadd.f32 %v2962_v27, %v2950_v26  ;;  %v5334_v51 = vld [vmem:[%s5832_s30 + $0x934] sm:$0xf]  ;;  %v4590_v26 = vld [vmem:[%s5832_s30 + $0x888] sm:$0xf0] }
 0x16c   : > { %3194 = vmatpush.bf16.msrb.mxu2 %v4401_v53  ;;  %v4678_v53 = vld [vmem:[%s5832_s30 + $0x938] sm:$0xf0] }
 0x16d   : > { %3207 = vmatpush.bf16.msrb.mxu3 %v4465_v56  ;;  %3169 = vmatmul.bf16.vlgmr.msrb.gmra.mxu0 %v6141_v23  ;;  %v4569_v23 = vor.u32 %v5306_v5, %v4566_v7  ;;  %v4553_v56 = vor.u32 %v5302_v43, %v4550_v47  ;;  %v2976_v58 = vadd.f32 %v2975_v34, %v2963_v36  ;;  %v4654_v36 = vld [vmem:[%s5832_s30 + $0x908] sm:$0xf0] }
 0x16e   : > { %3213 = vmatpush.bf16.msra.mxu0 %v4585_v57  ;;  %3182 = vmatmul.bf16.vlgmr.msrb.gmra.mxu1 %v6148_v31  ;;  %v4761_v31 = vor.u32 %v5354_v14, %v4758_v15  ;;  %v6642_v57 = vld [vmem:[%s251_s10] sm:$0x3]  ;;  %v4545_v7 = vor.u32 %v5300_v59, %v4542_v39  ;;  %v5314_v14 = vld [vmem:[%s5832_s30 + $0x894] sm:$0xf]  ;;  %v5030_v59 = vld [vmem:[%s5832_s30 + $0xbf8] sm:$0xf0] }
 0x16f   : > { %3226 = vmatpush.bf16.msra.mxu1 %v4649_v42  ;;  %3195 = vmatmul.bf16.vlgmr.msrb.gmra.mxu2 %v6146_v28  ;;  %v4558_v28 = vld [vmem:[%s5832_s30 + $0x848] sm:$0xf0]  ;;  %v4617_v42 = vor.u32 %v5318_v41, %v4614_v50  ;;  %v3328_v25 = vperm.slane %v6642_v57, 0  ;;  %v5374_v41 = vld [vmem:[%s5832_s30 + $0xa74] sm:$0xf] }
 0x170   : > { %3239 = vmatpush.bf16.msra.mxu2 %v4713_v52  ;;  %3208 = vmatmul.bf16.vlgmr.msrb.gmra.mxu3 %v6152_v35  ;;  %v4686_v35 = vld [vmem:[%s5832_s30 + $0x948] sm:$0xf0]  ;;  %v4561_v20 = vor.u32 %v5304_v0, %v4558_v28  ;;  %v4681_v52 = vor.u32 %v5334_v51, %v4678_v53  ;;  %v5346_v28 = vld [vmem:[%s5832_s30 + $0x994] sm:$0xf] }
 0x171   : > { %3252 = vmatpush.bf16.msra.mxu3 %v4777_v44  ;;  %v4689_v21 = vor.u32 %v5336_v4, %v4686_v35  ;;  %v4745_v44 = vor.u32 %v5350_v54, %v4742_v38  ;;  %v4526_v4 = vld [vmem:[%s5832_s30 + $0x808] sm:$0xf0]  ;;  %v5312_v35 = vld [vmem:[%s5832_s30 + $0x884] sm:$0xf]  ;;  %v4729_v34 = vor.u32 %v5346_v28, %v4726_v22  ;;  %v5390_v50 = vld [vmem:[%s5832_s30 + $0xaf4] sm:$0xf] }
 0x172   : > { %3214 = vmatpush.bf16.msra.mxu0 %v4577_v33  ;;  %v2988_v62 = vpop.f32.mrf.mxu2  ;;  %v2964_v5 = vpop.f32.mrf.mxu0  ;;  %v4902_v54 = vld [vmem:[%s5832_s30 + $0xaf8] sm:$0xf0]  ;;  %v5406_v38 = vld [vmem:[%s5832_s30 + $0xb74] sm:$0xf]  ;;  %v5368_v22 = vld [vmem:[%s5832_s30 + $0xa44] sm:$0xf] }
 0x173   : > { %3227 = vmatpush.bf16.msra.mxu1 %v4641_v2  ;;  %v2989_v1 = vadd.f32 %v2988_v62, %v2976_v58  ;;  %v3001_v33 = vpop.f32.mrf.mxu3  ;;  %v5348_v2 = vld [vmem:[%s5832_s30 + $0x9a4] sm:$0xf]  ;;  %v2977_v29 = vpop.f32.mrf.mxu1  ;;  %v4593_v58 = vor.u32 %v5312_v35, %v4590_v26  ;;  %v5022_v5 = vld [vmem:[%s5832_s30 + $0xbe8] sm:$0xf0] }
 0x174   : > { %3240 = vmatpush.bf16.msra.mxu2 %v4705_v3  ;;  %v4734_v3 = vld [vmem:[%s5832_s30 + $0x9a8] sm:$0xf0] }
 0x175   : > { %3253 = vmatpush.bf16.msra.mxu3 %v4769_v30  ;;  %v3002_v30 = vadd.f32 %v3001_v33, %v2989_v1  ;;  %v4737_v15 = vor.u32 %v5348_v2, %v4734_v3  ;;  %v4894_v33 = vld [vmem:[%s5832_s30 + $0xae8] sm:$0xf0]  ;;  %v5420_v3 = vld [vmem:[%s5832_s30 + $0xbe4] sm:$0xf] }
 0x176   : > { %3215 = vmatpush.bf16.msra.mxu0 %v4569_v23  ;;  %v4598_v23 = vld [vmem:[%s5832_s30 + $0x898] sm:$0xf0]  ;;  %v4958_v2 = vld [vmem:[%s5832_s30 + $0xb68] sm:$0xf0]  ;;  %v4897_v29 = vor.u32 %v5388_v61, %v4894_v33  ;;  %v5025_v18 = vor.u32 %v5420_v3, %v5022_v5  ;;  %v5412_v61 = vld [vmem:[%s5832_s30 + $0xba4] sm:$0xf] }
 0x177   : > { %3228 = vmatpush.bf16.msra.mxu1 %v4633_v17  ;;  %v5330_v17 = vld [vmem:[%s5832_s30 + $0x914] sm:$0xf]  ;;  %v3332_v0 = vadd.f32 %v3328_v25, %v3002_v30  ;;  %v4601_v32 = vor.u32 %v5314_v14, %v4598_v23  ;;  %v5404_v25 = vld [vmem:[%s5832_s30 + $0xb64] sm:$0xf]  ;;  %v4886_v14 = vld [vmem:[%s5832_s30 + $0xad8] sm:$0xf0] }
 0x178   : > { %3241 = vmatpush.bf16.msra.mxu2 %v4697_v55  ;;  %v4662_v55 = vld [vmem:[%s5832_s30 + $0x918] sm:$0xf0]  ;;  %v4961_v30 = vor.u32 %v5404_v25, %v4958_v2  ;;  %v4942_v35 = vld [vmem:[%s5832_s30 + $0xb48] sm:$0xf0] }
 0x179   : > { %3254 = vmatpush.bf16.msra.mxu3 %v4761_v31  ;;  %v5296_v31 = vld [vmem:[%s5832_s30 + $0x804] sm:$0xf]  ;;  %vm3334_vm0 = vcmp.gt.f32.partialorder %v3332_v0, 0.0  ;;  %v3336_v27 = vmul.f32 0.1, %v3332_v0  ;;  %v4665_v6 = vor.u32 %v5330_v17, %v4662_v55 }
 0x17a   : > { %3216 = vmatpush.bf16.msra.mxu0 %v4561_v20  ;;  %v5328_v20 = vld [vmem:[%s5832_s30 + $0x904] sm:$0xf]  ;;  %v2990_v43 = vpop.f32.mrf.mxu2  ;;  %v4529_v53 = vor.u32 %v5296_v31, %v4526_v4  ;;  %v4950_v23 = vld [vmem:[%s5832_s30 + $0xb58] sm:$0xf0]  ;;  %v5418_v17 = vld [vmem:[%s5832_s30 + $0xbd4] sm:$0xf] }
 0x17b   : > { %3229 = vmatpush.bf16.msra.mxu1 %v4625_v40  ;;  %v5344_v40 = vld [vmem:[%s5832_s30 + $0x984] sm:$0xf]  ;;  %v3338_v47 = vsel %vm3334_vm0, %v3332_v0, %v3336_v27  ;;  %v3003_v51 = vpop.f32.mrf.mxu3  ;;  %v5014_v55 = vld [vmem:[%s5832_s30 + $0xbd8] sm:$0xf0]  ;;  %v4889_v0 = vor.u32 %v5386_v11, %v4886_v14  ;;  %v4814_v31 = vld [vmem:[%s5832_s30 + $0xa48] sm:$0xf0] }
 0x17c   : > { %3242 = vmatpush.bf16.msra.mxu2 %v4689_v21  ;;  %v4718_v21 = vld [vmem:[%s5832_s30 + $0x988] sm:$0xf0]  ;;  %3340 = vst [vmem:[%s6678_s27] sm:$0xff] %v3338_v47  ;;  %v5400_v4 = vld [vmem:[%s5832_s30 + $0xb44] sm:$0xf]  ;;  %v4817_v27 = vor.u32 %v5368_v22, %v4814_v31  ;;  %v4870_v47 = vld [vmem:[%s5832_s30 + $0xab8] sm:$0xf0] }
 0x17d   : > { %3255 = vmatpush.bf16.msra.mxu3 %v4753_v48  ;;  %v4838_v48 = vld [vmem:[%s5832_s30 + $0xa78] sm:$0xf0]  ;;  %v4721_v39 = vor.u32 %v5344_v40, %v4718_v21  ;;  %v5006_v26 = vld [vmem:[%s5832_s30 + $0xbc8] sm:$0xf0]  ;;  %v5382_v40 = vld [vmem:[%s5832_s30 + $0xab4] sm:$0xf] }
 0x17e   : > { %3217 = vmatpush.bf16.msra.mxu0 %v4553_v56  ;;  %v4966_v56 = vld [vmem:[%s5832_s30 + $0xb78] sm:$0xf0]  ;;  %v4841_v60 = vor.u32 %v5374_v41, %v4838_v48  ;;  %v5398_v41 = vld [vmem:[%s5832_s30 + $0xb34] sm:$0xf]  ;;  %v5376_v22 = vld [vmem:[%s5832_s30 + $0xa84] sm:$0xf] }
 0x17f   : > { %3230 = vmatpush.bf16.msra.mxu1 %v4617_v42  ;;  %v4657_v42 = vor.u32 %v5328_v20, %v4654_v36  ;;  %v4969_v62 = vor.u32 %v5406_v38, %v4966_v56  ;;  %v4945_v20 = vor.u32 %v5400_v4, %v4942_v35  ;;  %v4806_v36 = vld [vmem:[%s5832_s30 + $0xa38] sm:$0xf0]  ;;  %v5414_v51 = vld [vmem:[%s5832_s30 + $0xbb4] sm:$0xf]  ;;  %v4873_v38 = vor.u32 %v5382_v40, %v4870_v47  ;;  %v4910_v4 = vld [vmem:[%s5832_s30 + $0xb08] sm:$0xf0] }
 0x180   : > { %3243 = vmatpush.bf16.msra.mxu2 %v4681_v52  ;;  %v5422_v52 = vld [vmem:[%s5832_s30 + $0xbf4] sm:$0xf]  ;;  %v4934_v48 = vld [vmem:[%s5832_s30 + $0xb38] sm:$0xf0] }
 0x181   : > { %3256 = vmatpush.bf16.msra.mxu3 %v4745_v44  ;;  %v4905_v44 = vor.u32 %v5390_v50, %v4902_v54  ;;  %v5033_v1 = vor.u32 %v5422_v52, %v5030_v59  ;;  %v4937_v56 = vor.u32 %v5398_v41, %v4934_v48  ;;  %v5380_v52 = vld [vmem:[%s5832_s30 + $0xaa4] sm:$0xf]  ;;  %v4854_v11 = vld [vmem:[%s5832_s30 + $0xa98] sm:$0xf0] }
 0x182   : > { %3218 = vmatpush.bf16.msra.mxu0 %v4545_v7  ;;  %v4833_v7 = vor.u32 %v5372_v63, %v4830_v24  ;;  %v4918_v14 = vld [vmem:[%s5832_s30 + $0xb18] sm:$0xf0] }
 0x183   : > { %3231 = vmatpush.bf16.msra.mxu1 %v4609_v9  ;;  %v5370_v9 = vld [vmem:[%s5832_s30 + $0xa54] sm:$0xf] }
 0x184   : > { %3244 = vmatpush.bf16.msra.mxu2 %v4673_v10  ;;  %v4822_v10 = vld [vmem:[%s5832_s30 + $0xa58] sm:$0xf0] }
 0x185   : > { %3257 = vmatpush.bf16.msra.mxu3 %v4737_v15  ;;  %v5402_v15 = vld [vmem:[%s5832_s30 + $0xb54] sm:$0xf] }
 0x186   : > { %3219 = vmatpush.bf16.msra.mxu0 %v4537_v19  ;;  %v4953_v28 = vor.u32 %v5402_v15, %v4950_v23  ;;  %v4878_v19 = vld [vmem:[%s5832_s30 + $0xac8] sm:$0xf0]  ;;  %v5410_v15 = vld [vmem:[%s5832_s30 + $0xb94] sm:$0xf]  ;;  %v4982_v23 = vld [vmem:[%s5832_s30 + $0xb98] sm:$0xf0] }
 0x187   : > { %3232 = vmatpush.bf16.msra.mxu1 %v4601_v32 }
 0x188   : > { %3245 = vmatpush.bf16.msra.mxu2 %v4665_v6 }
 0x189   : > { %3258 = vmatpush.bf16.msra.mxu3 %v4729_v34  ;;  %v5366_v34 = vld [vmem:[%s5832_s30 + $0xa34] sm:$0xf] }
 0x18a   : > { %3220 = vmatpush.bf16.msra.mxu0 %v4529_v53  ;;  %v3014_v32 = vpop.f32.mrf.mxu0  ;;  %v4998_v53 = vld [vmem:[%s5832_s30 + $0xbb8] sm:$0xf0]  ;;  %v4809_v54 = vor.u32 %v5366_v34, %v4806_v36 }
 0x18b   : > { %3233 = vmatpush.bf16.msra.mxu1 %v4593_v58  ;;  %v3027_v21 = vpop.f32.mrf.mxu1  ;;  %v5364_v58 = vld [vmem:[%s5832_s30 + $0xa24] sm:$0xf] }
 0x18c   : > { %3246 = vmatpush.bf16.msra.mxu2 %v4657_v42  ;;  %v3028_v50 = vadd.f32 %v3027_v21, %v3014_v32  ;;  %v4798_v42 = vld [vmem:[%s5832_s30 + $0xa28] sm:$0xf0] }
 0x18d   : > { %3259 = vmatpush.bf16.msra.mxu3 %v4721_v39  ;;  %3221 = vmatmul.bf16.vlgmr.msra.gmra.mxu0 %v6217_v37  ;;  %v4825_v37 = vor.u32 %v5370_v9, %v4822_v10  ;;  %v5001_v39 = vor.u32 %v5414_v51, %v4998_v53  ;;  %v4801_v33 = vor.u32 %v5364_v58, %v4798_v42 }
 0x18e   : > { %3265 = vmatpush.bf16.msrb.mxu0 %v4841_v60  ;;  %3234 = vmatmul.bf16.vlgmr.msra.gmra.mxu1 %v6224_v46  ;;  %v5017_v46 = vor.u32 %v5418_v17, %v5014_v55  ;;  %v4862_v60 = vld [vmem:[%s5832_s30 + $0xaa8] sm:$0xf0] }
 0x18f   : > { %3278 = vmatpush.bf16.msrb.mxu1 %v4905_v44  ;;  %3247 = vmatmul.bf16.vlgmr.msra.gmra.mxu2 %v6222_v45  ;;  %v5384_v45 = vld [vmem:[%s5832_s30 + $0xac4] sm:$0xf]  ;;  %v4865_v3 = vor.u32 %v5380_v52, %v4862_v60 }
 0x190   : > { %3291 = vmatpush.bf16.msrb.mxu2 %v4969_v62  ;;  %3260 = vmatmul.bf16.vlgmr.msra.gmra.mxu3 %v6228_v49  ;;  %v5416_v49 = vld [vmem:[%s5832_s30 + $0xbc4] sm:$0xf]  ;;  %v4881_v6 = vor.u32 %v5384_v45, %v4878_v19  ;;  %v4926_v62 = vld [vmem:[%s5832_s30 + $0xb28] sm:$0xf0]  ;;  %v4985_v45 = vor.u32 %v5410_v15, %v4982_v23 }
 0x191   : > { %3304 = vmatpush.bf16.msrb.mxu3 %v5033_v1  ;;  %v5009_v43 = vor.u32 %v5416_v49, %v5006_v26  ;;  %v5396_v44 = vld [vmem:[%s5832_s30 + $0xb24] sm:$0xf]  ;;  %v4990_v1 = vld [vmem:[%s5832_s30 + $0xba8] sm:$0xf0] }
 0x192   : > { %3266 = vmatpush.bf16.msrb.mxu0 %v4833_v7  ;;  %v3040_v59 = vpop.f32.mrf.mxu2  ;;  %v3016_v2 = vpop.f32.mrf.mxu0  ;;  %v4929_v5 = vor.u32 %v5396_v44, %v4926_v62  ;;  %v5362_v7 = vld [vmem:[%s5832_s30 + $0xa14] sm:$0xf]  ;;  %v4993_v10 = vor.u32 %v5412_v61, %v4990_v1  ;;  %v5392_v19 = vld [vmem:[%s5832_s30 + $0xb04] sm:$0xf]  ;;  %v4974_v26 = vld [vmem:[%s5832_s30 + $0xb88] sm:$0xf0] }
 0x193   : > { %3279 = vmatpush.bf16.msrb.mxu1 %v4897_v29  ;;  %v3041_v63 = vadd.f32 %v3040_v59, %v3028_v50  ;;  %v3053_v24 = vpop.f32.mrf.mxu3  ;;  %v4790_v29 = vld [vmem:[%s5832_s30 + $0xa18] sm:$0xf0]  ;;  %v3029_v9 = vpop.f32.mrf.mxu1  ;;  %v5408_v49 = vld [vmem:[%s5832_s30 + $0xb84] sm:$0xf] }
 0x194   : > { %3292 = vmatpush.bf16.msrb.mxu2 %v4961_v30  ;;  %v5378_v30 = vld [vmem:[%s5832_s30 + $0xa94] sm:$0xf]  ;;  %v4793_v17 = vor.u32 %v5362_v7, %v4790_v29 }
 0x195   : > { %3305 = vmatpush.bf16.msrb.mxu3 %v5025_v18  ;;  %v3054_v25 = vadd.f32 %v3053_v24, %v3041_v63  ;;  %v5394_v18 = vld [vmem:[%s5832_s30 + $0xb14] sm:$0xf]  ;;  %v4857_v55 = vor.u32 %v5378_v30, %v4854_v11 }
 0x196   : > { %3267 = vmatpush.bf16.msrb.mxu0 %v4825_v37  ;;  %v4921_v37 = vor.u32 %v5394_v18, %v4918_v14 }
 0x197   : > { %3280 = vmatpush.bf16.msrb.mxu1 %v4889_v0  ;;  %v5360_v0 = vld [vmem:[%s5832_s30 + $0xa04] sm:$0xf] }
 0x198   : > { %3293 = vmatpush.bf16.msrb.mxu2 %v4953_v28  ;;  %v4782_v28 = vld [vmem:[%s5832_s30 + $0xa08] sm:$0xf0] }
 0x199   : > { %3306 = vmatpush.bf16.msrb.mxu3 %v5017_v46  ;;  %v4846_v46 = vld [vmem:[%s5832_s30 + $0xa88] sm:$0xf0] }
 0x19a   : > { %3268 = vmatpush.bf16.msrb.mxu0 %v4817_v27  ;;  %v3042_v31 = vpop.f32.mrf.mxu2  ;;  %v4785_v27 = vor.u32 %v5360_v0, %v4782_v28  ;;  %v4849_v32 = vor.u32 %v5376_v22, %v4846_v46 }
 0x19b   : > { %3281 = vmatpush.bf16.msrb.mxu1 %v4881_v6  ;;  %v3055_v35 = vpop.f32.mrf.mxu3  ;;  %v4913_v6 = vor.u32 %v5392_v19, %v4910_v4  ;;  %v3329_v4 = vperm.slane %v6642_v57, 1 }
 0x19c   : > { %3294 = vmatpush.bf16.msrb.mxu2 %v4945_v20  ;;  %v4977_v20 = vor.u32 %v5408_v49, %v4974_v26 }
 0x19d   : > { %3307 = vmatpush.bf16.msrb.mxu3 %v5009_v43 }
 0x19e   : > { %3269 = vmatpush.bf16.msrb.mxu0 %v4809_v54 }
 0x19f   : > { %3282 = vmatpush.bf16.msrb.mxu1 %v4873_v38 }
 0x1a0   : > { %3295 = vmatpush.bf16.msrb.mxu2 %v4937_v56 }
 0x1a1   : > { %3308 = vmatpush.bf16.msrb.mxu3 %v5001_v39 }
 0x1a2   : > { %3270 = vmatpush.bf16.msrb.mxu0 %v4801_v33 }
 0x1a3   : > { %3283 = vmatpush.bf16.msrb.mxu1 %v4865_v3 }
 0x1a4   : > { %3296 = vmatpush.bf16.msrb.mxu2 %v4929_v5 }
 0x1a5   : > { %3309 = vmatpush.bf16.msrb.mxu3 %v4993_v10 }
 0x1a6   : > { %3271 = vmatpush.bf16.msrb.mxu0 %v4793_v17 }
 0x1a7   : > { %3284 = vmatpush.bf16.msrb.mxu1 %v4857_v55 }
 0x1a8   : > { %3297 = vmatpush.bf16.msrb.mxu2 %v4921_v37 }
 0x1a9   : > { %3310 = vmatpush.bf16.msrb.mxu3 %v4985_v45 }
 0x1aa   : > { %3272 = vmatpush.bf16.msrb.mxu0 %v4785_v27  ;;  %v3066_v34 = vpop.f32.mrf.mxu0 }
 0x1ab   : > { %3285 = vmatpush.bf16.msrb.mxu1 %v4849_v32  ;;  %v3067_v36 = vadd.f32 %v3066_v34, %v3054_v25  ;;  %v3079_v40 = vpop.f32.mrf.mxu1 }
 0x1ac   : > { %3298 = vmatpush.bf16.msrb.mxu2 %v4913_v6 }
 0x1ad   : > { %3311 = vmatpush.bf16.msrb.mxu3 %v4977_v20  ;;  %3273 = vmatmul.bf16.vlgmr.msrb.gmra.mxu0 %v6295_v8  ;;  %v3080_v21 = vadd.f32 %v3079_v40, %v3067_v36 }
 0x1ae   : > { %3286 = vmatmul.bf16.vlgmr.msrb.gmra.mxu1 %v6302_v13 }
 0x1af   : > { %3299 = vmatmul.bf16.vlgmr.msrb.gmra.mxu2 %v6300_v12 }
 0x1b0   : > { %3312 = vmatmul.bf16.vlgmr.msrb.gmra.mxu3 %v6306_v16 }
 0x1b2   : > { %v3092_v43 = vpop.f32.mrf.mxu2  ;;  %v3068_v50 = vpop.f32.mrf.mxu0 }
 0x1b3   : > { %v3093_v47 = vadd.f32 %v3092_v43, %v3080_v21  ;;  %v3105_v41 = vpop.f32.mrf.mxu3  ;;  %v3081_v51 = vpop.f32.mrf.mxu1 }
 0x1b5   : > { %v3106_v48 = vadd.f32 %v3105_v41, %v3093_v47 }
 0x1ba   : > { %v3094_v53 = vpop.f32.mrf.mxu2 }
 0x1bb   : > { %v3107_v54 = vpop.f32.mrf.mxu3 }
 0x1ca   : > { %v3118_v38 = vpop.f32.mrf.mxu0 }
 0x1cb   : > { %v3119_v8 = vadd.f32 %v3118_v38, %v3106_v48  ;;  %v3131_v56 = vpop.f32.mrf.mxu1 }
 0x1cd   : > { %v3132_v13 = vadd.f32 %v3131_v56, %v3119_v8 }
 0x1d2   : > { %v3144_v58 = vpop.f32.mrf.mxu2  ;;  %v3120_v16 = vpop.f32.mrf.mxu0 }
 0x1d3   : > { %v3145_v12 = vadd.f32 %v3144_v58, %v3132_v13  ;;  %v3157_v42 = vpop.f32.mrf.mxu3  ;;  %v3133_v52 = vpop.f32.mrf.mxu1 }
 0x1d5   : > { %v3158_v59 = vadd.f32 %v3157_v42, %v3145_v12 }
 0x1da   : > { %v3146_v39 = vpop.f32.mrf.mxu2 }
 0x1db   : > { %v3159_v60 = vpop.f32.mrf.mxu3 }
 0x1ea   : > { %v3170_v44 = vpop.f32.mrf.mxu0 }
 0x1eb   : > { %v3183_v62 = vpop.f32.mrf.mxu1  ;;  %v3171_v5 = vadd.f32 %v3170_v44, %v3158_v59 }
 0x1ed   : > { %v3184_v10 = vadd.f32 %v3183_v62, %v3171_v5 }
 0x1f2   : > { %v3196_v63 = vpop.f32.mrf.mxu2  ;;  %v3172_v61 = vpop.f32.mrf.mxu0 }
 0x1f3   : > { %v3209_v24 = vpop.f32.mrf.mxu3  ;;  %v3185_v1 = vpop.f32.mrf.mxu1  ;;  %v3197_v11 = vadd.f32 %v3196_v63, %v3184_v10 }
 0x1f5   : > { %v3210_v15 = vadd.f32 %v3209_v24, %v3197_v11 }
 0x1fa   : > { %v3198_v33 = vpop.f32.mrf.mxu2 }
 0x1fb   : > { %v3211_v25 = vpop.f32.mrf.mxu3 }
 0x20a   : > { %v3222_v2 = vpop.f32.mrf.mxu0 }
 0x20b   : > { %v3235_v3 = vpop.f32.mrf.mxu1  ;;  %v3223_v23 = vadd.f32 %v3222_v2, %v3210_v15 }
 0x20d   : > { %v3236_v17 = vadd.f32 %v3235_v3, %v3223_v23 }
 0x212   : > { %v3248_v7 = vpop.f32.mrf.mxu2  ;;  %v3224_v30 = vpop.f32.mrf.mxu0 }
 0x213   : > { %v3261_v29 = vpop.f32.mrf.mxu3  ;;  %v3237_v9 = vpop.f32.mrf.mxu1  ;;  %v3249_v55 = vadd.f32 %v3248_v7, %v3236_v17 }
 0x215   : > { %v3262_v37 = vadd.f32 %v3261_v29, %v3249_v55 }
 0x21a   : > { %v3250_v18 = vpop.f32.mrf.mxu2 }
 0x21b   : > { %v3263_v14 = vpop.f32.mrf.mxu3 }
 0x22a   : > { %v3274_v0 = vpop.f32.mrf.mxu0 }
 0x22b   : > { %v3287_v28 = vpop.f32.mrf.mxu1  ;;  %v3275_v22 = vadd.f32 %v3274_v0, %v3262_v37 }
 0x22d   : > { %v3288_v31 = vadd.f32 %v3287_v28, %v3275_v22 }
 0x232   : > { %v3300_v45 = vpop.f32.mrf.mxu2  ;;  %v3276_v35 = vpop.f32.mrf.mxu0 }
 0x233   : > { %v3301_v46 = vadd.f32 %v3300_v45, %v3288_v31  ;;  %v3313_v19 = vpop.f32.mrf.mxu3  ;;  %v3289_v49 = vpop.f32.mrf.mxu1 }
 0x235   : > { %v3314_v26 = vadd.f32 %v3313_v19, %v3301_v46 }
 0x237   : > { %v3333_v27 = vadd.f32 %v3329_v4, %v3314_v26 }
 0x239   : > { %vm3335_vm1 = vcmp.gt.f32.partialorder %v3333_v27, 0.0  ;;  %v3337_v32 = vmul.f32 0.1, %v3333_v27 }
 0x23a   : > { %v3302_v6 = vpop.f32.mrf.mxu2 }
 0x23b   : > { %v3339_v20 = vsel %vm3335_vm1, %v3333_v27, %v3337_v32  ;;  %v3315_v34 = vpop.f32.mrf.mxu3 }
 0x23c   : > { %3341 = vst [vmem:[%s6678_s27 + $0x8] sm:$0xff] %v3339_v20 }
 0x23d   : > { %5625 = shalt.err (!%p5622_p13)
}
 0x23e   : > { %5435 = dma.vmem_to_hbm [thread:$0]  (%p5792_p0), %s3359_s9, 256, %s3361_s11, %s3343_s15  }
 0x23f PF: > { %s3372_s28 = sand.u32 1, %s5664_s12   ;;  %p5449_p4 = pnand %p3489_p3, %p5796_p2 }
 0x240   : > { %s3373_s10 = scalar_lea.sflag [#allocation5], %s3372_s28 }
 0x241   : > { %p5450_p5 = pneg %p5449_p4 }
 0x243   : > { %5659 = dma.done.wait (%p5450_p5), %s3373_s10, 256  }
 0x244   : > { %5661 = vsyncadd (%p5450_p5), %s3373_s10, 4294967040  ;;  %s20_s17 = sadd.s32 1, %s5684_s17   ;;  %s6797_s12 = smov %s5668_s13 }
 0x245   : > { %p17_p1 = scmp.ge.s32.totalorder %s20_s17, 4   ;;  %s6798_s13 = smov %s5672_s14 }
 0x246   : > { %s6799_s14 = smov %s5758_s24  ;;  %s6800_s15 = smov %s5680_s16 }
 0x247   : > { %s6801_s16 = smov %s6803_s18  ;;  %19 = sbr.rel (!%p17_p1) target bundleno = 7 (0x7), region = 102 }
 0x24c   :  { %3379 = vsyncpa [#allocation4], 1 }
 0x24d   :  { %3381 = vsyncpa [#allocation4 + $0x1], 1 }
 0x24e   :  { %3382 = vsyncpa [#allocation7], 1 }
 0x24f   :  { %3384 = vsyncpa [#allocation7 + $0x1], 1 }
 0x250   :  { %3385 = vsyncpa [#allocation5], 1 }
 0x251   :  { %3387 = vsyncpa [#allocation5 + $0x1], 1 }

</bundles_post_ra>
